<compile_context>
chip_gen: v5e
topology: v5e:2x2
jax: 0.10.0
libtpu: 0.0.40
codegen_flags: <defaults>
</compile_context>

<pallas_src>
import functools

import jax
import jax.numpy as jnp
import numpy as np
from jax.experimental import pallas as pl
from jax.experimental.pallas import tpu as pltpu

_EPS = 1e-5
_LANE = 128


def _round_up(x, m):
    return (x + m - 1) // m * m


def _tpu_generation():
    try:
        kind = jax.devices()[0].device_kind.lower()
    except Exception:
        return 0
    for g in (7, 6, 5, 4, 3, 2):
        if f"v{g}" in kind:
            return g
    return 0


_GEN = _tpu_generation()


def _pick_tn(cp):
    # 256-wide output tile only where the MXU is 256 wide (v6e/v7x); 128 elsewhere (v5e: 4x128^2
    # MXU + single vst slot -> wider tiles just add accumulator/store pressure).
    wide = 256 if _GEN >= 6 else 128
    return wide if cp % wide == 0 else 128


def _vmem_limit_bytes():
    if _GEN >= 7:
        return 48 * 1024 * 1024       # v7x: 64 MiB physical per TensorCore
    if _GEN in (5, 6):
        return 96 * 1024 * 1024       # v5e / v6e: 128 MiB physical
    return 32 * 1024 * 1024           # unknown / older generations: conservative


def _compiler_params():
    return pltpu.CompilerParams(
        dimension_semantics=("parallel", "parallel"),
        vmem_limit_bytes=_vmem_limit_bytes(),
    )


def _grid_and_maps(n, num_ct, act_bytes_per_image, w_bytes_per_tile):
    """Choose grid order: batch inner (weights resident) when the weight tile is the bigger
    DMA, else batch outer (activations resident)."""
    batch_inner = w_bytes_per_tile > act_bytes_per_image
    if batch_inner:
        grid = (num_ct, n)
        bsel = lambda i, j: j           # batch index
        csel = lambda i, j: i           # cout-tile index
    else:
        grid = (n, num_ct)
        bsel = lambda i, j: i
        csel = lambda i, j: j
    return grid, bsel, csel


# ------------------------------ Pallas kernels --------------------------------

def _conv3x3_bn_kernel(x_ref, w_ref, s_ref, b_ref, o_ref, *, stride, ho, wo, relu):
    """3x3 conv (stride folded into phase decomposition) + folded BN (+ ReLU).

    x_ref : [stride*stride, 1, Hs, Ws, Cin]  phase-decomposed, spatially padded input tile
    w_ref : [3, 3, Cin, tn]                  weights for this Cout tile (bf16)
    s_ref, b_ref : [1, tn]                   folded BN scale / bias (f32)
    o_ref : [1, ho, wo, tn]
    """
    s = stride
    cin = w_ref.shape[2]
    tn = o_ref.shape[-1]
    # 9 accumulated MXU matmuls (K = Cin each), accumulated in a LOCAL f32 value so the
    # accumulator never bounces through VMEM (no read-modify-write per tap).
    acc = None
    for kh in range(3):
        for kw in range(3):
            p = (kh % s) * s + (kw % s)          # which stride-phase image
            oh, ow = kh // s, kw // s            # static offset inside that phase image
            patch = x_ref[p, 0, oh:oh + ho, ow:ow + wo, :].reshape(ho * wo, cin)
            d = jnp.dot(patch, w_ref[kh, kw], preferred_element_type=jnp.float32)
            acc = d if acc is None else acc + d
    out = acc * s_ref[...] + b_ref[...]          # BN affine applied once in the epilogue (f32)
    if relu:
        out = jnp.maximum(out, 0.0)
    o_ref[0] = out.reshape(ho, wo, tn).astype(o_ref.dtype)


def _conv3x3_bn_add_relu_kernel(*refs, ho, wo, project):
    """Second 3x3 conv (stride 1) + BN, fused with the shortcut, residual add and final ReLU.

    project=True : refs = (y, w, s, b, xs, wsc, ssc, bsc, out, ypad_scratch)
    project=False: refs = (y, w, s, b, xs, out, ypad_scratch)   (identity shortcut)

    y_ref  : [1, ho, wo, C]   UNPADDED conv1 output tile (halo built in VMEM, no HBM pad)
    w_ref  : [3, 3, C, tn]
    xs_ref : [1, ho, wo, Csc] (projection)  /  [1, ho, wo, tn] (identity)
    """
    if project:
        (y_ref, w_ref, s_ref, b_ref, xs_ref, wsc_ref, ssc_ref, bsc_ref,
         o_ref, ypad_ref) = refs
    else:
        y_ref, w_ref, s_ref, b_ref, xs_ref, o_ref, ypad_ref = refs

    c = w_ref.shape[2]
    tn = o_ref.shape[-1]

    # Build the zero-padded (ho+2, wo+2, C) tile in VMEM scratch. Cheap (one VMEM pass)
    # compared to the HBM write+read round trip it replaces.
    ypad_ref[...] = jnp.zeros_like(ypad_ref)
    ypad_ref[1:1 + ho, 1:1 + wo, :] = y_ref[0]

    acc = None
    for kh in range(3):
        for kw in range(3):
            patch = ypad_ref[kh:kh + ho, kw:kw + wo, :].reshape(ho * wo, c)
            d = jnp.dot(patch, w_ref[kh, kw], preferred_element_type=jnp.float32)
            acc = d if acc is None else acc + d
    out = acc * s_ref[...] + b_ref[...]

    if project:
        # Fused projection shortcut: tiny K=Csc matmul hides under the 3x3-conv MXU slack.
        csc = wsc_ref.shape[0]
        xs = xs_ref[0].reshape(ho * wo, csc)
        sc = jnp.dot(xs, wsc_ref[...], preferred_element_type=jnp.float32)
        sc = sc * ssc_ref[...] + bsc_ref[...]
    else:
        # Identity shortcut: plain add in f32 — no eye-matmul, no weight DMA.
        sc = xs_ref[0].reshape(ho * wo, tn).astype(jnp.float32)

    o_ref[0] = jnp.maximum(out + sc, 0.0).reshape(ho, wo, tn).astype(o_ref.dtype)


# ------------------------------ pallas_call wrappers ---------------------------

def conv3x3_bn(x_phases, w, scale, bias, *, stride, ho, wo, relu, out_dtype):
    ss, n, hs, ws, cin = x_phases.shape
    cp = w.shape[-1]
    tn = _pick_tn(cp)
    act_bytes = ss * hs * ws * cin * x_phases.dtype.itemsize
    w_bytes = 3 * 3 * cin * tn * w.dtype.itemsize
    grid, bsel, csel = _grid_and_maps(n, cp // tn, act_bytes, w_bytes)
    kernel = functools.partial(_conv3x3_bn_kernel, stride=stride, ho=ho, wo=wo, relu=relu)
    return pl.pallas_call(
        kernel,
        out_shape=jax.ShapeDtypeStruct((n, ho, wo, cp), out_dtype),
        grid_spec=pltpu.PrefetchScalarGridSpec(
            num_scalar_prefetch=0,
            grid=grid,
            in_specs=[
                pl.BlockSpec((ss, 1, hs, ws, cin),
                             lambda i, j: (0, bsel(i, j), 0, 0, 0)),
                pl.BlockSpec((3, 3, cin, tn), lambda i, j: (0, 0, 0, csel(i, j))),
                pl.BlockSpec((1, tn), lambda i, j: (0, csel(i, j))),
                pl.BlockSpec((1, tn), lambda i, j: (0, csel(i, j))),
            ],
            out_specs=pl.BlockSpec((1, ho, wo, tn),
                                   lambda i, j: (bsel(i, j), 0, 0, csel(i, j))),
        ),
        compiler_params=_compiler_params(),
    )(x_phases, w, scale, bias)


def conv3x3_bn_add_relu(y, w, scale, bias, xs, wsc, ssc, bsc, *, ho, wo, out_dtype):
    project = wsc is not None
    n, _, _, c = y.shape
    cp = w.shape[-1]
    tn = _pick_tn(cp)
    act_bytes = (ho * wo * c + ho * wo * xs.shape[-1]) * y.dtype.itemsize
    w_bytes = 3 * 3 * c * tn * w.dtype.itemsize
    grid, bsel, csel = _grid_and_maps(n, cp // tn, act_bytes, w_bytes)
    kernel = functools.partial(_conv3x3_bn_add_relu_kernel, ho=ho, wo=wo, project=project)

    in_specs = [
        pl.BlockSpec((1, ho, wo, c), lambda i, j: (bsel(i, j), 0, 0, 0)),
        pl.BlockSpec((3, 3, c, tn), lambda i, j: (0, 0, 0, csel(i, j))),
        pl.BlockSpec((1, tn), lambda i, j: (0, csel(i, j))),
        pl.BlockSpec((1, tn), lambda i, j: (0, csel(i, j))),
    ]
    args = [y, w, scale, bias]
    if project:
        csc = xs.shape[-1]
        in_specs += [
            pl.BlockSpec((1, ho, wo, csc), lambda i, j: (bsel(i, j), 0, 0, 0)),
            pl.BlockSpec((csc, tn), lambda i, j: (0, csel(i, j))),
            pl.BlockSpec((1, tn), lambda i, j: (0, csel(i, j))),
            pl.BlockSpec((1, tn), lambda i, j: (0, csel(i, j))),
        ]
        args += [xs, wsc, ssc, bsc]
    else:
        # identity shortcut: xs is channel-padded to cp and tiled together with the output
        in_specs += [pl.BlockSpec((1, ho, wo, tn),
                                  lambda i, j: (bsel(i, j), 0, 0, csel(i, j)))]
        args += [xs]

    return pl.pallas_call(
        kernel,
        out_shape=jax.ShapeDtypeStruct((n, ho, wo, cp), out_dtype),
        grid_spec=pltpu.PrefetchScalarGridSpec(
            num_scalar_prefetch=0,
            grid=grid,
            in_specs=in_specs,
            out_specs=pl.BlockSpec((1, ho, wo, tn),
                                   lambda i, j: (bsel(i, j), 0, 0, csel(i, j))),
            scratch_shapes=[pltpu.VMEM((ho + 2, wo + 2, c), y.dtype)],
        ),
        compiler_params=_compiler_params(),
    )(*args)


# ------------------------------ JAX glue ---------------------------------------

def _phase_decompose(xp, stride):
    """[N,Hp,Wp,C] -> [s*s, N, ceil(Hp/s), ceil(Wp/s), C] such that
    out[(kh%s)*s + (kw%s), n, i + kh//s, j + kw//s] == xp[n, s*i+kh, s*j+kw]."""
    if stride == 1:
        return xp[None]
    s = stride
    n, hp, wp, c = xp.shape
    hs, ws = -(-hp // s), -(-wp // s)
    xp = jnp.pad(xp, ((0, 0), (0, hs * s - hp), (0, ws * s - wp), (0, 0)))
    xps = xp.reshape(n, hs, s, ws, s, c)
    xps = jnp.transpose(xps, (2, 4, 0, 1, 3, 5))
    return xps.reshape(s * s, n, hs, ws, c)


def _prep_w3x3(w_oihw, cin_pad, cout_pad, dtype):
    """PyTorch OIHW (Cout, Cin, 3, 3) -> (3, 3, Cin_pad, Cout_pad) in compute dtype."""
    co, ci = w_oihw.shape[0], w_oihw.shape[1]
    w = jnp.transpose(w_oihw, (2, 3, 1, 0))
    w = jnp.pad(w, ((0, 0), (0, 0), (0, cin_pad - ci), (0, cout_pad - co)))
    return w.astype(dtype)


def _fold_bn(conv_bias, gamma, beta, mean, var, cout_pad):
    """Fold conv bias + inference-mode BatchNorm into per-channel scale/bias (kept in f32)."""
    scale = gamma / jnp.sqrt(var + _EPS)
    bias = (conv_bias - mean) * scale + beta
    scale = jnp.pad(scale, (0, cout_pad - scale.shape[0]))
    bias = jnp.pad(bias, (0, cout_pad - bias.shape[0]))
    return (scale.reshape(1, -1).astype(jnp.float32),
            bias.reshape(1, -1).astype(jnp.float32))


@functools.partial(jax.jit, static_argnames=("stride",))
def resblock_forward(x_nchw, params, *, stride=1):
    # Public API keeps PyTorch's NCHW; internally everything is NHWC.
    # TODO(synk): keep activations NHWC end-to-end at the model level to drop these transposes.
    compute_dtype = jnp.bfloat16
    x = jnp.transpose(x_nchw, (0, 2, 3, 1)).astype(compute_dtype)      # [N,H,W,Cin]
    n, h, w, cin = x.shape
    cout = params["w1"].shape[0]
    cp = _round_up(cout, _LANE)                                        # lane-dense channels
    ho = (h + 2 - 3) // stride + 1
    wo = (w + 2 - 3) // stride + 1

    # ---- conv1 (3x3, stride) + BN1 + ReLU ----
    xp = jnp.pad(x, ((0, 0), (1, 1), (1, 1), (0, 0)))
    x_phases = _phase_decompose(xp, stride)
    w1 = _prep_w3x3(params["w1"], cin, cp, compute_dtype)
    s1, b1 = _fold_bn(params["b1"], params["bn1_gamma"], params["bn1_beta"],
                      params["bn1_mean"], params["bn1_var"], cp)
    y1 = conv3x3_bn(x_phases, w1, s1, b1, stride=stride, ho=ho, wo=wo,
                    relu=True, out_dtype=compute_dtype)                # [N,Ho,Wo,Cp] bf16

    # ---- conv2 (3x3, stride 1) + BN2, fused with shortcut + add + ReLU ----
    # (no HBM pad of y1; kernel 2 builds the halo in VMEM)
    w2 = _prep_w3x3(params["w2"], cp, cp, compute_dtype)
    s2, b2 = _fold_bn(params["b2"], params["bn2_gamma"], params["bn2_beta"],
                      params["bn2_mean"], params["bn2_var"], cp)

    if cin != cout:                                                    # projection shortcut
        xs = x[:, ::stride, ::stride, :]                               # 1x1 conv, stride, no pad
        wsc = jnp.transpose(params["ws"].reshape(cout, cin), (1, 0))   # (Cin, Cout)
        wsc = jnp.pad(wsc, ((0, 0), (0, cp - cout))).astype(compute_dtype)
        ssc, bsc = _fold_bn(params["bs"], params["bns_gamma"], params["bns_beta"],
                            params["bns_mean"], params["bns_var"], cp)
    else:                                                              # identity shortcut
        if stride != 1:
            raise ValueError("identity shortcut requires stride == 1 "
                             "(same constraint as the PyTorch module)")
        xs = x if cp == cin else jnp.pad(x, ((0, 0), (0, 0), (0, 0), (0, cp - cin)))
        wsc = ssc = bsc = None                                         # no eye-matmul

    out = conv3x3_bn_add_relu(y1, w2, s2, b2, xs, wsc, ssc, bsc,
                              ho=ho, wo=wo, out_dtype=compute_dtype)   # [N,Ho,Wo,Cp] bf16
    out = out[..., :cout]
    return jnp.transpose(out, (0, 3, 1, 2))                            # back to NCHW (bf16)


# ------------------------------ pure-JAX reference ------------------------------

def _conv2d_ref(x, w, b, stride, padding):
    out = jax.lax.conv_general_dilated(
        x, w, window_strides=(stride, stride),
        padding=[(padding, padding), (padding, padding)],
        dimension_numbers=("NCHW", "OIHW", "NCHW"))
    return out + b.reshape(1, -1, 1, 1)


def _bn_ref(x, gamma, beta, mean, var):
    shape = (1, -1, 1, 1)
    return (x - mean.reshape(shape)) / jnp.sqrt(var.reshape(shape) + _EPS) \
        * gamma.reshape(shape) + beta.reshape(shape)


def resblock_ref(x, p, stride):
    y = _conv2d_ref(x, p["w1"], p["b1"], stride, 1)
    y = _bn_ref(y, p["bn1_gamma"], p["bn1_beta"], p["bn1_mean"], p["bn1_var"])
    y = jnp.maximum(y, 0.0)
    y = _conv2d_ref(y, p["w2"], p["b2"], 1, 1)
    y = _bn_ref(y, p["bn2_gamma"], p["bn2_beta"], p["bn2_mean"], p["bn2_var"])
    cin, cout = p["w1"].shape[1], p["w1"].shape[0]
    if cin != cout:
        s = _conv2d_ref(x, p["ws"], p["bs"], stride, 0)
        s = _bn_ref(s, p["bns_gamma"], p["bns_beta"], p["bns_mean"], p["bns_var"])
    else:
        s = x
    return jnp.maximum(y + s, 0.0)


# ----------------------------------- main ---------------------------------------

if __name__ == "__main__":
    N, Cin, H, W = 2, 4, 16, 16
    Cout, stride = 8, 2

    key = jax.random.PRNGKey(0)
    ks = jax.random.split(key, 20)
    x = jax.random.normal(ks[0], (N, Cin, H, W), jnp.float32)

    params = {
        # conv1: 3x3, Cin -> Cout
        "w1": 0.1 * jax.random.normal(ks[1], (Cout, Cin, 3, 3), jnp.float32),
        "b1": 0.1 * jax.random.normal(ks[2], (Cout,), jnp.float32),
        "bn1_gamma": jax.random.uniform(ks[3], (Cout,), jnp.float32, 0.5, 1.5),
        "bn1_beta": 0.1 * jax.random.normal(ks[4], (Cout,), jnp.float32),
        "bn1_mean": 0.1 * jax.random.normal(ks[5], (Cout,), jnp.float32),
        "bn1_var": jax.random.uniform(ks[6], (Cout,), jnp.float32, 0.5, 1.5),
        # conv2: 3x3, Cout -> Cout
        "w2": 0.1 * jax.random.normal(ks[7], (Cout, Cout, 3, 3), jnp.float32),
        "b2": 0.1 * jax.random.normal(ks[8], (Cout,), jnp.float32),
        "bn2_gamma": jax.random.uniform(ks[9], (Cout,), jnp.float32, 0.5, 1.5),
        "bn2_beta": 0.1 * jax.random.normal(ks[10], (Cout,), jnp.float32),
        "bn2_mean": 0.1 * jax.random.normal(ks[11], (Cout,), jnp.float32),
        "bn2_var": jax.random.uniform(ks[12], (Cout,), jnp.float32, 0.5, 1.5),
        # shortcut: 1x1, Cin -> Cout (active since Cin != Cout)
        "ws": 0.1 * jax.random.normal(ks[13], (Cout, Cin, 1, 1), jnp.float32),
        "bs": 0.1 * jax.random.normal(ks[14], (Cout,), jnp.float32),
        "bns_gamma": jax.random.uniform(ks[15], (Cout,), jnp.float32, 0.5, 1.5),
        "bns_beta": 0.1 * jax.random.normal(ks[16], (Cout,), jnp.float32),
        "bns_mean": 0.1 * jax.random.normal(ks[17], (Cout,), jnp.float32),
        "bns_var": jax.random.uniform(ks[18], (Cout,), jnp.float32, 0.5, 1.5),
    }

    out = resblock_forward(x, params, stride=stride)
    out = jax.block_until_ready(out)

    ref = resblock_ref(x, params, stride)
    # bf16 activations/weights/output with f32 accumulation -> relaxed tolerance vs f32 ref.
    np.testing.assert_allclose(np.asarray(out.astype(jnp.float32)), np.asarray(ref),
                               rtol=2e-2, atol=2e-2)
    assert out.shape == (N, Cout, H // stride, W // stride)

    print("KERNEL_OK")
</pallas_src>

<mosaic_0001>
module attributes {stable_mosaic.version = 11 : i64} {
  func.func @_conv3x3_bn_kernel(%arg0: i32, %arg1: i32, %arg2: memref<4x1x9x9x4xbf16, #tpu.memory_space<vmem>>, %arg3: memref<3x3x4x128xbf16, #tpu.memory_space<vmem>>, %arg4: memref<1x128xf32, #tpu.memory_space<vmem>>, %arg5: memref<1x128xf32, #tpu.memory_space<vmem>>, %arg6: memref<1x8x8x128xbf16, #tpu.memory_space<vmem>>) attributes {dimension_semantics = [#tpu.dimension_semantics<parallel>, #tpu.dimension_semantics<parallel>], iteration_bounds = array<i64: 1, 2>, scalar_prefetch = 0 : i64, scratch_operands = 0 : i64, tpu.core_type = #tpu.core_type<tc>, window_params = [{transform_indices = @transform_0, window_bounds = array<i64: 4, 1, 9, 9, 4>}, {transform_indices = @transform_1, window_bounds = array<i64: 3, 3, 4, 128>}, {transform_indices = @transform_2, window_bounds = array<i64: 1, 128>}, {transform_indices = @transform_3, window_bounds = array<i64: 1, 128>}, {transform_indices = @transform_4, window_bounds = array<i64: 1, 8, 8, 128>}]} {
    %c0 = arith.constant 0 : index
    %c0_0 = arith.constant 0 : index
    %c0_1 = arith.constant 0 : index
    %c0_2 = arith.constant 0 : index
    %c0_3 = arith.constant 0 : index
    %0 = vector.load %arg2[%c0, %c0_0, %c0_1, %c0_2, %c0_3] : memref<4x1x9x9x4xbf16, #tpu.memory_space<vmem>>, vector<1x1x8x8x4xbf16>
    %1 = vector.shape_cast %0 : vector<1x1x8x8x4xbf16> to vector<8x8x4xbf16>
    %2 = vector.shape_cast %1 : vector<8x8x4xbf16> to vector<64x4xbf16>
    %c0_4 = arith.constant 0 : index
    %c0_5 = arith.constant 0 : index
    %c0_6 = arith.constant 0 : index
    %c0_7 = arith.constant 0 : index
    %3 = vector.load %arg3[%c0_4, %c0_5, %c0_6, %c0_7] : memref<3x3x4x128xbf16, #tpu.memory_space<vmem>>, vector<1x1x4x128xbf16>
    %4 = vector.shape_cast %3 : vector<1x1x4x128xbf16> to vector<4x128xbf16>
    %cst = arith.constant dense<0.000000e+00> : vector<64x128xf32>
    %5 = tpu.matmul %2, %4, %cst {dimension_numbers = #tpu.dot_dimension_numbers<[1], [0], [0], [1], [0, 0, 1, 1], [], []>} : vector<64x4xbf16>, vector<4x128xbf16>, vector<64x128xf32> -> vector<64x128xf32>
    %c1 = arith.constant 1 : index
    %c0_8 = arith.constant 0 : index
    %c0_9 = arith.constant 0 : index
    %c0_10 = arith.constant 0 : index
    %c0_11 = arith.constant 0 : index
    %6 = vector.load %arg2[%c1, %c0_8, %c0_9, %c0_10, %c0_11] : memref<4x1x9x9x4xbf16, #tpu.memory_space<vmem>>, vector<1x1x8x8x4xbf16>
    %7 = vector.shape_cast %6 : vector<1x1x8x8x4xbf16> to vector<8x8x4xbf16>
    %8 = vector.shape_cast %7 : vector<8x8x4xbf16> to vector<64x4xbf16>
    %c0_12 = arith.constant 0 : index
    %c1_13 = arith.constant 1 : index
    %c0_14 = arith.constant 0 : index
    %c0_15 = arith.constant 0 : index
    %9 = vector.load %arg3[%c0_12, %c1_13, %c0_14, %c0_15] : memref<3x3x4x128xbf16, #tpu.memory_space<vmem>>, vector<1x1x4x128xbf16>
    %10 = vector.shape_cast %9 : vector<1x1x4x128xbf16> to vector<4x128xbf16>
    %cst_16 = arith.constant dense<0.000000e+00> : vector<64x128xf32>
    %11 = tpu.matmul %8, %10, %cst_16 {dimension_numbers = #tpu.dot_dimension_numbers<[1], [0], [0], [1], [0, 0, 1, 1], [], []>} : vector<64x4xbf16>, vector<4x128xbf16>, vector<64x128xf32> -> vector<64x128xf32>
    %12 = arith.addf %5, %11 : vector<64x128xf32>
    %c0_17 = arith.constant 0 : index
    %c0_18 = arith.constant 0 : index
    %c0_19 = arith.constant 0 : index
    %c1_20 = arith.constant 1 : index
    %c0_21 = arith.constant 0 : index
    %13 = vector.load %arg2[%c0_17, %c0_18, %c0_19, %c1_20, %c0_21] : memref<4x1x9x9x4xbf16, #tpu.memory_space<vmem>>, vector<1x1x8x8x4xbf16>
    %14 = vector.shape_cast %13 : vector<1x1x8x8x4xbf16> to vector<8x8x4xbf16>
    %15 = vector.shape_cast %14 : vector<8x8x4xbf16> to vector<64x4xbf16>
    %c0_22 = arith.constant 0 : index
    %c2 = arith.constant 2 : index
    %c0_23 = arith.constant 0 : index
    %c0_24 = arith.constant 0 : index
    %16 = vector.load %arg3[%c0_22, %c2, %c0_23, %c0_24] : memref<3x3x4x128xbf16, #tpu.memory_space<vmem>>, vector<1x1x4x128xbf16>
    %17 = vector.shape_cast %16 : vector<1x1x4x128xbf16> to vector<4x128xbf16>
    %cst_25 = arith.constant dense<0.000000e+00> : vector<64x128xf32>
    %18 = tpu.matmul %15, %17, %cst_25 {dimension_numbers = #tpu.dot_dimension_numbers<[1], [0], [0], [1], [0, 0, 1, 1], [], []>} : vector<64x4xbf16>, vector<4x128xbf16>, vector<64x128xf32> -> vector<64x128xf32>
    %19 = arith.addf %12, %18 : vector<64x128xf32>
    %c2_26 = arith.constant 2 : index
    %c0_27 = arith.constant 0 : index
    %c0_28 = arith.constant 0 : index
    %c0_29 = arith.constant 0 : index
    %c0_30 = arith.constant 0 : index
    %20 = vector.load %arg2[%c2_26, %c0_27, %c0_28, %c0_29, %c0_30] : memref<4x1x9x9x4xbf16, #tpu.memory_space<vmem>>, vector<1x1x8x8x4xbf16>
    %21 = vector.shape_cast %20 : vector<1x1x8x8x4xbf16> to vector<8x8x4xbf16>
    %22 = vector.shape_cast %21 : vector<8x8x4xbf16> to vector<64x4xbf16>
    %c1_31 = arith.constant 1 : index
    %c0_32 = arith.constant 0 : index
    %c0_33 = arith.constant 0 : index
    %c0_34 = arith.constant 0 : index
    %23 = vector.load %arg3[%c1_31, %c0_32, %c0_33, %c0_34] : memref<3x3x4x128xbf16, #tpu.memory_space<vmem>>, vector<1x1x4x128xbf16>
    %24 = vector.shape_cast %23 : vector<1x1x4x128xbf16> to vector<4x128xbf16>
    %cst_35 = arith.constant dense<0.000000e+00> : vector<64x128xf32>
    %25 = tpu.matmul %22, %24, %cst_35 {dimension_numbers = #tpu.dot_dimension_numbers<[1], [0], [0], [1], [0, 0, 1, 1], [], []>} : vector<64x4xbf16>, vector<4x128xbf16>, vector<64x128xf32> -> vector<64x128xf32>
    %26 = arith.addf %19, %25 : vector<64x128xf32>
    %c3 = arith.constant 3 : index
    %c0_36 = arith.constant 0 : index
    %c0_37 = arith.constant 0 : index
    %c0_38 = arith.constant 0 : index
    %c0_39 = arith.constant 0 : index
    %27 = vector.load %arg2[%c3, %c0_36, %c0_37, %c0_38, %c0_39] : memref<4x1x9x9x4xbf16, #tpu.memory_space<vmem>>, vector<1x1x8x8x4xbf16>
    %28 = vector.shape_cast %27 : vector<1x1x8x8x4xbf16> to vector<8x8x4xbf16>
    %29 = vector.shape_cast %28 : vector<8x8x4xbf16> to vector<64x4xbf16>
    %c1_40 = arith.constant 1 : index
    %c1_41 = arith.constant 1 : index
    %c0_42 = arith.constant 0 : index
    %c0_43 = arith.constant 0 : index
    %30 = vector.load %arg3[%c1_40, %c1_41, %c0_42, %c0_43] : memref<3x3x4x128xbf16, #tpu.memory_space<vmem>>, vector<1x1x4x128xbf16>
    %31 = vector.shape_cast %30 : vector<1x1x4x128xbf16> to vector<4x128xbf16>
    %cst_44 = arith.constant dense<0.000000e+00> : vector<64x128xf32>
    %32 = tpu.matmul %29, %31, %cst_44 {dimension_numbers = #tpu.dot_dimension_numbers<[1], [0], [0], [1], [0, 0, 1, 1], [], []>} : vector<64x4xbf16>, vector<4x128xbf16>, vector<64x128xf32> -> vector<64x128xf32>
    %33 = arith.addf %26, %32 : vector<64x128xf32>
    %c2_45 = arith.constant 2 : index
    %c0_46 = arith.constant 0 : index
    %c0_47 = arith.constant 0 : index
    %c1_48 = arith.constant 1 : index
    %c0_49 = arith.constant 0 : index
    %34 = vector.load %arg2[%c2_45, %c0_46, %c0_47, %c1_48, %c0_49] : memref<4x1x9x9x4xbf16, #tpu.memory_space<vmem>>, vector<1x1x8x8x4xbf16>
    %35 = vector.shape_cast %34 : vector<1x1x8x8x4xbf16> to vector<8x8x4xbf16>
    %36 = vector.shape_cast %35 : vector<8x8x4xbf16> to vector<64x4xbf16>
    %c1_50 = arith.constant 1 : index
    %c2_51 = arith.constant 2 : index
    %c0_52 = arith.constant 0 : index
    %c0_53 = arith.constant 0 : index
    %37 = vector.load %arg3[%c1_50, %c2_51, %c0_52, %c0_53] : memref<3x3x4x128xbf16, #tpu.memory_space<vmem>>, vector<1x1x4x128xbf16>
    %38 = vector.shape_cast %37 : vector<1x1x4x128xbf16> to vector<4x128xbf16>
    %cst_54 = arith.constant dense<0.000000e+00> : vector<64x128xf32>
    %39 = tpu.matmul %36, %38, %cst_54 {dimension_numbers = #tpu.dot_dimension_numbers<[1], [0], [0], [1], [0, 0, 1, 1], [], []>} : vector<64x4xbf16>, vector<4x128xbf16>, vector<64x128xf32> -> vector<64x128xf32>
    %40 = arith.addf %33, %39 : vector<64x128xf32>
    %c0_55 = arith.constant 0 : index
    %c0_56 = arith.constant 0 : index
    %c1_57 = arith.constant 1 : index
    %c0_58 = arith.constant 0 : index
    %c0_59 = arith.constant 0 : index
    %41 = vector.load %arg2[%c0_55, %c0_56, %c1_57, %c0_58, %c0_59] : memref<4x1x9x9x4xbf16, #tpu.memory_space<vmem>>, vector<1x1x8x8x4xbf16>
    %42 = vector.shape_cast %41 : vector<1x1x8x8x4xbf16> to vector<8x8x4xbf16>
    %43 = vector.shape_cast %42 : vector<8x8x4xbf16> to vector<64x4xbf16>
    %c2_60 = arith.constant 2 : index
    %c0_61 = arith.constant 0 : index
    %c0_62 = arith.constant 0 : index
    %c0_63 = arith.constant 0 : index
    %44 = vector.load %arg3[%c2_60, %c0_61, %c0_62, %c0_63] : memref<3x3x4x128xbf16, #tpu.memory_space<vmem>>, vector<1x1x4x128xbf16>
    %45 = vector.shape_cast %44 : vector<1x1x4x128xbf16> to vector<4x128xbf16>
    %cst_64 = arith.constant dense<0.000000e+00> : vector<64x128xf32>
    %46 = tpu.matmul %43, %45, %cst_64 {dimension_numbers = #tpu.dot_dimension_numbers<[1], [0], [0], [1], [0, 0, 1, 1], [], []>} : vector<64x4xbf16>, vector<4x128xbf16>, vector<64x128xf32> -> vector<64x128xf32>
    %47 = arith.addf %40, %46 : vector<64x128xf32>
    %c1_65 = arith.constant 1 : index
    %c0_66 = arith.constant 0 : index
    %c1_67 = arith.constant 1 : index
    %c0_68 = arith.constant 0 : index
    %c0_69 = arith.constant 0 : index
    %48 = vector.load %arg2[%c1_65, %c0_66, %c1_67, %c0_68, %c0_69] : memref<4x1x9x9x4xbf16, #tpu.memory_space<vmem>>, vector<1x1x8x8x4xbf16>
    %49 = vector.shape_cast %48 : vector<1x1x8x8x4xbf16> to vector<8x8x4xbf16>
    %50 = vector.shape_cast %49 : vector<8x8x4xbf16> to vector<64x4xbf16>
    %c2_70 = arith.constant 2 : index
    %c1_71 = arith.constant 1 : index
    %c0_72 = arith.constant 0 : index
    %c0_73 = arith.constant 0 : index
    %51 = vector.load %arg3[%c2_70, %c1_71, %c0_72, %c0_73] : memref<3x3x4x128xbf16, #tpu.memory_space<vmem>>, vector<1x1x4x128xbf16>
    %52 = vector.shape_cast %51 : vector<1x1x4x128xbf16> to vector<4x128xbf16>
    %cst_74 = arith.constant dense<0.000000e+00> : vector<64x128xf32>
    %53 = tpu.matmul %50, %52, %cst_74 {dimension_numbers = #tpu.dot_dimension_numbers<[1], [0], [0], [1], [0, 0, 1, 1], [], []>} : vector<64x4xbf16>, vector<4x128xbf16>, vector<64x128xf32> -> vector<64x128xf32>
    %54 = arith.addf %47, %53 : vector<64x128xf32>
    %c0_75 = arith.constant 0 : index
    %c0_76 = arith.constant 0 : index
    %c1_77 = arith.constant 1 : index
    %c1_78 = arith.constant 1 : index
    %c0_79 = arith.constant 0 : index
    %55 = vector.load %arg2[%c0_75, %c0_76, %c1_77, %c1_78, %c0_79] : memref<4x1x9x9x4xbf16, #tpu.memory_space<vmem>>, vector<1x1x8x8x4xbf16>
    %56 = vector.shape_cast %55 : vector<1x1x8x8x4xbf16> to vector<8x8x4xbf16>
    %57 = vector.shape_cast %56 : vector<8x8x4xbf16> to vector<64x4xbf16>
    %c2_80 = arith.constant 2 : index
    %c2_81 = arith.constant 2 : index
    %c0_82 = arith.constant 0 : index
    %c0_83 = arith.constant 0 : index
    %58 = vector.load %arg3[%c2_80, %c2_81, %c0_82, %c0_83] : memref<3x3x4x128xbf16, #tpu.memory_space<vmem>>, vector<1x1x4x128xbf16>
    %59 = vector.shape_cast %58 : vector<1x1x4x128xbf16> to vector<4x128xbf16>
    %cst_84 = arith.constant dense<0.000000e+00> : vector<64x128xf32>
    %60 = tpu.matmul %57, %59, %cst_84 {dimension_numbers = #tpu.dot_dimension_numbers<[1], [0], [0], [1], [0, 0, 1, 1], [], []>} : vector<64x4xbf16>, vector<4x128xbf16>, vector<64x128xf32> -> vector<64x128xf32>
    %61 = arith.addf %54, %60 : vector<64x128xf32>
    %c0_85 = arith.constant 0 : index
    %c0_86 = arith.constant 0 : index
    %62 = vector.load %arg4[%c0_85, %c0_86] : memref<1x128xf32, #tpu.memory_space<vmem>>, vector<1x128xf32>
    %63 = vector.broadcast %62 : vector<1x128xf32> to vector<64x128xf32>
    %64 = arith.mulf %61, %63 : vector<64x128xf32>
    %c0_87 = arith.constant 0 : index
    %c0_88 = arith.constant 0 : index
    %65 = vector.load %arg5[%c0_87, %c0_88] : memref<1x128xf32, #tpu.memory_space<vmem>>, vector<1x128xf32>
    %66 = vector.broadcast %65 : vector<1x128xf32> to vector<64x128xf32>
    %67 = arith.addf %64, %66 : vector<64x128xf32>
    %cst_89 = arith.constant 0.000000e+00 : f32
    %68 = vector.broadcast %cst_89 : f32 to vector<64x128xf32>
    %69 = arith.maximumf %67, %68 : vector<64x128xf32>
    %70 = vector.shape_cast %69 : vector<64x128xf32> to vector<8x8x128xf32>
    %71 = arith.truncf %70 : vector<8x8x128xf32> to vector<8x8x128xbf16>
    %c0_90 = arith.constant 0 : index
    %c0_91 = arith.constant 0 : index
    %c0_92 = arith.constant 0 : index
    %c0_93 = arith.constant 0 : index
    %72 = vector.load %arg6[%c0_90, %c0_91, %c0_92, %c0_93] : memref<1x8x8x128xbf16, #tpu.memory_space<vmem>>, vector<1x8x8x128xbf16>
    %73 = vector.shape_cast %72 : vector<1x8x8x128xbf16> to vector<8x8x128xbf16>
    %74 = vector.shape_cast %71 : vector<8x8x128xbf16> to vector<1x8x8x128xbf16>
    tpu.vector_store %arg6[%c0_90, %c0_91, %c0_92, %c0_93], %74 {strides = array<i32>} : memref<1x8x8x128xbf16, #tpu.memory_space<vmem>>, vector<1x8x8x128xbf16>,
    return
  }
  func.func @transform_0(%arg0: i32, %arg1: i32) -> (i32, i32, i32, i32, i32) {
    %c0_i32 = arith.constant 0 : i32
    %c0_i32_0 = arith.constant 0 : i32
    %c0_i32_1 = arith.constant 0 : i32
    %c0_i32_2 = arith.constant 0 : i32
    %c0_i32_3 = arith.constant 0 : i32
    return %c0_i32, %arg1, %c0_i32_0, %c0_i32_1, %c0_i32_2 : i32, i32, i32, i32, i32
  }
  func.func @transform_1(%arg0: i32, %arg1: i32) -> (i32, i32, i32, i32) {
    %c0_i32 = arith.constant 0 : i32
    %c0_i32_0 = arith.constant 0 : i32
    %c0_i32_1 = arith.constant 0 : i32
    %c0_i32_2 = arith.constant 0 : i32
    return %c0_i32, %c0_i32_0, %c0_i32_1, %arg0 : i32, i32, i32, i32
  }
  func.func @transform_2(%arg0: i32, %arg1: i32) -> (i32, i32) {
    %c0_i32 = arith.constant 0 : i32
    %c0_i32_0 = arith.constant 0 : i32
    return %c0_i32, %arg0 : i32, i32
  }
  func.func @transform_3(%arg0: i32, %arg1: i32) -> (i32, i32) {
    %c0_i32 = arith.constant 0 : i32
    %c0_i32_0 = arith.constant 0 : i32
    return %c0_i32, %arg0 : i32, i32
  }
  func.func @transform_4(%arg0: i32, %arg1: i32) -> (i32, i32, i32, i32) {
    %c0_i32 = arith.constant 0 : i32
    %c0_i32_0 = arith.constant 0 : i32
    %c0_i32_1 = arith.constant 0 : i32
    return %arg1, %c0_i32, %c0_i32_0, %arg0 : i32, i32, i32, i32
  }
}

module attributes {stable_mosaic.version = 11 : i64} {
  func.func @_conv3x3_bn_add_relu_kernel(%arg0: i32, %arg1: i32, %arg2: memref<1x8x8x128xbf16, #tpu.memory_space<vmem>>, %arg3: memref<3x3x128x128xbf16, #tpu.memory_space<vmem>>, %arg4: memref<1x128xf32, #tpu.memory_space<vmem>>, %arg5: memref<1x128xf32, #tpu.memory_space<vmem>>, %arg6: memref<1x8x8x4xbf16, #tpu.memory_space<vmem>>, %arg7: memref<4x128xbf16, #tpu.memory_space<vmem>>, %arg8: memref<1x128xf32, #tpu.memory_space<vmem>>, %arg9: memref<1x128xf32, #tpu.memory_space<vmem>>, %arg10: memref<1x8x8x128xbf16, #tpu.memory_space<vmem>>, %arg11: memref<10x10x128xbf16, #tpu.memory_space<vmem>>) attributes {dimension_semantics = [#tpu.dimension_semantics<parallel>, #tpu.dimension_semantics<parallel>], iteration_bounds = array<i64: 1, 2>, scalar_prefetch = 0 : i64, scratch_operands = 1 : i64, tpu.core_type = #tpu.core_type<tc>, window_params = [{transform_indices = @transform_0, window_bounds = array<i64: 1, 8, 8, 128>}, {transform_indices = @transform_1, window_bounds = array<i64: 3, 3, 128, 128>}, {transform_indices = @transform_2, window_bounds = array<i64: 1, 128>}, {transform_indices = @transform_3, window_bounds = array<i64: 1, 128>}, {transform_indices = @transform_4, window_bounds = array<i64: 1, 8, 8, 4>}, {transform_indices = @transform_5, window_bounds = array<i64: 4, 128>}, {transform_indices = @transform_6, window_bounds = array<i64: 1, 128>}, {transform_indices = @transform_7, window_bounds = array<i64: 1, 128>}, {transform_indices = @transform_8, window_bounds = array<i64: 1, 8, 8, 128>}]} {
    %cst = arith.constant 0.000000e+00 : bf16
    %0 = vector.broadcast %cst : bf16 to vector<10x10x128xbf16>
    %c0 = arith.constant 0 : index
    %c0_0 = arith.constant 0 : index
    %c0_1 = arith.constant 0 : index
    %1 = vector.load %arg11[%c0, %c0_0, %c0_1] : memref<10x10x128xbf16, #tpu.memory_space<vmem>>, vector<10x10x128xbf16>
    tpu.vector_store %arg11[%c0, %c0_0, %c0_1], %0 {strides = array<i32>} : memref<10x10x128xbf16, #tpu.memory_space<vmem>>, vector<10x10x128xbf16>,
    %c0_2 = arith.constant 0 : index
    %c0_3 = arith.constant 0 : index
    %c0_4 = arith.constant 0 : index
    %c0_5 = arith.constant 0 : index
    %2 = vector.load %arg2[%c0_2, %c0_3, %c0_4, %c0_5] : memref<1x8x8x128xbf16, #tpu.memory_space<vmem>>, vector<1x8x8x128xbf16>
    %3 = vector.shape_cast %2 : vector<1x8x8x128xbf16> to vector<8x8x128xbf16>
    %c1 = arith.constant 1 : index
    %c1_6 = arith.constant 1 : index
    %c0_7 = arith.constant 0 : index
    %4 = vector.load %arg11[%c1, %c1_6, %c0_7] : memref<10x10x128xbf16, #tpu.memory_space<vmem>>, vector<8x8x128xbf16>
    tpu.vector_store %arg11[%c1, %c1_6, %c0_7], %3 {strides = array<i32>} : memref<10x10x128xbf16, #tpu.memory_space<vmem>>, vector<8x8x128xbf16>,
    %c0_8 = arith.constant 0 : index
    %c0_9 = arith.constant 0 : index
    %c0_10 = arith.constant 0 : index
    %5 = vector.load %arg11[%c0_8, %c0_9, %c0_10] : memref<10x10x128xbf16, #tpu.memory_space<vmem>>, vector<8x8x128xbf16>
    %6 = vector.shape_cast %5 : vector<8x8x128xbf16> to vector<64x128xbf16>
    %c0_11 = arith.constant 0 : index
    %c0_12 = arith.constant 0 : index
    %c0_13 = arith.constant 0 : index
    %c0_14 = arith.constant 0 : index
    %7 = vector.load %arg3[%c0_11, %c0_12, %c0_13, %c0_14] : memref<3x3x128x128xbf16, #tpu.memory_space<vmem>>, vector<1x1x128x128xbf16>
    %8 = vector.shape_cast %7 : vector<1x1x128x128xbf16> to vector<128x128xbf16>
    %cst_15 = arith.constant dense<0.000000e+00> : vector<64x128xf32>
    %9 = tpu.matmul %6, %8, %cst_15 {dimension_numbers = #tpu.dot_dimension_numbers<[1], [0], [0], [1], [0, 0, 1, 1], [], []>} : vector<64x128xbf16>, vector<128x128xbf16>, vector<64x128xf32> -> vector<64x128xf32>
    %c0_16 = arith.constant 0 : index
    %c1_17 = arith.constant 1 : index
    %c0_18 = arith.constant 0 : index
    %10 = vector.load %arg11[%c0_16, %c1_17, %c0_18] : memref<10x10x128xbf16, #tpu.memory_space<vmem>>, vector<8x8x128xbf16>
    %11 = vector.shape_cast %10 : vector<8x8x128xbf16> to vector<64x128xbf16>
    %c0_19 = arith.constant 0 : index
    %c1_20 = arith.constant 1 : index
    %c0_21 = arith.constant 0 : index
    %c0_22 = arith.constant 0 : index
    %12 = vector.load %arg3[%c0_19, %c1_20, %c0_21, %c0_22] : memref<3x3x128x128xbf16, #tpu.memory_space<vmem>>, vector<1x1x128x128xbf16>
    %13 = vector.shape_cast %12 : vector<1x1x128x128xbf16> to vector<128x128xbf16>
    %cst_23 = arith.constant dense<0.000000e+00> : vector<64x128xf32>
    %14 = tpu.matmul %11, %13, %cst_23 {dimension_numbers = #tpu.dot_dimension_numbers<[1], [0], [0], [1], [0, 0, 1, 1], [], []>} : vector<64x128xbf16>, vector<128x128xbf16>, vector<64x128xf32> -> vector<64x128xf32>
    %15 = arith.addf %9, %14 : vector<64x128xf32>
    %c0_24 = arith.constant 0 : index
    %c2 = arith.constant 2 : index
    %c0_25 = arith.constant 0 : index
    %16 = vector.load %arg11[%c0_24, %c2, %c0_25] : memref<10x10x128xbf16, #tpu.memory_space<vmem>>, vector<8x8x128xbf16>
    %17 = vector.shape_cast %16 : vector<8x8x128xbf16> to vector<64x128xbf16>
    %c0_26 = arith.constant 0 : index
    %c2_27 = arith.constant 2 : index
    %c0_28 = arith.constant 0 : index
    %c0_29 = arith.constant 0 : index
    %18 = vector.load %arg3[%c0_26, %c2_27, %c0_28, %c0_29] : memref<3x3x128x128xbf16, #tpu.memory_space<vmem>>, vector<1x1x128x128xbf16>
    %19 = vector.shape_cast %18 : vector<1x1x128x128xbf16> to vector<128x128xbf16>
    %cst_30 = arith.constant dense<0.000000e+00> : vector<64x128xf32>
    %20 = tpu.matmul %17, %19, %cst_30 {dimension_numbers = #tpu.dot_dimension_numbers<[1], [0], [0], [1], [0, 0, 1, 1], [], []>} : vector<64x128xbf16>, vector<128x128xbf16>, vector<64x128xf32> -> vector<64x128xf32>
    %21 = arith.addf %15, %20 : vector<64x128xf32>
    %c1_31 = arith.constant 1 : index
    %c0_32 = arith.constant 0 : index
    %c0_33 = arith.constant 0 : index
    %22 = vector.load %arg11[%c1_31, %c0_32, %c0_33] : memref<10x10x128xbf16, #tpu.memory_space<vmem>>, vector<8x8x128xbf16>
    %23 = vector.shape_cast %22 : vector<8x8x128xbf16> to vector<64x128xbf16>
    %c1_34 = arith.constant 1 : index
    %c0_35 = arith.constant 0 : index
    %c0_36 = arith.constant 0 : index
    %c0_37 = arith.constant 0 : index
    %24 = vector.load %arg3[%c1_34, %c0_35, %c0_36, %c0_37] : memref<3x3x128x128xbf16, #tpu.memory_space<vmem>>, vector<1x1x128x128xbf16>
    %25 = vector.shape_cast %24 : vector<1x1x128x128xbf16> to vector<128x128xbf16>
    %cst_38 = arith.constant dense<0.000000e+00> : vector<64x128xf32>
    %26 = tpu.matmul %23, %25, %cst_38 {dimension_numbers = #tpu.dot_dimension_numbers<[1], [0], [0], [1], [0, 0, 1, 1], [], []>} : vector<64x128xbf16>, vector<128x128xbf16>, vector<64x128xf32> -> vector<64x128xf32>
    %27 = arith.addf %21, %26 : vector<64x128xf32>
    %c1_39 = arith.constant 1 : index
    %c1_40 = arith.constant 1 : index
    %c0_41 = arith.constant 0 : index
    %28 = vector.load %arg11[%c1_39, %c1_40, %c0_41] : memref<10x10x128xbf16, #tpu.memory_space<vmem>>, vector<8x8x128xbf16>
    %29 = vector.shape_cast %28 : vector<8x8x128xbf16> to vector<64x128xbf16>
    %c1_42 = arith.constant 1 : index
    %c1_43 = arith.constant 1 : index
    %c0_44 = arith.constant 0 : index
    %c0_45 = arith.constant 0 : index
    %30 = vector.load %arg3[%c1_42, %c1_43, %c0_44, %c0_45] : memref<3x3x128x128xbf16, #tpu.memory_space<vmem>>, vector<1x1x128x128xbf16>
    %31 = vector.shape_cast %30 : vector<1x1x128x128xbf16> to vector<128x128xbf16>
    %cst_46 = arith.constant dense<0.000000e+00> : vector<64x128xf32>
    %32 = tpu.matmul %29, %31, %cst_46 {dimension_numbers = #tpu.dot_dimension_numbers<[1], [0], [0], [1], [0, 0, 1, 1], [], []>} : vector<64x128xbf16>, vector<128x128xbf16>, vector<64x128xf32> -> vector<64x128xf32>
    %33 = arith.addf %27, %32 : vector<64x128xf32>
    %c1_47 = arith.constant 1 : index
    %c2_48 = arith.constant 2 : index
    %c0_49 = arith.constant 0 : index
    %34 = vector.load %arg11[%c1_47, %c2_48, %c0_49] : memref<10x10x128xbf16, #tpu.memory_space<vmem>>, vector<8x8x128xbf16>
    %35 = vector.shape_cast %34 : vector<8x8x128xbf16> to vector<64x128xbf16>
    %c1_50 = arith.constant 1 : index
    %c2_51 = arith.constant 2 : index
    %c0_52 = arith.constant 0 : index
    %c0_53 = arith.constant 0 : index
    %36 = vector.load %arg3[%c1_50, %c2_51, %c0_52, %c0_53] : memref<3x3x128x128xbf16, #tpu.memory_space<vmem>>, vector<1x1x128x128xbf16>
    %37 = vector.shape_cast %36 : vector<1x1x128x128xbf16> to vector<128x128xbf16>
    %cst_54 = arith.constant dense<0.000000e+00> : vector<64x128xf32>
    %38 = tpu.matmul %35, %37, %cst_54 {dimension_numbers = #tpu.dot_dimension_numbers<[1], [0], [0], [1], [0, 0, 1, 1], [], []>} : vector<64x128xbf16>, vector<128x128xbf16>, vector<64x128xf32> -> vector<64x128xf32>
    %39 = arith.addf %33, %38 : vector<64x128xf32>
    %c2_55 = arith.constant 2 : index
    %c0_56 = arith.constant 0 : index
    %c0_57 = arith.constant 0 : index
    %40 = vector.load %arg11[%c2_55, %c0_56, %c0_57] : memref<10x10x128xbf16, #tpu.memory_space<vmem>>, vector<8x8x128xbf16>
    %41 = vector.shape_cast %40 : vector<8x8x128xbf16> to vector<64x128xbf16>
    %c2_58 = arith.constant 2 : index
    %c0_59 = arith.constant 0 : index
    %c0_60 = arith.constant 0 : index
    %c0_61 = arith.constant 0 : index
    %42 = vector.load %arg3[%c2_58, %c0_59, %c0_60, %c0_61] : memref<3x3x128x128xbf16, #tpu.memory_space<vmem>>, vector<1x1x128x128xbf16>
    %43 = vector.shape_cast %42 : vector<1x1x128x128xbf16> to vector<128x128xbf16>
    %cst_62 = arith.constant dense<0.000000e+00> : vector<64x128xf32>
    %44 = tpu.matmul %41, %43, %cst_62 {dimension_numbers = #tpu.dot_dimension_numbers<[1], [0], [0], [1], [0, 0, 1, 1], [], []>} : vector<64x128xbf16>, vector<128x128xbf16>, vector<64x128xf32> -> vector<64x128xf32>
    %45 = arith.addf %39, %44 : vector<64x128xf32>
    %c2_63 = arith.constant 2 : index
    %c1_64 = arith.constant 1 : index
    %c0_65 = arith.constant 0 : index
    %46 = vector.load %arg11[%c2_63, %c1_64, %c0_65] : memref<10x10x128xbf16, #tpu.memory_space<vmem>>, vector<8x8x128xbf16>
    %47 = vector.shape_cast %46 : vector<8x8x128xbf16> to vector<64x128xbf16>
    %c2_66 = arith.constant 2 : index
    %c1_67 = arith.constant 1 : index
    %c0_68 = arith.constant 0 : index
    %c0_69 = arith.constant 0 : index
    %48 = vector.load %arg3[%c2_66, %c1_67, %c0_68, %c0_69] : memref<3x3x128x128xbf16, #tpu.memory_space<vmem>>, vector<1x1x128x128xbf16>
    %49 = vector.shape_cast %48 : vector<1x1x128x128xbf16> to vector<128x128xbf16>
    %cst_70 = arith.constant dense<0.000000e+00> : vector<64x128xf32>
    %50 = tpu.matmul %47, %49, %cst_70 {dimension_numbers = #tpu.dot_dimension_numbers<[1], [0], [0], [1], [0, 0, 1, 1], [], []>} : vector<64x128xbf16>, vector<128x128xbf16>, vector<64x128xf32> -> vector<64x128xf32>
    %51 = arith.addf %45, %50 : vector<64x128xf32>
    %c2_71 = arith.constant 2 : index
    %c2_72 = arith.constant 2 : index
    %c0_73 = arith.constant 0 : index
    %52 = vector.load %arg11[%c2_71, %c2_72, %c0_73] : memref<10x10x128xbf16, #tpu.memory_space<vmem>>, vector<8x8x128xbf16>
    %53 = vector.shape_cast %52 : vector<8x8x128xbf16> to vector<64x128xbf16>
    %c2_74 = arith.constant 2 : index
    %c2_75 = arith.constant 2 : index
    %c0_76 = arith.constant 0 : index
    %c0_77 = arith.constant 0 : index
    %54 = vector.load %arg3[%c2_74, %c2_75, %c0_76, %c0_77] : memref<3x3x128x128xbf16, #tpu.memory_space<vmem>>, vector<1x1x128x128xbf16>
    %55 = vector.shape_cast %54 : vector<1x1x128x128xbf16> to vector<128x128xbf16>
    %cst_78 = arith.constant dense<0.000000e+00> : vector<64x128xf32>
    %56 = tpu.matmul %53, %55, %cst_78 {dimension_numbers = #tpu.dot_dimension_numbers<[1], [0], [0], [1], [0, 0, 1, 1], [], []>} : vector<64x128xbf16>, vector<128x128xbf16>, vector<64x128xf32> -> vector<64x128xf32>
    %57 = arith.addf %51, %56 : vector<64x128xf32>
    %c0_79 = arith.constant 0 : index
    %c0_80 = arith.constant 0 : index
    %58 = vector.load %arg4[%c0_79, %c0_80] : memref<1x128xf32, #tpu.memory_space<vmem>>, vector<1x128xf32>
    %59 = vector.broadcast %58 : vector<1x128xf32> to vector<64x128xf32>
    %60 = arith.mulf %57, %59 : vector<64x128xf32>
    %c0_81 = arith.constant 0 : index
    %c0_82 = arith.constant 0 : index
    %61 = vector.load %arg5[%c0_81, %c0_82] : memref<1x128xf32, #tpu.memory_space<vmem>>, vector<1x128xf32>
    %62 = vector.broadcast %61 : vector<1x128xf32> to vector<64x128xf32>
    %63 = arith.addf %60, %62 : vector<64x128xf32>
    %c0_83 = arith.constant 0 : index
    %c0_84 = arith.constant 0 : index
    %c0_85 = arith.constant 0 : index
    %c0_86 = arith.constant 0 : index
    %64 = vector.load %arg6[%c0_83, %c0_84, %c0_85, %c0_86] : memref<1x8x8x4xbf16, #tpu.memory_space<vmem>>, vector<1x8x8x4xbf16>
    %65 = vector.shape_cast %64 : vector<1x8x8x4xbf16> to vector<8x8x4xbf16>
    %66 = vector.shape_cast %65 : vector<8x8x4xbf16> to vector<64x4xbf16>
    %c0_87 = arith.constant 0 : index
    %c0_88 = arith.constant 0 : index
    %67 = vector.load %arg7[%c0_87, %c0_88] : memref<4x128xbf16, #tpu.memory_space<vmem>>, vector<4x128xbf16>
    %cst_89 = arith.constant dense<0.000000e+00> : vector<64x128xf32>
    %68 = tpu.matmul %66, %67, %cst_89 {dimension_numbers = #tpu.dot_dimension_numbers<[1], [0], [0], [1], [0, 0, 1, 1], [], []>} : vector<64x4xbf16>, vector<4x128xbf16>, vector<64x128xf32> -> vector<64x128xf32>
    %c0_90 = arith.constant 0 : index
    %c0_91 = arith.constant 0 : index
    %69 = vector.load %arg8[%c0_90, %c0_91] : memref<1x128xf32, #tpu.memory_space<vmem>>, vector<1x128xf32>
    %70 = vector.broadcast %69 : vector<1x128xf32> to vector<64x128xf32>
    %71 = arith.mulf %68, %70 : vector<64x128xf32>
    %c0_92 = arith.constant 0 : index
    %c0_93 = arith.constant 0 : index
    %72 = vector.load %arg9[%c0_92, %c0_93] : memref<1x128xf32, #tpu.memory_space<vmem>>, vector<1x128xf32>
    %73 = vector.broadcast %72 : vector<1x128xf32> to vector<64x128xf32>
    %74 = arith.addf %71, %73 : vector<64x128xf32>
    %75 = arith.addf %63, %74 : vector<64x128xf32>
    %cst_94 = arith.constant 0.000000e+00 : f32
    %76 = vector.broadcast %cst_94 : f32 to vector<64x128xf32>
    %77 = arith.maximumf %75, %76 : vector<64x128xf32>
    %78 = vector.shape_cast %77 : vector<64x128xf32> to vector<8x8x128xf32>
    %79 = arith.truncf %78 : vector<8x8x128xf32> to vector<8x8x128xbf16>
    %c0_95 = arith.constant 0 : index
    %c0_96 = arith.constant 0 : index
    %c0_97 = arith.constant 0 : index
    %c0_98 = arith.constant 0 : index
    %80 = vector.load %arg10[%c0_95, %c0_96, %c0_97, %c0_98] : memref<1x8x8x128xbf16, #tpu.memory_space<vmem>>, vector<1x8x8x128xbf16>
    %81 = vector.shape_cast %80 : vector<1x8x8x128xbf16> to vector<8x8x128xbf16>
    %82 = vector.shape_cast %79 : vector<8x8x128xbf16> to vector<1x8x8x128xbf16>
    tpu.vector_store %arg10[%c0_95, %c0_96, %c0_97, %c0_98], %82 {strides = array<i32>} : memref<1x8x8x128xbf16, #tpu.memory_space<vmem>>, vector<1x8x8x128xbf16>,
    return
  }
  func.func @transform_0(%arg0: i32, %arg1: i32) -> (i32, i32, i32, i32) {
    %c0_i32 = arith.constant 0 : i32
    %c0_i32_0 = arith.constant 0 : i32
    %c0_i32_1 = arith.constant 0 : i32
    %c0_i32_2 = arith.constant 0 : i32
    return %arg1, %c0_i32, %c0_i32_0, %c0_i32_1 : i32, i32, i32, i32
  }
  func.func @transform_1(%arg0: i32, %arg1: i32) -> (i32, i32, i32, i32) {
    %c0_i32 = arith.constant 0 : i32
    %c0_i32_0 = arith.constant 0 : i32
    %c0_i32_1 = arith.constant 0 : i32
    %c0_i32_2 = arith.constant 0 : i32
    return %c0_i32, %c0_i32_0, %c0_i32_1, %arg0 : i32, i32, i32, i32
  }
  func.func @transform_2(%arg0: i32, %arg1: i32) -> (i32, i32) {
    %c0_i32 = arith.constant 0 : i32
    %c0_i32_0 = arith.constant 0 : i32
    return %c0_i32, %arg0 : i32, i32
  }
  func.func @transform_3(%arg0: i32, %arg1: i32) -> (i32, i32) {
    %c0_i32 = arith.constant 0 : i32
    %c0_i32_0 = arith.constant 0 : i32
    return %c0_i32, %arg0 : i32, i32
  }
  func.func @transform_4(%arg0: i32, %arg1: i32) -> (i32, i32, i32, i32) {
    %c0_i32 = arith.constant 0 : i32
    %c0_i32_0 = arith.constant 0 : i32
    %c0_i32_1 = arith.constant 0 : i32
    %c0_i32_2 = arith.constant 0 : i32
    return %arg1, %c0_i32, %c0_i32_0, %c0_i32_1 : i32, i32, i32, i32
  }
  func.func @transform_5(%arg0: i32, %arg1: i32) -> (i32, i32) {
    %c0_i32 = arith.constant 0 : i32
    %c0_i32_0 = arith.constant 0 : i32
    return %c0_i32, %arg0 : i32, i32
  }
  func.func @transform_6(%arg0: i32, %arg1: i32) -> (i32, i32) {
    %c0_i32 = arith.constant 0 : i32
    %c0_i32_0 = arith.constant 0 : i32
    return %c0_i32, %arg0 : i32, i32
  }
  func.func @transform_7(%arg0: i32, %arg1: i32) -> (i32, i32) {
    %c0_i32 = arith.constant 0 : i32
    %c0_i32_0 = arith.constant 0 : i32
    return %c0_i32, %arg0 : i32, i32
  }
  func.func @transform_8(%arg0: i32, %arg1: i32) -> (i32, i32, i32, i32) {
    %c0_i32 = arith.constant 0 : i32
    %c0_i32_0 = arith.constant 0 : i32
    %c0_i32_1 = arith.constant 0 : i32
    return %arg1, %c0_i32, %c0_i32_0, %arg0 : i32, i32, i32, i32
  }
}

</mosaic_0001>

<bundles_post_ra>
// kernel: resblock_forward.2
= control target key start
LH: loop header
LB: loop body
LE: loop exit
PB: predicated region body
PF: predicated region fallthrough
CT: control target
= control target key end

     0   :  { %s2216_s15 = smov 0   ;;  %s2218_s16 = smov 0   ;;  %s2656_s0 = inlined_call_operand.vmem [shape: bf16[4,2,9,9,4], index: 0, kind: input, shape index: {}]   ;;  %s2657_s1 = inlined_call_operand.vmem [shape: bf16[3,3,4,128], index: 1, kind: input, shape index: {}]   ;;  %s2658_s2 = inlined_call_operand.vmem [shape: f32[1,128], index: 2, kind: input, shape index: {}]   ;;  %s2659_s3 = inlined_call_operand.vmem [shape: f32[1,128], index: 3, kind: input, shape index: {}]   ;;  %s2660_s4 = inlined_call_operand.vmem [shape: bf16[2,8,8,128], index: 4, kind: output, shape index: {}]  }
   0x1   :  { %s2220_s17 = smov 0   ;;  %s2222_s18 = smov 0  }
   0x2   :  { %s2224_s19 = smov 0  }
   0x3 LB: > { %s23_s20 = sadd.s32 1, %s2185_s18  ;;  %p40_p1 = scmp.ne.s32.totalorder %s2177_s16, %s2173_s15  ;;  %s2189_s19 = sphi %s2224_s19, %s14_s19   ;;  %s2185_s18 = sphi %s2222_s18, %s2666_s18   ;;  %s2181_s17 = sphi %s2220_s17, %s2665_s17   ;;  %s2177_s16 = sphi %s2218_s16, %s2664_s16   ;;  %s2173_s15 = sphi %s2216_s15, %s2663_s15  }
   0x4   : > { %p24_p0 = scmp.ge.s32.totalorder %s23_s20, 2  ;;  %p41_p2 = scmp.eq.s32.totalorder %s2189_s19, 0 }
   0x5   : > { %s33_s22 = sadd.s32 1, %s2177_s16  ;;  %p1836_p5 = scmp.ge.s32.totalorder %s2189_s19, 2 }
   0x6   : > { %s2668_s20 = smov (%p24_p0, %s23_s20), 0  ;;  %p42_p3 = por %p41_p2, %p40_p1 }
   0x7   : > { %s30_s21 = ssub.s32 %s2185_s18, %s2668_s20  ;;  %191 = sbr.rel (%p1836_p5) target bundleno = 53 (0x35), region = 28 }
   0x8   : > { %p31_p4 = scmp.eq.s32.totalorder %s30_s21, 0 }
   0xa   : > { %s2251_s23 = scalar_select %p31_p4, %s2177_s16, %s33_s22  }
   0xc   : > { %194 = sbr.rel (!%p42_p3) target bundleno = 53 (0x35), region = 32  ;;  %s196_s24 = sand.u32 (%p42_p3), 1, %s2177_s16  }
   0xd   : > { %s2107_s25 = smul.u32 (%p42_p3), 72, %s2185_s18 }
   0xe   : > { %s2106_s26 = smul.u32 (%p42_p3), 288, %s196_s24 }
   0xf   : > { %s2259_s29 = scalar_lea.vmem (%p42_p3), %s2656_s0, %s2107_s25 }
  0x10   : > { %v218_v0 = vld [vmem:[%s2259_s29] sm:$0xff] (%p42_p3)   ;;  %v222_v1 = vld [vmem:[%s2259_s29 + $0x8] sm:$0xff] (%p42_p3)   ;;  %v226_v2 = vld [vmem:[%s2259_s29 + $0x10] sm:$0xff] (%p42_p3)   ;;  %s2264_s30 = scalar_lea.vmem (%p42_p3), [#allocation2], %s2106_s26 }
  0x11   : > { %219 = vst [vmem:[%s2264_s30] sm:$0xff] %v218_v0   ;;  %v230_v3 = vld [vmem:[%s2259_s29 + $0x18] sm:$0xff]   ;;  %v234_v4 = vld [vmem:[%s2259_s29 + $0x20] sm:$0xff]   ;;  %v238_v5 = vld [vmem:[%s2259_s29 + $0x28] sm:$0xff]  }
  0x12   : > { %223 = vst [vmem:[%s2264_s30 + $0x8] sm:$0xff] %v222_v1   ;;  %v242_v6 = vld [vmem:[%s2259_s29 + $0x30] sm:$0xff]   ;;  %v246_v7 = vld [vmem:[%s2259_s29 + $0x38] sm:$0xff]   ;;  %v250_v8 = vld [vmem:[%s2259_s29 + $0x40] sm:$0xff]  }
  0x13   : > { %227 = vst [vmem:[%s2264_s30 + $0x10] sm:$0xff] %v226_v2   ;;  %v254_v9 = vld [vmem:[%s2259_s29 + $0x90] sm:$0xff]   ;;  %v258_v10 = vld [vmem:[%s2259_s29 + $0x98] sm:$0xff]   ;;  %v262_v11 = vld [vmem:[%s2259_s29 + $0xa0] sm:$0xff]  }
  0x14   : > { %231 = vst [vmem:[%s2264_s30 + $0x18] sm:$0xff] %v230_v3   ;;  %v266_v12 = vld [vmem:[%s2259_s29 + $0xa8] sm:$0xff]   ;;  %v270_v13 = vld [vmem:[%s2259_s29 + $0xb0] sm:$0xff]   ;;  %v274_v14 = vld [vmem:[%s2259_s29 + $0xb8] sm:$0xff]  }
  0x15   : > { %235 = vst [vmem:[%s2264_s30 + $0x20] sm:$0xff] %v234_v4   ;;  %v278_v15 = vld [vmem:[%s2259_s29 + $0xc0] sm:$0xff]   ;;  %v282_v16 = vld [vmem:[%s2259_s29 + $0xc8] sm:$0xff]   ;;  %v286_v17 = vld [vmem:[%s2259_s29 + $0xd0] sm:$0xff]  }
  0x16   : > { %239 = vst [vmem:[%s2264_s30 + $0x28] sm:$0xff] %v238_v5   ;;  %v290_v18 = vld [vmem:[%s2259_s29 + $0x120] sm:$0xff]   ;;  %v294_v19 = vld [vmem:[%s2259_s29 + $0x128] sm:$0xff]   ;;  %v298_v20 = vld [vmem:[%s2259_s29 + $0x130] sm:$0xff]  }
  0x17   : > { %243 = vst [vmem:[%s2264_s30 + $0x30] sm:$0xff] %v242_v6   ;;  %v302_v21 = vld [vmem:[%s2259_s29 + $0x138] sm:$0xff]   ;;  %v306_v22 = vld [vmem:[%s2259_s29 + $0x140] sm:$0xff]   ;;  %v310_v23 = vld [vmem:[%s2259_s29 + $0x148] sm:$0xff]  }
  0x18   : > { %247 = vst [vmem:[%s2264_s30 + $0x38] sm:$0xff] %v246_v7   ;;  %v314_v24 = vld [vmem:[%s2259_s29 + $0x150] sm:$0xff]   ;;  %v318_v25 = vld [vmem:[%s2259_s29 + $0x158] sm:$0xff]   ;;  %v322_v26 = vld [vmem:[%s2259_s29 + $0x160] sm:$0xff]  }
  0x19   : > { %251 = vst [vmem:[%s2264_s30 + $0x40] sm:$0xff] %v250_v8   ;;  %v326_v27 = vld [vmem:[%s2259_s29 + $0x1b0] sm:$0xff]   ;;  %v330_v28 = vld [vmem:[%s2259_s29 + $0x1b8] sm:$0xff]   ;;  %v334_v29 = vld [vmem:[%s2259_s29 + $0x1c0] sm:$0xff]  }
  0x1a   : > { %255 = vst [vmem:[%s2264_s30 + $0x48] sm:$0xff] %v254_v9   ;;  %v338_v30 = vld [vmem:[%s2259_s29 + $0x1c8] sm:$0xff]   ;;  %v342_v31 = vld [vmem:[%s2259_s29 + $0x1d0] sm:$0xff]   ;;  %v346_v32 = vld [vmem:[%s2259_s29 + $0x1d8] sm:$0xff]  }
  0x1b   : > { %259 = vst [vmem:[%s2264_s30 + $0x50] sm:$0xff] %v258_v10   ;;  %v350_v33 = vld [vmem:[%s2259_s29 + $0x1e0] sm:$0xff]   ;;  %v354_v34 = vld [vmem:[%s2259_s29 + $0x1e8] sm:$0xff]   ;;  %v358_v35 = vld [vmem:[%s2259_s29 + $0x1f0] sm:$0xff]  }
  0x1c   : > { %263 = vst [vmem:[%s2264_s30 + $0x58] sm:$0xff] %v262_v11  }
  0x1d   : > { %267 = vst [vmem:[%s2264_s30 + $0x60] sm:$0xff] %v266_v12  }
  0x1e   : > { %271 = vst [vmem:[%s2264_s30 + $0x68] sm:$0xff] %v270_v13  }
  0x1f   : > { %275 = vst [vmem:[%s2264_s30 + $0x70] sm:$0xff] %v274_v14  }
  0x20   : > { %279 = vst [vmem:[%s2264_s30 + $0x78] sm:$0xff] %v278_v15  }
  0x21   : > { %283 = vst [vmem:[%s2264_s30 + $0x80] sm:$0xff] %v282_v16  }
  0x22   : > { %287 = vst [vmem:[%s2264_s30 + $0x88] sm:$0xff] %v286_v17  }
  0x23   : > { %291 = vst [vmem:[%s2264_s30 + $0x90] sm:$0xff] %v290_v18  }
  0x24   : > { %295 = vst [vmem:[%s2264_s30 + $0x98] sm:$0xff] %v294_v19  }
  0x25   : > { %299 = vst [vmem:[%s2264_s30 + $0xa0] sm:$0xff] %v298_v20  }
  0x26   : > { %303 = vst [vmem:[%s2264_s30 + $0xa8] sm:$0xff] %v302_v21  }
  0x27   : > { %307 = vst [vmem:[%s2264_s30 + $0xb0] sm:$0xff] %v306_v22  }
  0x28   : > { %311 = vst [vmem:[%s2264_s30 + $0xb8] sm:$0xff] %v310_v23  }
  0x29   : > { %315 = vst [vmem:[%s2264_s30 + $0xc0] sm:$0xff] %v314_v24  }
  0x2a   : > { %319 = vst [vmem:[%s2264_s30 + $0xc8] sm:$0xff] %v318_v25  }
  0x2b   : > { %323 = vst [vmem:[%s2264_s30 + $0xd0] sm:$0xff] %v322_v26  }
  0x2c   : > { %327 = vst [vmem:[%s2264_s30 + $0xd8] sm:$0xff] %v326_v27  }
  0x2d   : > { %331 = vst [vmem:[%s2264_s30 + $0xe0] sm:$0xff] %v330_v28  }
  0x2e   : > { %335 = vst [vmem:[%s2264_s30 + $0xe8] sm:$0xff] %v334_v29  }
  0x2f   : > { %339 = vst [vmem:[%s2264_s30 + $0xf0] sm:$0xff] %v338_v30  }
  0x30   : > { %343 = vst [vmem:[%s2264_s30 + $0xf8] sm:$0xff] %v342_v31  }
  0x31   : > { %347 = vst [vmem:[%s2264_s30 + $0x100] sm:$0xff] %v346_v32  }
  0x32   : > { %351 = vst [vmem:[%s2264_s30 + $0x108] sm:$0xff] %v350_v33  }
  0x33   : > { %355 = vst [vmem:[%s2264_s30 + $0x110] sm:$0xff] %v354_v34  }
  0x34   : > { %359 = vst [vmem:[%s2264_s30 + $0x118] sm:$0xff] %v358_v35  }
  0x35 PF: > { %p1838_p6 = scmp.ge.s32.totalorder %s2189_s19, 1  ;;  %p528_p7 = scmp.lt.s32.totalorder %s2189_s19, 3 }
  0x37   : > { %p529_p8 = pnand %p1838_p6, %p528_p7 }
  0x38   : > { %s535_s7 = sand.u32 (!%p529_p8), 1, %s2173_s15   ;;  %p583_p9 = scmp.lt.s32.totalorder (!%p529_p8), %s2181_s17, 1 }
  0x39   : > { %532 = sbr.rel (%p529_p8) target bundleno = 353 (0x161), region = 73 }
  0x3a   : > { %s2108_s8 = smul.u32 (!%p529_p8), 288, %s535_s7 }
  0x3c   : > { %s2358_s22 = scalar_lea.vmem (!%p529_p8), [#allocation2], %s2108_s8 }
  0x3e   : > { %v1849_v36 = vld [vmem:[%s2657_s1 + $0x2] sm:$0x3]  ;;  %vm645_vm0 = vcmask 1041408   ;;  %v1890_v38 = vld [vmem:[%s2657_s1 + $0x4] sm:$0x3]  ;;  %vm632_vm1 = vcmask 31744  }
  0x3f   : > { %v647_v37 = vsel %vm645_vm0, %v1849_v36, 0  ;;  %v1903_v39 = vld [vmem:[%s2657_s1 + $0x6] sm:$0x3]  ;;  %v900_v40 = vsel %vm645_vm0, %v1890_v38, 0  ;;  %v600_v42 = vld [vmem:[%s2657_s1] sm:$0x3] }
  0x40   : > { %2103 = vmatpush.bf16.msra.mxu1 %v647_v37  ;;  %2104 = vmatpush.bf16.msra.mxu2 %v647_v37  ;;  %v983_v41 = vsel %vm645_vm0, %v1903_v39, 0  ;;  %v1932_v43 = vld [vmem:[%s2657_s1 + $0x8] sm:$0x3]  ;;  %v711_v44 = vsel %vm645_vm0, %v600_v42, 0  ;;  %v1856_v46 = vld [vmem:[%s2358_s22 + $0x58] sm:$0xf] }
  0x41   : > { %2105 = vmatpush.bf16.msra.mxu3 %v647_v37  ;;  %656 = vmatpush.bf16.msra.mxu0 %v647_v37  ;;  %v1066_v45 = vsel %vm645_vm0, %v1932_v43, 0  ;;  %v2061_v47 = vld [vmem:[%s2358_s22 + $0x5c] sm:$0xf0]  ;;  %v1860_v48 = vld [vmem:[%s2358_s22 + $0x68] sm:$0xf]  ;;  %s2670_s17 = smov (!%p583_p9, %s2181_s17), 1 }
  0x42   : > { %v1857_v49 = vor.u32 %v2061_v47, %v1856_v46  ;;  %v2062_v50 = vld [vmem:[%s2358_s22 + $0x6c] sm:$0xf0]  ;;  %v1864_v51 = vld [vmem:[%s2358_s22 + $0x78] sm:$0xf]  ;;  %v2063_v52 = vld [vmem:[%s2358_s22 + $0x7c] sm:$0xf0] }
  0x43   : > { %v1861_v53 = vor.u32 %v2062_v50, %v1860_v48  ;;  %v1865_v54 = vor.u32 %v2063_v52, %v1864_v51  ;;  %v1852_v55 = vld [vmem:[%s2358_s22 + $0x48] sm:$0xf]  ;;  %v2060_v56 = vld [vmem:[%s2358_s22 + $0x4c] sm:$0xf0]  ;;  %v742_v58 = vld [vmem:[%s2358_s22] sm:$0xf] }
  0x44   : > { %909 = vmatpush.bf16.msrb.mxu2 %v900_v40  ;;  %720 = vmatpush.bf16.msrb.mxu1 %v711_v44  ;;  %v1853_v57 = vor.u32 %v2060_v56, %v1852_v55  ;;  %v743_v59 = vld [vmem:[%s2358_s22 + $0x4] sm:$0x1]  ;;  %v744_v60 = vld [vmem:[%s2358_s22 + $0x8] sm:$0xf]  ;;  %v745_v61 = vld [vmem:[%s2358_s22 + $0xc] sm:$0x1] }
  0x45   : > { %992 = vmatpush.bf16.msrb.mxu3 %v983_v41  ;;  %1075 = vmatpush.bf16.msrb.mxu0 %v1066_v45  ;;  %v762_v62 = vshrl.u32 %v742_v58, 16  ;;  %v765_v63 = vshll.u32 %v742_v58, 16  ;;  %v771_v0 = vshll.u32 %v743_v59, 16  ;;  %v776_v1 = vshrl.u32 %v744_v60, 16  ;;  %v1982_v4 = vld [vmem:[%s2657_s1 + $0xc] sm:$0x3] }
  0x46   : > { %1867 = vmatmul.msk.bf16.vlgmr.msra.gmra.mxu1 %vm632_vm1, %v1857_v49  ;;  %1868 = vmatmul.msk.bf16.vlgmr.msra.gmra.mxu2 %vm632_vm1, %v1861_v53  ;;  %vm758_vm2 = vsmask.f32 3328  ;;  %v779_v2 = vshll.u32 %v744_v60, 16  ;;  %v785_v3 = vshll.u32 %v745_v61, 16  ;;  %vm759_vm3 = vsmask.f32 7440 }
  0x47   : > { %1869 = vmatmul.msk.bf16.vlgmr.msra.gmra.mxu3 %vm632_vm1, %v1865_v54  ;;  %1866 = vmatmul.msk.bf16.vlgmr.msra.gmra.mxu0 %vm632_vm1, %v1853_v57  ;;  %v764_v5 = vrot.slane %v762_v62, 4  ;;  %v767_v6 = vrot.slane %v765_v63, 5  ;;  %v778_v7 = vrot.slane %v776_v1, 4  ;;  %v773_v8 = vrot.slane %v771_v0, 5  ;;  %v2011_v13 = vld [vmem:[%s2657_s1 + $0xe] sm:$0x3]  ;;  %vm2393_vm4 = vmor %vm758_vm2, %vm759_vm3 }
  0x48   : > { %v781_v9 = vrot.slane %v779_v2, 5  ;;  %v787_v10 = vrot.slane %v785_v3, 5  ;;  %v1343_v11 = vsel %vm645_vm0, %v1982_v4, 0  ;;  %v1969_v14 = vld [vmem:[%s2657_s1 + $0xa] sm:$0x3]  ;;  %v1426_v20 = vsel %vm645_vm0, %v2011_v13, 0 }
  0x49   : > { %v768_v12 = vor.u32 %v767_v6, %v764_v5  ;;  %1352 = vmatpush.bf16.msra.mxu2 %v1343_v11  ;;  %v2048_v15 = vld [vmem:[%s2657_s1 + $0x10] sm:$0x3]  ;;  %v1872_v16 = vld [vmem:[%s2358_s22] sm:$0xf]  ;;  %v2056_v17 = vld [vmem:[%s2358_s22 + $0x4] sm:$0xf0]  ;;  %1435 = vmatpush.bf16.msra.mxu3 %v1426_v20 }
  0x4a   : > { %v782_v19 = vor.u32 %v781_v9, %v778_v7  ;;  %v1260_v21 = vsel %vm645_vm0, %v1969_v14, 0  ;;  %v1620_v22 = vsel %vm645_vm0, %v2048_v15, 0  ;;  %v1906_v24 = vld [vmem:[%s2358_s22 + $0x90] sm:$0xf]  ;;  %v2064_v27 = vld [vmem:[%s2358_s22 + $0x94] sm:$0xf0]  ;;  %v1873_v41 = vor.u32 %v2056_v17, %v1872_v16 }
  0x4b   : > { %v769_v23 = vrot.slane %v768_v12, 4  ;;  %1269 = vmatpush.bf16.msra.mxu1 %v1260_v21  ;;  %v746_v25 = vld [vmem:[%s2358_s22 + $0x10] sm:$0xf]  ;;  %1629 = vmatpush.bf16.msra.mxu0 %v1620_v22  ;;  %v748_v28 = vld [vmem:[%s2358_s22 + $0x18] sm:$0xf]  ;;  %v1907_v45 = vor.u32 %v2064_v27, %v1906_v24  ;;  %s2055_s10 = sshll.u32 %s2670_s17, 5 }
  0x4c   : > { %v783_v26 = vrot.slane %v782_v19, 4  ;;  %v790_v29 = vshrl.u32 %v746_v25, 16  ;;  %v1935_v31 = vld [vmem:[%s2358_s22 + $0xd8] sm:$0xf]  ;;  %v2068_v32 = vld [vmem:[%s2358_s22 + $0xdc] sm:$0xf0]  ;;  %s2610_s13 = scalar_lea.vmem %s2660_s4, %s2055_s10 }
  0x4d   : > { %v774_v30 = vsel %vm2393_vm4, %v769_v23, %v773_v8  ;;  %v793_v33 = vshll.u32 %v746_v25, 16  ;;  %v804_v34 = vshrl.u32 %v748_v28, 16  ;;  %v747_v37 = vld [vmem:[%s2358_s22 + $0x14] sm:$0x1]  ;;  %v749_v38 = vld [vmem:[%s2358_s22 + $0x1c] sm:$0x1]  ;;  %v1936_v46 = vor.u32 %v2068_v32, %v1935_v31 }
  0x4e   : > { %v788_v35 = vsel %vm2393_vm4, %v783_v26, %v787_v10  ;;  %v875_v36 = vunpack.c.l.b16 %v774_v30  ;;  %v792_v39 = vrot.slane %v790_v29, 4  ;;  %v807_v40 = vshll.u32 %v748_v28, 16  ;;  %v750_v57 = vld [vmem:[%s2358_s22 + $0x20] sm:$0xf]  ;;  %v752_v58 = vld [vmem:[%s2358_s22 + $0x28] sm:$0xf] }
  0x4f   : > { %v876_v42 = vunpack.c.l.b16 %v788_v35  ;;  %v795_v43 = vrot.slane %v793_v33, 5  ;;  %v806_v44 = vrot.slane %v804_v34, 4  ;;  %v799_v50 = vshll.u32 %v747_v37, 16  ;;  %v1876_v1 = vld [vmem:[%s2358_s22 + $0x10] sm:$0xf] }
  0x50   : > { %v809_v47 = vrot.slane %v807_v40, 5  ;;  %v813_v51 = vshll.u32 %v749_v38, 16  ;;  %v818_v59 = vshrl.u32 %v750_v57, 16  ;;  %v821_v60 = vshll.u32 %v750_v57, 16  ;;  %v2057_v2 = vld [vmem:[%s2358_s22 + $0x14] sm:$0xf0] }
  0x51   : > { %v883_v48 = vpack.c.b16 %v876_v42, %v875_v36  ;;  %v796_v49 = vor.u32 %v795_v43, %v792_v39  ;;  %v801_v54 = vrot.slane %v799_v50, 5  ;;  %v832_v63 = vshrl.u32 %v752_v58, 16  ;;  %v1910_v5 = vld [vmem:[%s2358_s22 + $0xa0] sm:$0xf]  ;;  %v2065_v6 = vld [vmem:[%s2358_s22 + $0xa4] sm:$0xf0] }
  0x52   : > { %v810_v52 = vor.u32 %v809_v47, %v806_v44  ;;  %v815_v56 = vrot.slane %v813_v51, 5  ;;  %v835_v0 = vshll.u32 %v752_v58, 16  ;;  %v1939_v7 = vld [vmem:[%s2358_s22 + $0xe8] sm:$0xf]  ;;  %v2069_v8 = vld [vmem:[%s2358_s22 + $0xec] sm:$0xf0]  ;;  %v1877_v15 = vor.u32 %v2057_v2, %v1876_v1 }
  0x53   : > { %v797_v53 = vrot.slane %v796_v49, 4  ;;  %v820_v9 = vrot.slane %v818_v59, 4  ;;  %v823_v10 = vrot.slane %v821_v60, 5  ;;  %v834_v11 = vrot.slane %v832_v63, 4  ;;  %v751_v13 = vld [vmem:[%s2358_s22 + $0x24] sm:$0x1] }
  0x54   : > { %v811_v55 = vrot.slane %v810_v52, 4  ;;  %v837_v12 = vrot.slane %v835_v0, 5  ;;  %v753_v14 = vld [vmem:[%s2358_s22 + $0x2c] sm:$0x1]  ;;  %v1911_v17 = vor.u32 %v2065_v6, %v1910_v5  ;;  %v1940_v19 = vor.u32 %v2069_v8, %v1939_v7  ;;  %v754_v24 = vld [vmem:[%s2358_s22 + $0x30] sm:$0xf] }
  0x55   : > { %v802_v61 = vsel %vm2393_vm4, %v797_v53, %v801_v54  ;;  %v824_v20 = vor.u32 %v823_v10, %v820_v9  ;;  %v827_v21 = vshll.u32 %v751_v13, 16  ;;  %v841_v23 = vshll.u32 %v753_v14, 16  ;;  %v756_v25 = vld [vmem:[%s2358_s22 + $0x38] sm:$0xf]  ;;  %v755_v40 = vld [vmem:[%s2358_s22 + $0x34] sm:$0x1] }
  0x56   : > { %1886 = vmatmul.msk.bf16.vlgmr.msrb.gmra.mxu1 %vm632_vm1, %v1873_v41  ;;  %1891 = vmatmul.msk.bf16.vlgmr.msrb.gmra.mxu2 %vm632_vm1, %v883_v48  ;;  %v816_v62 = vsel %vm2393_vm4, %v811_v55, %v815_v56  ;;  %v877_v3 = vunpack.c.l.b16 %v802_v61  ;;  %v838_v22 = vor.u32 %v837_v12, %v834_v11  ;;  %v846_v30 = vshrl.u32 %v754_v24, 16  ;;  %v757_v41 = vld [vmem:[%s2358_s22 + $0x3c] sm:$0x1]  ;;  %v1880_v42 = vld [vmem:[%s2358_s22 + $0x20] sm:$0xf] }
  0x57   : > { %1920 = vmatmul.msk.bf16.vlgmr.msrb.gmra.mxu3 %vm632_vm1, %v1907_v45  ;;  %1949 = vmatmul.msk.bf16.vlgmr.msrb.gmra.mxu0 %vm632_vm1, %v1936_v46  ;;  %v878_v4 = vunpack.c.l.b16 %v816_v62  ;;  %v825_v26 = vrot.slane %v824_v20, 4  ;;  %v829_v27 = vrot.slane %v827_v21, 5  ;;  %v843_v29 = vrot.slane %v841_v23, 5  ;;  %v2058_v43 = vld [vmem:[%s2358_s22 + $0x24] sm:$0xf0] }
  0x58   : > { %v839_v28 = vrot.slane %v838_v22, 4  ;;  %v849_v31 = vshll.u32 %v754_v24, 16  ;;  %v860_v32 = vshrl.u32 %v756_v25, 16  ;;  %v863_v33 = vshll.u32 %v756_v25, 16  ;;  %v1914_v46 = vld [vmem:[%s2358_s22 + $0xb0] sm:$0xf] }
  0x59   : > { %v884_v16 = vpack.c.b16 %v878_v4, %v877_v3  ;;  %v830_v34 = vsel %vm2393_vm4, %v825_v26, %v829_v27  ;;  %v848_v36 = vrot.slane %v846_v30, 4  ;;  %v2066_v47 = vld [vmem:[%s2358_s22 + $0xb4] sm:$0xf0]  ;;  %v2070_v49 = vld [vmem:[%s2358_s22 + $0xfc] sm:$0xf0]  ;;  %v855_v51 = vshll.u32 %v755_v40, 16 }
  0x5a   : > { %v844_v35 = vsel %vm2393_vm4, %v839_v28, %v843_v29  ;;  %v851_v37 = vrot.slane %v849_v31, 5  ;;  %v862_v38 = vrot.slane %v860_v32, 4  ;;  %v865_v39 = vrot.slane %v863_v33, 5  ;;  %v1943_v48 = vld [vmem:[%s2358_s22 + $0xf8] sm:$0xf] }
  0x5b   : > { %v879_v44 = vunpack.c.l.b16 %v830_v34  ;;  %v880_v45 = vunpack.c.l.b16 %v844_v35  ;;  %v869_v53 = vshll.u32 %v757_v41, 16  ;;  %v1881_v54 = vor.u32 %v2058_v43, %v1880_v42  ;;  %v1953_v62 = vld [vmem:[%s2358_s22 + $0x90] sm:$0xf]  ;;  %v1955_v63 = vld [vmem:[%s2358_s22 + $0x98] sm:$0xf] }
  0x5c   : > { %v852_v50 = vor.u32 %v851_v37, %v848_v36  ;;  %v866_v52 = vor.u32 %v865_v39, %v862_v38  ;;  %v1915_v56 = vor.u32 %v2066_v47, %v1914_v46  ;;  %v1944_v57 = vor.u32 %v2070_v49, %v1943_v48  ;;  %v2032_v0 = vld [vmem:[%s2358_s22 + $0x8] sm:$0xf]  ;;  %v2034_v1 = vld [vmem:[%s2358_s22 + $0x10] sm:$0xf]  ;;  %v2059_v13 = vld [vmem:[%s2358_s22 + $0x34] sm:$0xf0] }
  0x5d   : > { %v885_v55 = vpack.c.b16 %v880_v45, %v879_v44  ;;  %v857_v59 = vrot.slane %v855_v51, 5  ;;  %v871_v61 = vrot.slane %v869_v53, 5  ;;  %v1122_v4 = vshrl.u32 %v1953_v62, 16  ;;  %v1884_v12 = vld [vmem:[%s2358_s22 + $0x30] sm:$0xf] }
  0x5e   : > { %v853_v58 = vrot.slane %v852_v50, 4  ;;  %v867_v60 = vrot.slane %v866_v52, 4  ;;  %v1125_v5 = vshll.u32 %v1953_v62, 16  ;;  %v1136_v6 = vshrl.u32 %v1955_v63, 16  ;;  %v1956_v24 = vld [vmem:[%s2358_s22 + $0x9c] sm:$0x1] }
  0x5f   : > { %v1139_v7 = vshll.u32 %v1955_v63, 16  ;;  %v1482_v8 = vshrl.u32 %v2032_v0, 16  ;;  %v1485_v9 = vshll.u32 %v2032_v0, 16  ;;  %v1496_v10 = vshrl.u32 %v2034_v1, 16  ;;  %v2033_v29 = vld [vmem:[%s2358_s22 + $0xc] sm:$0x1] }
  0x60   : > { %v858_v2 = vsel %vm2393_vm4, %v853_v58, %v857_v59  ;;  %v872_v3 = vsel %vm2393_vm4, %v867_v60, %v871_v61  ;;  %v1499_v11 = vshll.u32 %v2034_v1, 16  ;;  %v1124_v20 = vrot.slane %v1122_v4, 4  ;;  %v2035_v30 = vld [vmem:[%s2358_s22 + $0x14] sm:$0x1]  ;;  %v1947_v34 = vld [vmem:[%s2358_s22 + $0x108] sm:$0xf] }
  0x61   : > { %v881_v14 = vunpack.c.l.b16 %v858_v2  ;;  %v1127_v21 = vrot.slane %v1125_v5, 5  ;;  %v1138_v22 = vrot.slane %v1136_v6, 4  ;;  %v1141_v23 = vrot.slane %v1139_v7, 5  ;;  %v2071_v35 = vld [vmem:[%s2358_s22 + $0x10c] sm:$0xf0] }
  0x62   : > { %v1484_v25 = vrot.slane %v1482_v8, 4  ;;  %v1487_v26 = vrot.slane %v1485_v9, 5  ;;  %v1498_v27 = vrot.slane %v1496_v10, 4  ;;  %v1501_v28 = vrot.slane %v1499_v11, 5  ;;  %v1957_v45 = vld [vmem:[%s2358_s22 + $0xa0] sm:$0xf] }
  0x63   : > { %v1885_v31 = vor.u32 %v2059_v13, %v1884_v12  ;;  %v1128_v36 = vor.u32 %v1127_v21, %v1124_v20  ;;  %v1142_v38 = vor.u32 %v1141_v23, %v1138_v22  ;;  %v1145_v39 = vshll.u32 %v1956_v24, 16  ;;  %v1959_v46 = vld [vmem:[%s2358_s22 + $0xa8] sm:$0xf]  ;;  %v2036_v59 = vld [vmem:[%s2358_s22 + $0x18] sm:$0xf] }
  0x64   : > { %v1488_v40 = vor.u32 %v1487_v26, %v1484_v25  ;;  %v1491_v41 = vshll.u32 %v2033_v29, 16  ;;  %v1502_v42 = vor.u32 %v1501_v28, %v1498_v27  ;;  %v1505_v43 = vshll.u32 %v2035_v30, 16  ;;  %v2038_v60 = vld [vmem:[%s2358_s22 + $0x20] sm:$0xf]  ;;  %v1958_v1 = vld [vmem:[%s2358_s22 + $0xa4] sm:$0x1] }
  0x65   : > { %v1948_v44 = vor.u32 %v2071_v35, %v1947_v34  ;;  %v1129_v47 = vrot.slane %v1128_v36, 4  ;;  %v1143_v49 = vrot.slane %v1142_v38, 4  ;;  %v1147_v50 = vrot.slane %v1145_v39, 5  ;;  %v1960_v6 = vld [vmem:[%s2358_s22 + $0xac] sm:$0x1] }
  0x66   : > { %1887 = vmatmul.msk.bf16.gmra.mxu1 %vm632_vm1, %v1877_v15  ;;  %1892 = vmatmul.msk.bf16.gmra.mxu2 %vm632_vm1, %v884_v16  ;;  %v882_v15 = vunpack.c.l.b16 %v872_v3  ;;  %v1918_v16 = vld [vmem:[%s2358_s22 + $0xc0] sm:$0xf]  ;;  %v1489_v51 = vrot.slane %v1488_v40, 4  ;;  %v1493_v52 = vrot.slane %v1491_v41, 5  ;;  %v1503_v53 = vrot.slane %v1502_v42, 4 }
  0x67   : > { %1921 = vmatmul.msk.bf16.gmra.mxu3 %vm632_vm1, %v1911_v17  ;;  %1950 = vmatmul.msk.bf16.gmra.mxu0 %vm632_vm1, %v1940_v19  ;;  %v2067_v17 = vld [vmem:[%s2358_s22 + $0xc4] sm:$0xf0]  ;;  %v1954_v19 = vld [vmem:[%s2358_s22 + $0x94] sm:$0x1]  ;;  %v1167_v58 = vshll.u32 %v1959_v46, 16  ;;  %v1148_v62 = vsel %vm2393_vm4, %v1143_v49, %v1147_v50  ;;  %v1510_v7 = vshrl.u32 %v2036_v59, 16 }
  0x68   : > { %v886_v32 = vpack.c.b16 %v882_v15, %v881_v14  ;;  %v1919_v33 = vor.u32 %v2067_v17, %v1918_v16  ;;  %v1131_v37 = vshll.u32 %v1954_v19, 16  ;;  %v1494_v63 = vsel %vm2393_vm4, %v1489_v51, %v1493_v52  ;;  %v1985_v13 = vld [vmem:[%s2358_s22 + $0x8] sm:$0xf]  ;;  %v2072_v14 = vld [vmem:[%s2358_s22 + $0xc] sm:$0xf0] }
  0x69   : > { %v1169_v5 = vrot.slane %v1167_v58, 5  ;;  %v1513_v8 = vshll.u32 %v2036_v59, 16  ;;  %v1524_v9 = vshrl.u32 %v2038_v60, 16  ;;  %v1527_v10 = vshll.u32 %v2038_v60, 16  ;;  %v2014_v17 = vld [vmem:[%s2358_s22 + $0x50] sm:$0xf] }
  0x6a   : > { %v1133_v48 = vrot.slane %v1131_v37, 5  ;;  %v1236_v12 = vunpack.c.l.b16 %v1148_v62  ;;  %v1595_v15 = vunpack.c.l.b16 %v1494_v63  ;;  %v2076_v19 = vld [vmem:[%s2358_s22 + $0x54] sm:$0xf0]  ;;  %v1159_v21 = vshll.u32 %v1958_v1, 16  ;;  %v2037_v29 = vld [vmem:[%s2358_s22 + $0x1c] sm:$0x1] }
  0x6b   : > { %v1173_v23 = vshll.u32 %v1960_v6, 16  ;;  %v1512_v24 = vrot.slane %v1510_v7, 4  ;;  %v1515_v25 = vrot.slane %v1513_v8, 5  ;;  %v1526_v26 = vrot.slane %v1524_v9, 4  ;;  %v2039_v30 = vld [vmem:[%s2358_s22 + $0x24] sm:$0x1] }
  0x6c   : > { %v1134_v61 = vsel %vm2393_vm4, %v1129_v47, %v1133_v48  ;;  %v1529_v27 = vrot.slane %v1527_v10, 5  ;;  %v1161_v35 = vrot.slane %v1159_v21, 5  ;;  %v1519_v39 = vshll.u32 %v2037_v29, 16  ;;  %v1961_v42 = vld [vmem:[%s2358_s22 + $0xb0] sm:$0xf] }
  0x6d   : > { %v1235_v11 = vunpack.c.l.b16 %v1134_v61  ;;  %v1175_v37 = vrot.slane %v1173_v23, 5  ;;  %v1516_v38 = vor.u32 %v1515_v25, %v1512_v24  ;;  %v1533_v41 = vshll.u32 %v2039_v30, 16  ;;  %v2042_v51 = vld [vmem:[%s2358_s22 + $0x30] sm:$0xf]  ;;  %v2073_v1 = vld [vmem:[%s2358_s22 + $0x1c] sm:$0xf0] }
  0x6e   : > { %v1530_v40 = vor.u32 %v1529_v27, %v1526_v26  ;;  %v1521_v48 = vrot.slane %v1519_v39, 5  ;;  %v1178_v52 = vshrl.u32 %v1961_v42, 16  ;;  %v1552_v58 = vshrl.u32 %v2042_v51, 16  ;;  %v1962_v7 = vld [vmem:[%s2358_s22 + $0xb4] sm:$0x1] }
  0x6f   : > { %v1243_v28 = vpack.c.b16 %v1236_v12, %v1235_v11  ;;  %v1517_v47 = vrot.slane %v1516_v38, 4  ;;  %v1535_v50 = vrot.slane %v1533_v41, 5  ;;  %v1555_v59 = vshll.u32 %v2042_v51, 16  ;;  %v1964_v8 = vld [vmem:[%s2358_s22 + $0xbc] sm:$0x1] }
  0x70   : > { %v1531_v49 = vrot.slane %v1530_v40, 4  ;;  %v2077_v11 = vld [vmem:[%s2358_s22 + $0x64] sm:$0xf0]  ;;  %v1187_v21 = vshll.u32 %v1962_v7, 16  ;;  %v1201_v23 = vshll.u32 %v1964_v8, 16 }
  0x71   : > { %v1522_v62 = vsel %vm2393_vm4, %v1517_v47, %v1521_v48  ;;  %v1965_v39 = vld [vmem:[%s2358_s22 + $0xc0] sm:$0xf]  ;;  %v1967_v40 = vld [vmem:[%s2358_s22 + $0xc8] sm:$0xf] }
  0x72   : > { %v1536_v63 = vsel %vm2393_vm4, %v1531_v49, %v1535_v50  ;;  %v1597_v12 = vunpack.c.l.b16 %v1522_v62  ;;  %v1220_v47 = vshrl.u32 %v1967_v40, 16  ;;  %v1223_v48 = vshll.u32 %v1967_v40, 16  ;;  %v2026_v40 = vld [vmem:[%s2358_s22 + $0x80] sm:$0xf] }
  0x76   : > { %1888 = vmatmul.msk.bf16.gmra.mxu1 %vm632_vm1, %v1881_v54  ;;  %1893 = vmatmul.msk.bf16.gmra.mxu2 %vm632_vm1, %v885_v55  ;;  %v1507_v54 = vrot.slane %v1505_v43, 5  ;;  %v1150_v55 = vshrl.u32 %v1957_v45, 16  ;;  %v1963_v43 = vld [vmem:[%s2358_s22 + $0xb8] sm:$0xf] }
  0x77   : > { %1922 = vmatmul.msk.bf16.gmra.mxu3 %vm632_vm1, %v1915_v56  ;;  %1951 = vmatmul.msk.bf16.gmra.mxu0 %vm632_vm1, %v1944_v57  ;;  %v1153_v56 = vshll.u32 %v1957_v45, 16  ;;  %v1164_v57 = vshrl.u32 %v1959_v46, 16  ;;  %v2040_v46 = vld [vmem:[%s2358_s22 + $0x28] sm:$0xf] }
  0x78   : > { %v1508_v0 = vsel %vm2393_vm4, %v1503_v53, %v1507_v54  ;;  %v1152_v2 = vrot.slane %v1150_v55, 4  ;;  %v1181_v53 = vshll.u32 %v1961_v42, 16  ;;  %v1192_v54 = vshrl.u32 %v1963_v43, 16 }
  0x79   : > { %v1155_v3 = vrot.slane %v1153_v56, 5  ;;  %v1166_v4 = vrot.slane %v1164_v57, 4  ;;  %v1596_v16 = vunpack.c.l.b16 %v1508_v0  ;;  %v1195_v55 = vshll.u32 %v1963_v43, 16  ;;  %v1989_v0 = vld [vmem:[%s2358_s22 + $0x18] sm:$0xf] }
  0x7a   : > { %v1538_v56 = vshrl.u32 %v2040_v46, 16  ;;  %v1541_v57 = vshll.u32 %v2040_v46, 16  ;;  %v1990_v24 = vor.u32 %v2073_v1, %v1989_v0  ;;  %v2044_v43 = vld [vmem:[%s2358_s22 + $0x38] sm:$0xf]  ;;  %v1209_v46 = vshll.u32 %v1965_v39, 16 }
  0x7b   : > { %v1156_v20 = vor.u32 %v1155_v3, %v1152_v2  ;;  %v1170_v22 = vor.u32 %v1169_v5, %v1166_v4  ;;  %v2018_v2 = vld [vmem:[%s2358_s22 + $0x60] sm:$0xf]  ;;  %v1180_v3 = vrot.slane %v1178_v52, 4  ;;  %v1183_v4 = vrot.slane %v1181_v53, 5 }
  0x7c   : > { %v1194_v5 = vrot.slane %v1192_v54, 4  ;;  %v1197_v6 = vrot.slane %v1195_v55, 5  ;;  %v1540_v9 = vrot.slane %v1538_v56, 4  ;;  %v1543_v10 = vrot.slane %v1541_v57, 5  ;;  %v1993_v57 = vld [vmem:[%s2358_s22 + $0x28] sm:$0xf] }
  0x7d   : > { %v1157_v34 = vrot.slane %v1156_v20, 4  ;;  %v1171_v36 = vrot.slane %v1170_v22, 4  ;;  %v1184_v20 = vor.u32 %v1183_v4, %v1180_v3  ;;  %v2019_v25 = vor.u32 %v2077_v11, %v2018_v2  ;;  %v1966_v3 = vld [vmem:[%s2358_s22 + $0xc4] sm:$0x1]  ;;  %v1968_v4 = vld [vmem:[%s2358_s22 + $0xcc] sm:$0x1] }
  0x7e   : > { %v1198_v22 = vor.u32 %v1197_v6, %v1194_v5  ;;  %v1544_v26 = vor.u32 %v1543_v10, %v1540_v9  ;;  %v1566_v51 = vshrl.u32 %v2044_v43, 16  ;;  %v1569_v52 = vshll.u32 %v2044_v43, 16 }
  0x7f   : > { %v1176_v45 = vsel %vm2393_vm4, %v1171_v36, %v1175_v37  ;;  %v1211_v62 = vrot.slane %v1209_v46, 5  ;;  %v1225_v0 = vrot.slane %v1223_v48, 5 }
  0x80   : > { %v1238_v61 = vunpack.c.l.b16 %v1176_v45  ;;  %v1206_v45 = vshrl.u32 %v1965_v39, 16  ;;  %v1568_v5 = vrot.slane %v1566_v51, 4  ;;  %v1571_v6 = vrot.slane %v1569_v52, 5  ;;  %v2075_v39 = vld [vmem:[%s2358_s22 + $0x3c] sm:$0xf0] }
  0x86   : > { %1889 = vmatmul.msk.bf16.gmra.mxu1 %vm632_vm1, %v1885_v31  ;;  %1894 = vmatmul.msk.bf16.gmra.mxu2 %vm632_vm1, %v886_v32  ;;  %v1986_v31 = vor.u32 %v2072_v14, %v1985_v13  ;;  %v2015_v32 = vor.u32 %v2076_v19, %v2014_v17  ;;  %v1598_v13 = vunpack.c.l.b16 %v1536_v63  ;;  %v2041_v14 = vld [vmem:[%s2358_s22 + $0x2c] sm:$0x1]  ;;  %v2043_v19 = vld [vmem:[%s2358_s22 + $0x34] sm:$0x1]  ;;  %v1222_v63 = vrot.slane %v1220_v47, 4 }
  0x87   : > { %1923 = vmatmul.msk.bf16.gmra.mxu3 %vm632_vm1, %v1919_v33  ;;  %1952 = vmatmul.msk.bf16.gmra.mxu0 %vm632_vm1, %v1948_v44  ;;  %v1603_v33 = vpack.c.b16 %v1596_v16, %v1595_v15  ;;  %v1162_v44 = vsel %vm2393_vm4, %v1157_v34, %v1161_v35  ;;  %v1554_v15 = vrot.slane %v1552_v58, 4  ;;  %v1557_v16 = vrot.slane %v1555_v59, 5  ;;  %v2074_v58 = vld [vmem:[%s2358_s22 + $0x2c] sm:$0xf0] }
  0x88   : > { %v1237_v60 = vunpack.c.l.b16 %v1162_v44  ;;  %v1547_v27 = vshll.u32 %v2041_v14, 16  ;;  %v1561_v30 = vshll.u32 %v2043_v19, 16  ;;  %v1203_v34 = vrot.slane %v1201_v23, 5  ;;  %v2046_v44 = vld [vmem:[%s2358_s22 + $0x40] sm:$0xf] }
  0x89   : > { %v1558_v29 = vor.u32 %v1557_v16, %v1554_v15  ;;  %v1545_v35 = vrot.slane %v1544_v26, 4  ;;  %v1580_v53 = vshrl.u32 %v2046_v44, 16  ;;  %v1583_v54 = vshll.u32 %v2046_v44, 16  ;;  %v2022_v59 = vld [vmem:[%s2358_s22 + $0x70] sm:$0xf] }
  0x8a   : > { %v1244_v17 = vpack.c.b16 %v1238_v61, %v1237_v60  ;;  %v1549_v36 = vrot.slane %v1547_v27, 5  ;;  %v1563_v38 = vrot.slane %v1561_v30, 5  ;;  %v2078_v60 = vld [vmem:[%s2358_s22 + $0x74] sm:$0xf0]  ;;  %v1208_v61 = vrot.slane %v1206_v45, 4 }
  0x8b   : > { %v1559_v37 = vrot.slane %v1558_v29, 4  ;;  %v1582_v7 = vrot.slane %v1580_v53, 4  ;;  %v1585_v8 = vrot.slane %v1583_v54, 5  ;;  %v1994_v10 = vor.u32 %v2074_v58, %v1993_v57 }
  0x8c   : > { %v1550_v49 = vsel %vm2393_vm4, %v1545_v35, %v1549_v36  ;;  %v2023_v11 = vor.u32 %v2078_v60, %v2022_v59  ;;  %v1212_v14 = vor.u32 %v1211_v62, %v1208_v61  ;;  %v1215_v15 = vshll.u32 %v1966_v3, 16 }
  0x8d   : > { %v1564_v50 = vsel %vm2393_vm4, %v1559_v37, %v1563_v38  ;;  %v1599_v1 = vunpack.c.l.b16 %v1550_v49  ;;  %v1226_v16 = vor.u32 %v1225_v0, %v1222_v63  ;;  %v1997_v38 = vld [vmem:[%s2358_s22 + $0x38] sm:$0xf] }
  0x8e   : > { %v1600_v2 = vunpack.c.l.b16 %v1564_v50  ;;  %v1998_v46 = vor.u32 %v2075_v39, %v1997_v38 }
  0x8f   : > { %v1227_v26 = vrot.slane %v1226_v16, 4 }
  0x90   : > { %v1605_v19 = vpack.c.b16 %v1600_v2, %v1599_v1 }
  0x96   : > { %1970 = vmatmul.msk.bf16.vlgmr.msra.gmra.mxu1 %vm632_vm1, %v1243_v28  ;;  %1999 = vmatmul.msk.bf16.vlgmr.msra.gmra.mxu2 %vm632_vm1, %v1986_v31  ;;  %v1604_v28 = vpack.c.b16 %v1598_v13, %v1597_v12  ;;  %v1185_v31 = vrot.slane %v1184_v20, 4  ;;  %v2045_v12 = vld [vmem:[%s2358_s22 + $0x3c] sm:$0x1]  ;;  %v2047_v13 = vld [vmem:[%s2358_s22 + $0x44] sm:$0x1]  ;;  %v1572_v20 = vor.u32 %v1571_v6, %v1568_v5 }
  0x97   : > { %2028 = vmatmul.msk.bf16.vlgmr.msra.gmra.mxu3 %vm632_vm1, %v2015_v32  ;;  %2049 = vmatmul.msk.bf16.vlgmr.msra.gmra.mxu0 %vm632_vm1, %v1603_v33  ;;  %v1189_v32 = vrot.slane %v1187_v21, 5  ;;  %v1199_v33 = vrot.slane %v1198_v22, 4  ;;  %v1575_v21 = vshll.u32 %v2045_v12, 16  ;;  %v1586_v22 = vor.u32 %v1585_v8, %v1582_v7 }
  0x98   : > { %v1589_v23 = vshll.u32 %v2047_v13, 16 }
  0x99   : > { %v1190_v41 = vsel %vm2393_vm4, %v1185_v31, %v1189_v32  ;;  %v1204_v42 = vsel %vm2393_vm4, %v1199_v33, %v1203_v34  ;;  %v1577_v29 = vrot.slane %v1575_v21, 5  ;;  %v1587_v30 = vrot.slane %v1586_v22, 4 }
  0x9a   : > { %v1239_v55 = vunpack.c.l.b16 %v1190_v41  ;;  %v1240_v56 = vunpack.c.l.b16 %v1204_v42  ;;  %v1591_v31 = vrot.slane %v1589_v23, 5  ;;  %v2079_v41 = vld [vmem:[%s2358_s22 + $0x84] sm:$0xf0] }
  0x9b   : > { %v2027_v47 = vor.u32 %v2079_v41, %v2026_v40 }
  0x9c   : > { %v1245_v9 = vpack.c.b16 %v1240_v56, %v1239_v55  ;;  %v1592_v35 = vsel %vm2393_vm4, %v1587_v30, %v1591_v31 }
  0x9d   : > { %v1602_v43 = vunpack.c.l.b16 %v1592_v35 }
  0xa6   : > { %1971 = vmatmul.msk.bf16.gmra.mxu1 %vm632_vm1, %v1244_v17  ;;  %2000 = vmatmul.msk.bf16.gmra.mxu2 %vm632_vm1, %v1990_v24  ;;  %v1229_v17 = vshll.u32 %v1968_v4, 16  ;;  %v1213_v24 = vrot.slane %v1212_v14, 4 }
  0xa7   : > { %2029 = vmatmul.msk.bf16.gmra.mxu3 %vm632_vm1, %v2019_v25  ;;  %2050 = vmatmul.msk.bf16.gmra.mxu0 %vm632_vm1, %v1604_v28  ;;  %v1217_v25 = vrot.slane %v1215_v15, 5  ;;  %v1573_v28 = vrot.slane %v1572_v20, 4 }
  0xa8   : > { %v1231_v27 = vrot.slane %v1229_v17, 5 }
  0xa9   : > { %v1218_v32 = vsel %vm2393_vm4, %v1213_v24, %v1217_v25  ;;  %v1578_v34 = vsel %vm2393_vm4, %v1573_v28, %v1577_v29 }
  0xaa   : > { %v1232_v33 = vsel %vm2393_vm4, %v1227_v26, %v1231_v27  ;;  %v1241_v36 = vunpack.c.l.b16 %v1218_v32  ;;  %v1601_v42 = vunpack.c.l.b16 %v1578_v34 }
  0xab   : > { %v1242_v37 = vunpack.c.l.b16 %v1232_v33 }
  0xac   : > { %v1606_v48 = vpack.c.b16 %v1602_v43, %v1601_v42 }
  0xad   : > { %v1246_v44 = vpack.c.b16 %v1242_v37, %v1241_v36 }
  0xb6   : > { %1972 = vmatmul.msk.bf16.gmra.mxu1 %vm632_vm1, %v1245_v9  ;;  %2001 = vmatmul.msk.bf16.gmra.mxu2 %vm632_vm1, %v1994_v10 }
  0xb7   : > { %2030 = vmatmul.msk.bf16.gmra.mxu3 %vm632_vm1, %v2023_v11  ;;  %2051 = vmatmul.msk.bf16.gmra.mxu0 %vm632_vm1, %v1605_v19 }
  0xc3   : > { %v663_v45 = vpop.f32.mrf.mxu1 }
  0xc4   : > { %v658_v49 = vpop.f32.mrf.mxu0 }
  0xc6   : > { %1973 = vmatmul.msk.bf16.gmra.mxu1 %vm632_vm1, %v1246_v44  ;;  %2002 = vmatmul.msk.bf16.gmra.mxu2 %vm632_vm1, %v1998_v46 }
  0xc7   : > { %2031 = vmatmul.msk.bf16.gmra.mxu3 %vm632_vm1, %v2027_v47  ;;  %2052 = vmatmul.msk.bf16.gmra.mxu0 %vm632_vm1, %v1606_v48 }
  0xc9   : > { %v668_v18 = vpop.f32.mrf.mxu2 }
  0xca   : > { %v673_v50 = vpop.f32.mrf.mxu3 }
  0xcb   : > { %v2562_v51 = vpop.f32.mrf.mxu1 }
  0xcc   : > { %v660_v52 = vpop.f32.mrf.mxu0 }
  0xd1   : > { %v2564_v53 = vpop.f32.mrf.mxu2 }
  0xd2   : > { %v2566_v54 = vpop.f32.mrf.mxu3 }
  0xd3   : > { %v722_v55 = vpop.f32.mrf.mxu1 }
  0xd4   : > { %v723_v56 = vadd.f32 %v722_v55, %v658_v49  ;;  %v1077_v57 = vpop.f32.mrf.mxu0 }
  0xd9   : > { %v911_v58 = vpop.f32.mrf.mxu2 }
  0xda   : > { %v994_v59 = vpop.f32.mrf.mxu3  ;;  %v931_v60 = vadd.f32 %v911_v58, %v723_v56 }
  0xdb   : > { %v724_v61 = vpop.f32.mrf.mxu1 }
  0xdc   : > { %v1014_v62 = vadd.f32 %v994_v59, %v931_v60  ;;  %v1079_v63 = vpop.f32.mrf.mxu0  ;;  %v725_v41 = vadd.f32 %v724_v61, %v660_v52 }
  0xde   : > { %v1097_v0 = vadd.f32 %v1077_v57, %v1014_v62  ;;  %v2593_v57 = vld [vmem:[%s2658_s2] ss:$0 sm:$0xff] }
  0xe1   : > { %v913_v1 = vpop.f32.mrf.mxu2 }
  0xe2   : > { %v996_v2 = vpop.f32.mrf.mxu3  ;;  %v932_v43 = vadd.f32 %v913_v1, %v725_v41 }
  0xe3   : > { %v727_v3 = vpop.f32.mrf.mxu1 }
  0xe4   : > { %v728_v4 = vadd.f32 %v727_v3, %v663_v45  ;;  %v1082_v5 = vpop.f32.mrf.mxu0  ;;  %v1015_v47 = vadd.f32 %v996_v2, %v932_v43 }
  0xe6   : > { %v1098_v55 = vadd.f32 %v1079_v63, %v1015_v47  ;;  %v2601_v63 = vld [vmem:[%s2659_s3] ss:$0 sm:$0xff] }
  0xe9   : > { %v916_v6 = vpop.f32.mrf.mxu2 }
  0xea   : > { %v999_v7 = vpop.f32.mrf.mxu3  ;;  %v933_v8 = vadd.f32 %v916_v6, %v728_v4 }
  0xeb   : > { %v729_v9 = vpop.f32.mrf.mxu1 }
  0xec   : > { %v1016_v10 = vadd.f32 %v999_v7, %v933_v8  ;;  %v2568_v11 = vpop.f32.mrf.mxu0  ;;  %v730_v62 = vadd.f32 %v729_v9, %v2562_v51 }
  0xee   : > { %v1099_v12 = vadd.f32 %v1082_v5, %v1016_v10 }
  0xf1   : > { %v918_v13 = vpop.f32.mrf.mxu2 }
  0xf2   : > { %v1001_v14 = vpop.f32.mrf.mxu3  ;;  %v934_v3 = vadd.f32 %v918_v13, %v730_v62 }
  0xf3   : > { %v732_v15 = vpop.f32.mrf.mxu1 }
  0xf4   : > { %v733_v16 = vadd.f32 %v732_v15, %v668_v18  ;;  %v1087_v17 = vpop.f32.mrf.mxu0  ;;  %v1017_v51 = vadd.f32 %v1001_v14, %v934_v3 }
  0xf9   : > { %v921_v19 = vpop.f32.mrf.mxu2 }
  0xfa   : > { %v1004_v20 = vpop.f32.mrf.mxu3  ;;  %v935_v21 = vadd.f32 %v921_v19, %v733_v16 }
  0xfb   : > { %v2570_v22 = vpop.f32.mrf.mxu1 }
  0xfc   : > { %v1018_v23 = vadd.f32 %v1004_v20, %v935_v21  ;;  %v2572_v24 = vpop.f32.mrf.mxu0 }
  0xfe   : > { %v2574_v25 = vadd.f32 %v1087_v17, %v1018_v23 }
 0x101   : > { %v2576_v26 = vpop.f32.mrf.mxu2 }
 0x102   : > { %v2578_v27 = vpop.f32.mrf.mxu3 }
 0x103   : > { %v737_v28 = vpop.f32.mrf.mxu1 }
 0x104   : > { %v738_v29 = vadd.f32 %v737_v28, %v673_v50  ;;  %v1092_v30 = vpop.f32.mrf.mxu0 }
 0x109   : > { %v926_v31 = vpop.f32.mrf.mxu2 }
 0x10a   : > { %v1009_v32 = vpop.f32.mrf.mxu3  ;;  %v937_v33 = vadd.f32 %v926_v31, %v738_v29 }
 0x10b   : > { %v2580_v34 = vpop.f32.mrf.mxu1 }
 0x10c   : > { %v1020_v35 = vadd.f32 %v1009_v32, %v937_v33  ;;  %v2582_v36 = vpop.f32.mrf.mxu0  ;;  %v735_v32 = vadd.f32 %v2570_v22, %v2564_v53 }
 0x10e   : > { %v2584_v37 = vadd.f32 %v1092_v30, %v1020_v35 }
 0x111   : > { %v2586_v38 = vpop.f32.mrf.mxu2 }
 0x112   : > { %v2588_v39 = vpop.f32.mrf.mxu3 }
 0x113   : > { %v1271_v40 = vpop.f32.mrf.mxu1 }
 0x114   : > { %v1631_v42 = vpop.f32.mrf.mxu0  ;;  %v1291_v44 = vadd.f32 %v1271_v40, %v1097_v0  ;;  %v936_v40 = vadd.f32 %v2576_v26, %v735_v32 }
 0x116   : > { %v1019_v47 = vadd.f32 %v2578_v27, %v936_v40  ;;  %v740_v27 = vadd.f32 %v2580_v34, %v2566_v54 }
 0x119   : > { %v1354_v45 = vpop.f32.mrf.mxu2 }
 0x11a   : > { %v1437_v46 = vpop.f32.mrf.mxu3  ;;  %v1374_v48 = vadd.f32 %v1354_v45, %v1291_v44 }
 0x11b   : > { %v1273_v49 = vpop.f32.mrf.mxu1 }
 0x11c   : > { %v1457_v18 = vadd.f32 %v1437_v46, %v1374_v48  ;;  %v1633_v50 = vpop.f32.mrf.mxu0  ;;  %v1292_v52 = vadd.f32 %v1273_v49, %v1098_v55  ;;  %v1102_v55 = vadd.f32 %v2572_v24, %v1019_v47 }
 0x11e   : > { %v1651_v56 = vadd.f32 %v1631_v42, %v1457_v18 }
 0x120   : > { %v1663_v0 = vmul.f32 %v2593_v57, %v1651_v56 }
 0x121   : > { %v1356_v58 = vpop.f32.mrf.mxu2 }
 0x122   : > { %v1439_v59 = vpop.f32.mrf.mxu3  ;;  %v1375_v60 = vadd.f32 %v1356_v58, %v1292_v52  ;;  %v1675_v5 = vadd.f32 %v2601_v63, %v1663_v0 }
 0x123   : > { %v1276_v61 = vpop.f32.mrf.mxu1 }
 0x124   : > { %v1458_v1 = vadd.f32 %v1439_v59, %v1375_v60  ;;  %v1636_v2 = vpop.f32.mrf.mxu0  ;;  %v1293_v7 = vadd.f32 %v1276_v61, %v1099_v12  ;;  %v1683_v17 = vmax.f32 %v1675_v5, 0.0  ;;  %v1100_v12 = vadd.f32 %v2568_v11, %v1017_v51 }
 0x126   : > { %v1652_v4 = vadd.f32 %v1633_v50, %v1458_v1  ;;  %v938_v1 = vadd.f32 %v2586_v38, %v740_v27 }
 0x128   : > { %v1664_v6 = vmul.f32 %v2593_v57, %v1652_v4 }
 0x129   : > { %v1359_v8 = vpop.f32.mrf.mxu2 }
 0x12a   : > { %v1442_v10 = vpop.f32.mrf.mxu3  ;;  %v1676_v9 = vadd.f32 %v2601_v63, %v1664_v6  ;;  %v1376_v15 = vadd.f32 %v1359_v8, %v1293_v7  ;;  %v1021_v7 = vadd.f32 %v2588_v39, %v938_v1 }
 0x12b   : > { %v1278_v16 = vpop.f32.mrf.mxu1 }
 0x12c   : > { %v1684_v19 = vmax.f32 %v1676_v9, 0.0  ;;  %v1459_v20 = vadd.f32 %v1442_v10, %v1376_v15  ;;  %v1638_v21 = vpop.f32.mrf.mxu0  ;;  %v1294_v23 = vadd.f32 %v1278_v16, %v1100_v12  ;;  %v1104_v16 = vadd.f32 %v2582_v36, %v1021_v7 }
 0x12e   : > { %v2083_v13 = vpack.c.bf16 %v1684_v19, %v1683_v17  ;;  %v1653_v14 = vadd.f32 %v1636_v2, %v1459_v20 }
 0x130   : > { %2084 = vst [vmem:[%s2610_s13] sm:$0xff] %v2083_v13   ;;  %v1665_v33 = vmul.f32 %v2593_v57, %v1653_v14 }
 0x131   : > { %v1361_v28 = vpop.f32.mrf.mxu2 }
 0x132   : > { %v1444_v29 = vpop.f32.mrf.mxu3  ;;  %v1377_v30 = vadd.f32 %v1361_v28, %v1294_v23  ;;  %v1677_v11 = vadd.f32 %v2601_v63, %v1665_v33 }
 0x133   : > { %v1281_v31 = vpop.f32.mrf.mxu1 }
 0x134   : > { %v1460_v35 = vadd.f32 %v1444_v29, %v1377_v30  ;;  %v1641_v42 = vpop.f32.mrf.mxu0  ;;  %v1295_v44 = vadd.f32 %v1281_v31, %v2574_v25  ;;  %v1685_v49 = vmax.f32 %v1677_v11, 0.0 }
 0x136   : > { %v1654_v41 = vadd.f32 %v1638_v21, %v1460_v35 }
 0x138   : > { %v1666_v43 = vmul.f32 %v2593_v57, %v1654_v41 }
 0x139   : > { %v1364_v45 = vpop.f32.mrf.mxu2 }
 0x13a   : > { %v1447_v46 = vpop.f32.mrf.mxu3  ;;  %v1678_v53 = vadd.f32 %v2601_v63, %v1666_v43  ;;  %v1378_v22 = vadd.f32 %v1364_v45, %v1295_v44 }
 0x13b   : > { %v1283_v48 = vpop.f32.mrf.mxu1 }
 0x13c   : > { %v1686_v18 = vmax.f32 %v1678_v53, 0.0  ;;  %v1461_v26 = vadd.f32 %v1447_v46, %v1378_v22  ;;  %v1296_v52 = vadd.f32 %v1283_v48, %v1102_v55  ;;  %v1643_v58 = vpop.f32.mrf.mxu0 }
 0x13e   : > { %v2088_v50 = vpack.c.bf16 %v1686_v18, %v1685_v49  ;;  %v1655_v56 = vadd.f32 %v1641_v42, %v1461_v26 }
 0x140   : > { %2100 = vst [vmem:[%s2610_s13 + $0x8] sm:$0xff] %v2088_v50   ;;  %v1667_v62 = vmul.f32 %v2593_v57, %v1655_v56 }
 0x141   : > { %v1366_v59 = vpop.f32.mrf.mxu2 }
 0x142   : > { %v1449_v25 = vpop.f32.mrf.mxu3  ;;  %v1379_v60 = vadd.f32 %v1366_v59, %v1296_v52  ;;  %v1679_v24 = vadd.f32 %v2601_v63, %v1667_v62 }
 0x143   : > { %v1286_v61 = vpop.f32.mrf.mxu1 }
 0x144   : > { %v1462_v0 = vadd.f32 %v1449_v25, %v1379_v60  ;;  %v1297_v4 = vadd.f32 %v1286_v61, %v2584_v37  ;;  %v1646_v34 = vpop.f32.mrf.mxu0  ;;  %v1687_v10 = vmax.f32 %v1679_v24, 0.0 }
 0x146   : > { %v1656_v2 = vadd.f32 %v1643_v58, %v1462_v0 }
 0x148   : > { %v1668_v3 = vmul.f32 %v2593_v57, %v1656_v2 }
 0x149   : > { %v1369_v5 = vpop.f32.mrf.mxu2 }
 0x14a   : > { %v1452_v6 = vpop.f32.mrf.mxu3  ;;  %v1680_v8 = vadd.f32 %v2601_v63, %v1668_v3  ;;  %v1380_v54 = vadd.f32 %v1369_v5, %v1297_v4 }
 0x14b   : > { %v1288_v38 = vpop.f32.mrf.mxu1 }
 0x14c   : > { %v1688_v51 = vmax.f32 %v1680_v8, 0.0  ;;  %v1463_v9 = vadd.f32 %v1452_v6, %v1380_v54  ;;  %v1298_v19 = vadd.f32 %v1288_v38, %v1104_v16  ;;  %v1648_v12 = vpop.f32.mrf.mxu0 }
 0x14e   : > { %v2093_v15 = vpack.c.bf16 %v1688_v51, %v1687_v10  ;;  %v1657_v17 = vadd.f32 %v1646_v34, %v1463_v9 }
 0x150   : > { %2101 = vst [vmem:[%s2610_s13 + $0x10] sm:$0xff] %v2093_v15   ;;  %v1669_v39 = vmul.f32 %v2593_v57, %v1657_v17 }
 0x151   : > { %v1371_v37 = vpop.f32.mrf.mxu2 }
 0x152   : > { %v1381_v20 = vadd.f32 %v1371_v37, %v1298_v19  ;;  %v1454_v21 = vpop.f32.mrf.mxu3  ;;  %v1681_v23 = vadd.f32 %v2601_v63, %v1669_v39 }
 0x154   : > { %v1464_v13 = vadd.f32 %v1454_v21, %v1381_v20  ;;  %v1689_v30 = vmax.f32 %v1681_v23, 0.0 }
 0x156   : > { %v1658_v14 = vadd.f32 %v1648_v12, %v1464_v13 }
 0x158   : > { %v1670_v28 = vmul.f32 %v2593_v57, %v1658_v14 }
 0x15a   : > { %v1682_v29 = vadd.f32 %v2601_v63, %v1670_v28 }
 0x15c   : > { %v1690_v36 = vmax.f32 %v1682_v29, 0.0 }
 0x15e   : > { %v2098_v31 = vpack.c.bf16 %v1690_v36, %v1689_v30 }
 0x160   : > { %2102 = vst [vmem:[%s2610_s13 + $0x18] sm:$0xff] %v2098_v31  }
 0x161 PF: > { %s14_s19 = sadd.s32 1, %s2189_s19   ;;  %s2663_s15 = smov %s2177_s16 }
 0x162   : > { %p11_p10 = scmp.ge.s32.totalorder %s14_s19, 4   ;;  %s2664_s16 = smov %s2251_s23 }
 0x163   : > { %s2665_s17 = smov %s2185_s18  ;;  %s2666_s18 = smov %s2668_s20 }
 0x164   :  { %13 = sbr.rel (!%p11_p10) target bundleno = 3 (0x3), region = 134 }

// kernel: resblock_forward.3
= control target key start
LH: loop header
LB: loop body
LE: loop exit
PB: predicated region body
PF: predicated region fallthrough
CT: control target
= control target key end

     0   :  { %s3323_s27 = smov 0   ;;  %s3325_s28 = smov 0   ;;  %s3998_s0 = inlined_call_operand.vmem [shape: bf16[2,8,8,128], index: 0, kind: input, shape index: {}]   ;;  %s3999_s1 = inlined_call_operand.vmem [shape: bf16[3,3,128,128], index: 1, kind: input, shape index: {}]   ;;  %s4000_s2 = inlined_call_operand.vmem [shape: f32[1,128], index: 2, kind: input, shape index: {}]   ;;  %s4001_s3 = inlined_call_operand.vmem [shape: f32[1,128], index: 3, kind: input, shape index: {}]   ;;  %s4002_s4 = inlined_call_operand.vmem [shape: bf16[2,8,8,4], index: 4, kind: input, shape index: {}]   ;;  %s4003_s5 = inlined_call_operand.vmem [shape: bf16[4,128], index: 5, kind: input, shape index: {}]   ;;  %s4004_s6 = inlined_call_operand.vmem [shape: f32[1,128], index: 6, kind: input, shape index: {}]   ;;  %s4005_s7 = inlined_call_operand.vmem [shape: f32[1,128], index: 7, kind: input, shape index: {}]   ;;  %s4006_s8 = inlined_call_operand.vmem [shape: bf16[2,8,8,128], index: 8, kind: output, shape index: {}]  }
   0x1   :  { %s3327_s29 = smov 0  }
   0x2 LB: > { %s27_s30 = sadd.s32 1, %s3271_s28  ;;  %p2577_p0 = scmp.ge.s32.totalorder %s3275_s29, 1  ;;  %s3275_s29 = sphi %s3327_s29, %s18_s29   ;;  %s3271_s28 = sphi %s3325_s28, %s4016_s28   ;;  %s3267_s27 = sphi %s3323_s27, %s4015_s27  }
   0x3   : > { %p28_p1 = scmp.ge.s32.totalorder %s27_s30, 2  ;;  %p336_p2 = scmp.lt.s32.totalorder %s3275_s29, 3 }
   0x5   : > { %s4018_s30 = smov (%p28_p1, %s27_s30), 0  ;;  %p337_p3 = pnand %p2577_p0, %p336_p2 }
   0x6   : > { %p398_p4 = scmp.lt.s32.totalorder (!%p337_p3), %s3267_s27, 1 }
   0x7   : > { %340 = sbr.rel (%p337_p3) target bundleno = 354 (0x162), region = 52 }
   0xc   : > { %v3108_v0 = vld [vmem:[%s3999_s1 + $0x38] sm:$0xff]  ;;  %v3277_v2 = vmov 0   ;;  %v3107_v3 = vld [vmem:[%s3999_s1 + $0x30] sm:$0xff]  ;;  %s4020_s27 = smov (!%p398_p4, %s3267_s27), 1  ;;  %vm546_vm0 = vcmask 1043456   ;;  %v3106_v5 = vld [vmem:[%s3999_s1 + $0x28] sm:$0xff] }
   0xd   : > { %v3116_v1 = vld [vmem:[%s3999_s1 + $0x78] sm:$0xff]  ;;  %445 = vst [vmem:[#allocation2 + $0x20] sm:$0xf] %v3277_v2  ;;  %3216 = vmatpush.bf16.msra.mxu3 %v3108_v0  ;;  %v3115_v4 = vld [vmem:[%s3999_s1 + $0x70] sm:$0xff]  ;;  %929 = vmatpush.bf16.msra.mxu1 %v3108_v0  ;;  %s3355_s17 = sshll.u32 %s4020_s27, 5  ;;  %v3114_v6 = vld [vmem:[%s3999_s1 + $0x68] sm:$0xff] }
   0xe   : > { %3208 = vmatpush.bf16.msra.mxu2 %v3116_v1  ;;  %447 = vst [vmem:[#allocation2 + $0x28] sm:$0xf] %v3277_v2  ;;  %828 = vmatpush.bf16.msra.mxu0 %v3116_v1  ;;  %s3368_s24 = scalar_lea.vmem %s3998_s0, %s3355_s17  ;;  %vm547_vm1 = vsmask.f32 7938  ;;  %v3105_v13 = vld [vmem:[%s3999_s1 + $0x20] sm:$0xff]  ;;  %v3104_v27 = vld [vmem:[%s3999_s1 + $0x18] sm:$0xff]  ;;  %s3818_s22 = scalar_lea.vmem %s4002_s4, %s3355_s17 }
   0xf   : > { %437 = vst [vmem:[#allocation2] sm:$0xf] %v3277_v2  ;;  %v460_v7 = vld [vmem:[%s3368_s24 + $0xc] sm:$0xf]  ;;  %v461_v8 = vld [vmem:[%s3368_s24 + $0x10] sm:$0xf]  ;;  %vm3389_vm2 = vmand %vm546_vm0, %vm547_vm1  ;;  %s3946_s15 = scalar_lea.vmem %s4006_s8, %s3355_s17 }
  0x10   : > { %438 = vst [vmem:[#allocation2 + $0x4] sm:$0x1] %v3277_v2  ;;  %v490_v9 = vshrl.u32 %v460_v7, 16  ;;  %v493_v10 = vshll.u32 %v460_v7, 16  ;;  %v498_v11 = vshrl.u32 %v461_v8, 16  ;;  %v501_v12 = vshll.u32 %v461_v8, 16 }
  0x11   : > { %3217 = vmatpush.bf16.msra.mxu3 %v3107_v3  ;;  %439 = vst [vmem:[#allocation2 + $0x8] sm:$0xf] %v3277_v2  ;;  %930 = vmatpush.bf16.msra.mxu1 %v3107_v3  ;;  %v3113_v14 = vld [vmem:[%s3999_s1 + $0x60] sm:$0xff]  ;;  %v3112_v28 = vld [vmem:[%s3999_s1 + $0x58] sm:$0xff]  ;;  %vm552_vm3 = vcmask 1040384   ;;  %v3103_v33 = vld [vmem:[%s3999_s1 + $0x10] sm:$0xff] }
  0x12   : > { %3209 = vmatpush.bf16.msra.mxu2 %v3115_v4  ;;  %829 = vmatpush.bf16.msra.mxu0 %v3115_v4  ;;  %440 = vst [vmem:[#allocation2 + $0xc] sm:$0x1] %v3277_v2  ;;  %v3382_v15 = vrot.slane %v490_v9, 7  ;;  %v3384_v16 = vrot.slane %v498_v11, 7  ;;  %v457_v22 = vld [vmem:[%s3368_s24] sm:$0xf] }
  0x13   : > { %441 = vst [vmem:[#allocation2 + $0x10] sm:$0xf] %v3277_v2  ;;  %v466_v23 = vshrl.u32 %v457_v22, 16  ;;  %vm553_vm4 = vsmask.f32 256  ;;  %v469_v30 = vshll.u32 %v457_v22, 16 }
  0x14   : > { %442 = vst [vmem:[#allocation2 + $0x14] sm:$0x1] %v3277_v2  ;;  %v570_v18 = vld [vmem:[#allocation2 + $0x20] sm:$0xf]  ;;  %v495_v20 = vor.u32 %v493_v10, %v3382_v15  ;;  %v503_v21 = vor.u32 %v501_v12, %v3384_v16  ;;  %v496_v34 = vrot.slane %v3382_v15, 4  ;;  %v3111_v35 = vld [vmem:[%s3999_s1 + $0x50] sm:$0xff]  ;;  %vm3422_vm5 = vmand %vm552_vm3, %vm553_vm4 }
  0x15   : > { %3218 = vmatpush.bf16.msra.mxu3 %v3106_v5  ;;  %v576_v19 = vld [vmem:[#allocation2 + $0x28] sm:$0xf]  ;;  %443 = vst [vmem:[#allocation2 + $0x18] sm:$0xf] %v3277_v2  ;;  %931 = vmatpush.bf16.msra.mxu1 %v3106_v5  ;;  %v468_v29 = vrot.slane %v466_v23, 7  ;;  %v504_v36 = vrot.slane %v3384_v16, 4 }
  0x16   : > { %3210 = vmatpush.bf16.msra.mxu2 %v3114_v6  ;;  %830 = vmatpush.bf16.msra.mxu0 %v3114_v6  ;;  %444 = vst [vmem:[#allocation2 + $0x1c] sm:$0x1] %v3277_v2  ;;  %v571_v24 = vsel %vm3389_vm2, %v495_v20, %v570_v18  ;;  %v577_v25 = vsel %vm3389_vm2, %v503_v21, %v576_v19  ;;  %v600_v26 = vld [vmem:[#allocation2] sm:$0xf]  ;;  %v3102_v43 = vld [vmem:[%s3999_s1 + $0x8] sm:$0xff]  ;;  %v3124_v10 = vld [vmem:[%s3999_s1 + $0xb8] sm:$0xff] }
  0x17   : > { %446 = vst [vmem:[#allocation2 + $0x24] sm:$0x1] %v3277_v2  ;;  %v636_v31 = vshrl.u32 %v600_v26, 16  ;;  %v639_v32 = vshll.u32 %v600_v26, 16  ;;  %v471_v40 = vor.u32 %v469_v30, %v468_v29  ;;  %v472_v41 = vrot.slane %v468_v29, 4  ;;  %v3110_v44 = vld [vmem:[%s3999_s1 + $0x48] sm:$0xff] }
  0x18   : > { %448 = vst [vmem:[#allocation2 + $0x2c] sm:$0x1] %v3277_v2  ;;  %v549_v38 = vld [vmem:[#allocation2 + $0x8] sm:$0xf]  ;;  %v3427_v42 = vld [vmem:[#allocation2 + $0x4] sm:$0x1] }
  0x19   : > { %3219 = vmatpush.bf16.msra.mxu3 %v3105_v13  ;;  %572 = vst [vmem:[#allocation2 + $0x20] sm:$0xf] %v571_v24  ;;  %932 = vmatpush.bf16.msra.mxu1 %v3105_v13  ;;  %vm632_vm6 = vsmask.f32 3328  ;;  %v638_v46 = vrot.slane %v636_v31, 4  ;;  %v641_v47 = vrot.slane %v639_v32, 5  ;;  %v550_v56 = vsel %vm3389_vm2, %v471_v40, %v549_v38 }
  0x1a   : > { %3211 = vmatpush.bf16.msra.mxu2 %v3113_v14  ;;  %831 = vmatpush.bf16.msra.mxu0 %v3113_v14  ;;  %578 = vst [vmem:[#allocation2 + $0x28] sm:$0xf] %v577_v25  ;;  %v555_v50 = vld [vmem:[#allocation2 + $0xc] sm:$0x1]  ;;  %vm633_vm7 = vsmask.f32 7440 }
  0x1b   : > { %449 = vst [vmem:[#allocation2 + $0x30] sm:$0xf] %v3277_v2  ;;  %v3101_v57 = vld [vmem:[%s3999_s1] sm:$0xff]  ;;  %v556_v62 = vsel %vm3422_vm5, %v472_v41, %v555_v50  ;;  %v642_v63 = vor.u32 %v641_v47, %v638_v46  ;;  %v645_v0 = vshll.u32 %v3427_v42, 16  ;;  %v462_v1 = vld [vmem:[%s3368_s24 + $0x14] sm:$0xf]  ;;  %vm3486_vm8 = vmor %vm632_vm6, %vm633_vm7 }
  0x1c   : > { %450 = vst [vmem:[#allocation2 + $0x34] sm:$0x1] %v3277_v2  ;;  %v3109_v58 = vld [vmem:[%s3999_s1 + $0x40] sm:$0xff]  ;;  %v506_v5 = vshrl.u32 %v462_v1, 16  ;;  %v463_v7 = vld [vmem:[%s3368_s24 + $0x18] sm:$0xf] }
  0x1d   : > { %3220 = vmatpush.bf16.msra.mxu3 %v3104_v27  ;;  %451 = vst [vmem:[#allocation2 + $0x38] sm:$0xf] %v3277_v2  ;;  %933 = vmatpush.bf16.msra.mxu1 %v3104_v27  ;;  %v509_v8 = vshll.u32 %v462_v1, 16  ;;  %v3136_v11 = vld [vmem:[%s3999_s1 + $0xf8] sm:$0xff]  ;;  %v514_v13 = vshrl.u32 %v463_v7, 16  ;;  %v3466_v15 = vrot.slane %v642_v63, 4 }
  0x1e   : > { %3212 = vmatpush.bf16.msra.mxu2 %v3112_v28  ;;  %832 = vmatpush.bf16.msra.mxu0 %v3112_v28  ;;  %452 = vst [vmem:[#allocation2 + $0x3c] sm:$0x1] %v3277_v2  ;;  %v573_v39 = vld [vmem:[#allocation2 + $0x24] sm:$0x1]  ;;  %v508_v12 = vrot.slane %v506_v5, 7  ;;  %v3468_v16 = vrot.slane %v645_v0, 5 }
  0x1f   : > { %453 = vst [vmem:[#allocation2 + $0x40] sm:$0xf] %v3277_v2  ;;  %v579_v45 = vld [vmem:[#allocation2 + $0x2c] sm:$0x1]  ;;  %v574_v48 = vsel %vm3422_vm5, %v496_v34, %v573_v39  ;;  %v3144_v18 = vld [vmem:[%s3999_s1 + $0x138] sm:$0xff]  ;;  %v517_v19 = vshll.u32 %v463_v7, 16 }
  0x20   : > { %454 = vst [vmem:[#allocation2 + $0x44] sm:$0x1] %v3277_v2  ;;  %v604_v49 = vld [vmem:[#allocation2 + $0x20] sm:$0xf]  ;;  %v580_v51 = vsel %vm3422_vm5, %v504_v36, %v579_v45  ;;  %v511_v23 = vor.u32 %v509_v8, %v508_v12  ;;  %v512_v24 = vrot.slane %v508_v12, 4  ;;  %v516_v25 = vrot.slane %v514_v13, 7 }
  0x21   : > { %3221 = vmatpush.bf16.msra.mxu3 %v3103_v33  ;;  %455 = vst [vmem:[#allocation2 + $0x48] sm:$0xf] %v3277_v2  ;;  %v605_v52 = vld [vmem:[#allocation2 + $0x28] sm:$0xf]  ;;  %934 = vmatpush.bf16.msra.mxu1 %v3103_v33  ;;  %v692_v53 = vshrl.u32 %v604_v49, 16  ;;  %v695_v54 = vshll.u32 %v604_v49, 16  ;;  %v648_v46 = vsel %vm3486_vm8, %v3466_v15, %v3468_v16 }
  0x22   : > { %3213 = vmatpush.bf16.msra.mxu2 %v3111_v35  ;;  %833 = vmatpush.bf16.msra.mxu0 %v3111_v35  ;;  %456 = vst [vmem:[#allocation2 + $0x4c] sm:$0x1] %v3277_v2  ;;  %v706_v55 = vshrl.u32 %v605_v52, 16  ;;  %v3451_v59 = vld [vmem:[#allocation2 + $0x20] sm:$0xf]  ;;  %v709_v61 = vshll.u32 %v605_v52, 16  ;;  %v519_v39 = vor.u32 %v517_v19, %v516_v25 }
  0x23   : > { %v3453_v60 = vld [vmem:[#allocation2 + $0x24] sm:$0xf0]  ;;  %575 = vst [vmem:[#allocation2 + $0x24] sm:$0x1] %v574_v48  ;;  %v694_v2 = vrot.slane %v692_v53, 4  ;;  %v697_v3 = vrot.slane %v695_v54, 5 }
  0x24   : > { %581 = vst [vmem:[#allocation2 + $0x2c] sm:$0x1] %v580_v51  ;;  %v708_v4 = vrot.slane %v706_v55, 4  ;;  %v711_v6 = vrot.slane %v709_v61, 5  ;;  %v582_v20 = vld [vmem:[#allocation2 + $0x30] sm:$0xf]  ;;  %v2643_v21 = vor.u32 %v3453_v60, %v3451_v59 }
  0x25   : > { %3222 = vmatpush.bf16.msra.mxu3 %v3102_v43  ;;  %551 = vst [vmem:[#allocation2 + $0x8] sm:$0xf] %v550_v56  ;;  %935 = vmatpush.bf16.msra.mxu1 %v3102_v43  ;;  %v698_v9 = vor.u32 %v697_v3, %v694_v2  ;;  %v2634_v22 = vld [vmem:[#allocation2] sm:$0xf]  ;;  %v588_v26 = vld [vmem:[#allocation2 + $0x38] sm:$0xf]  ;;  %v583_v41 = vsel %vm3389_vm2, %v511_v23, %v582_v20 }
  0x26   : > { %3214 = vmatpush.bf16.msra.mxu2 %v3110_v44  ;;  %834 = vmatpush.bf16.msra.mxu0 %v3110_v44  ;;  %557 = vst [vmem:[#allocation2 + $0xc] sm:$0x1] %v556_v62  ;;  %v712_v14 = vor.u32 %v711_v6, %v708_v4  ;;  %v585_v27 = vld [vmem:[#allocation2 + $0x34] sm:$0x1]  ;;  %v3152_v30 = vld [vmem:[%s3999_s1 + $0x178] sm:$0xff]  ;;  %v520_v40 = vrot.slane %v516_v25, 4  ;;  %v589_v52 = vsel %vm3389_vm2, %v519_v39, %v588_v26 }
  0x27   : > { %v699_v28 = vrot.slane %v698_v9, 4  ;;  %v3123_v29 = vld [vmem:[%s3999_s1 + $0xb0] sm:$0xff]  ;;  %v591_v31 = vld [vmem:[#allocation2 + $0x3c] sm:$0x1]  ;;  %v458_v32 = vld [vmem:[%s3368_s24 + $0x4] sm:$0xf]  ;;  %v586_v47 = vsel %vm3422_vm5, %v512_v24, %v585_v27 }
  0x28   : > { %v713_v35 = vrot.slane %v712_v14, 4  ;;  %v3135_v36 = vld [vmem:[%s3999_s1 + $0xf0] sm:$0xff]  ;;  %v3499_v43 = vld [vmem:[%s3368_s24 + $0x8] sm:$0xf]  ;;  %584 = vst [vmem:[#allocation2 + $0x30] sm:$0xf] %v583_v41  ;;  %v592_v53 = vsel %vm3422_vm5, %v520_v40, %v591_v31 }
  0x29   : > { %3223 = vmatpush.bf16.msra.mxu3 %v3101_v57  ;;  %936 = vmatpush.bf16.msra.mxu1 %v3101_v57  ;;  %v3143_v38 = vld [vmem:[%s3999_s1 + $0x130] sm:$0xff]  ;;  %v474_v48 = vshrl.u32 %v458_v32, 16  ;;  %v477_v54 = vshll.u32 %v458_v32, 16  ;;  %v3122_v60 = vld [vmem:[%s3999_s1 + $0xa8] sm:$0xff]  ;;  %590 = vst [vmem:[#allocation2 + $0x38] sm:$0xf] %v589_v52 }
  0x2a   : > { %3215 = vmatpush.bf16.msra.mxu2 %v3109_v58  ;;  %835 = vmatpush.bf16.msra.mxu0 %v3109_v58  ;;  %v3482_v33 = vld [vmem:[#allocation2 + $0x24] sm:$0x1]  ;;  %v3151_v61 = vld [vmem:[%s3999_s1 + $0x170] sm:$0xff]  ;;  %v482_v1 = vshrl.u32 %v3499_v43, 16  ;;  %v3134_v5 = vld [vmem:[%s3999_s1 + $0xe8] sm:$0xff]  ;;  %v485_v6 = vshll.u32 %v3499_v43, 16 }
  0x2b   : > { %v3501_v44 = vld [vmem:[#allocation2 + $0x2c] sm:$0x1]  ;;  %v701_v45 = vshll.u32 %v3482_v33, 16  ;;  %v476_v0 = vrot.slane %v474_v48, 7  ;;  %587 = vst [vmem:[#allocation2 + $0x34] sm:$0x1] %v586_v47 }
  0x2c   : > { %947 = vmatmul.bf16.vlgmr.msra.gmra.mxu3 %v2643_v21  ;;  %v715_v49 = vshll.u32 %v3501_v44, 16  ;;  %v601_v50 = vld [vmem:[#allocation2 + $0x8] sm:$0xf]  ;;  %593 = vst [vmem:[#allocation2 + $0x3c] sm:$0x1] %v592_v53  ;;  %v3121_v15 = vld [vmem:[%s3999_s1 + $0xa0] sm:$0xff] }
  0x2d   : > { %1232 = vmatpush.bf16.msrb.mxu3 %v3136_v11  ;;  %v3097_v51 = vld [vmem:[#allocation2 + $0x4] sm:$0xf0]  ;;  %v703_v55 = vrot.slane %v701_v45, 5  ;;  %v3515_v56 = vld [vmem:[#allocation2 + $0xc] sm:$0x1]  ;;  %v650_v57 = vshrl.u32 %v601_v50, 16  ;;  %1652 = vmatpush.bf16.msrb.mxu1 %v3152_v30  ;;  %v479_v11 = vor.u32 %v477_v54, %v476_v0  ;;  %v764_v30 = vunpack.c.l.b16 %v648_v46 }
  0x2e   : > { %1098 = vmatpush.bf16.msrb.mxu2 %v3124_v10  ;;  %1478 = vmatpush.bf16.msrb.mxu0 %v3144_v18  ;;  %v653_v58 = vshll.u32 %v601_v50, 16  ;;  %v2635_v59 = vor.u32 %v3097_v51, %v2634_v22  ;;  %v717_v62 = vrot.slane %v715_v49, 5  ;;  %v659_v63 = vshll.u32 %v3515_v56, 16  ;;  %v3142_v10 = vld [vmem:[%s3999_s1 + $0x128] sm:$0xff]  ;;  %v558_v12 = vld [vmem:[#allocation2 + $0x10] sm:$0xf] }
  0x2f   : > { %v704_v2 = vsel %vm3486_vm8, %v699_v28, %v703_v55  ;;  %v652_v3 = vrot.slane %v650_v57, 4  ;;  %v3150_v16 = vld [vmem:[%s3999_s1 + $0x168] sm:$0xff]  ;;  %v480_v18 = vrot.slane %v476_v0, 4  ;;  %v484_v19 = vrot.slane %v482_v1, 7  ;;  %v561_v20 = vld [vmem:[#allocation2 + $0x14] sm:$0x1] }
  0x30   : > { %v655_v4 = vrot.slane %v653_v58, 5  ;;  %937 = vmatmul.bf16.vlgmr.msra.gmra.mxu1 %v2635_v59  ;;  %v718_v7 = vsel %vm3486_vm8, %v713_v35, %v717_v62  ;;  %v768_v8 = vunpack.c.l.b16 %v704_v2  ;;  %v661_v9 = vrot.slane %v659_v63, 5  ;;  %v3133_v21 = vld [vmem:[%s3999_s1 + $0xe0] sm:$0xff]  ;;  %v2646_v22 = vld [vmem:[#allocation2 + $0x30] sm:$0xf]  ;;  %v3120_v55 = vld [vmem:[%s3999_s1 + $0x98] sm:$0xff] }
  0x31   : > { %1233 = vmatpush.bf16.msrb.mxu3 %v3135_v36  ;;  %v769_v13 = vunpack.c.l.b16 %v718_v7  ;;  %1653 = vmatpush.bf16.msrb.mxu1 %v3151_v61  ;;  %v606_v23 = vld [vmem:[#allocation2 + $0x30] sm:$0xf]  ;;  %v559_v24 = vsel %vm3389_vm2, %v479_v11, %v558_v12  ;;  %v3141_v27 = vld [vmem:[%s3999_s1 + $0x120] sm:$0xff]  ;;  %v487_v32 = vor.u32 %v485_v6, %v484_v19  ;;  %v488_v35 = vrot.slane %v484_v19, 4  ;;  %v567_v39 = vld [vmem:[#allocation2 + $0x1c] sm:$0x1] }
  0x32   : > { %1099 = vmatpush.bf16.msrb.mxu2 %v3123_v29  ;;  %1479 = vmatpush.bf16.msrb.mxu0 %v3143_v38  ;;  %v656_v14 = vor.u32 %v655_v4, %v652_v3  ;;  %v720_v28 = vshrl.u32 %v606_v23, 16  ;;  %v723_v29 = vshll.u32 %v606_v23, 16  ;;  %560 = vst [vmem:[#allocation2 + $0x10] sm:$0xf] %v559_v24  ;;  %v3149_v31 = vld [vmem:[%s3999_s1 + $0x160] sm:$0xff]  ;;  %v562_v36 = vsel %vm3422_vm5, %v480_v18, %v561_v20  ;;  %v3140_v63 = vld [vmem:[%s3999_s1 + $0x118] sm:$0xff] }
  0x33   : > { %v774_v25 = vpack.c.b16 %v769_v13, %v768_v8  ;;  %v564_v38 = vld [vmem:[#allocation2 + $0x18] sm:$0xf]  ;;  %v3557_v49 = vld [vmem:[#allocation2 + $0x34] sm:$0x1]  ;;  %563 = vst [vmem:[#allocation2 + $0x14] sm:$0x1] %v562_v36  ;;  %v568_v58 = vsel %vm3422_vm5, %v488_v35, %v567_v39 }
  0x34   : > { %v657_v26 = vrot.slane %v656_v14, 4  ;;  %v3100_v41 = vld [vmem:[#allocation2 + $0x34] sm:$0xf0]  ;;  %v722_v45 = vrot.slane %v720_v28, 4  ;;  %v725_v46 = vrot.slane %v723_v29, 5  ;;  %v729_v54 = vshll.u32 %v3557_v49, 16 }
  0x35   : > { %1234 = vmatpush.bf16.msrb.mxu3 %v3134_v5  ;;  %846 = vmatmul.bf16.vlgmr.msra.gmra.mxu2 %v774_v25  ;;  %v607_v43 = vld [vmem:[#allocation2 + $0x38] sm:$0xf]  ;;  %v2647_v48 = vor.u32 %v3100_v41, %v2646_v22  ;;  %v3559_v52 = vld [vmem:[#allocation2 + $0x3c] sm:$0x1]  ;;  %v565_v57 = vsel %vm3389_vm2, %v487_v32, %v564_v38  ;;  %569 = vst [vmem:[#allocation2 + $0x1c] sm:$0x1] %v568_v58 }
  0x36   : > { %1100 = vmatpush.bf16.msrb.mxu2 %v3122_v60  ;;  %1480 = vmatpush.bf16.msrb.mxu0 %v3142_v10  ;;  %v662_v40 = vsel %vm3486_vm8, %v657_v26, %v661_v9  ;;  %v734_v50 = vshrl.u32 %v607_v43, 16  ;;  %v737_v51 = vshll.u32 %v607_v43, 16  ;;  %v726_v53 = vor.u32 %v725_v46, %v722_v45  ;;  %566 = vst [vmem:[#allocation2 + $0x18] sm:$0xf] %v565_v57  ;;  %v3132_v2 = vld [vmem:[%s3999_s1 + $0xd8] sm:$0xff]  ;;  %v3119_v10 = vld [vmem:[%s3999_s1 + $0x90] sm:$0xff] }
  0x37   : > { %1654 = vmatpush.bf16.msrb.mxu1 %v3150_v16  ;;  %v765_v47 = vunpack.c.l.b16 %v662_v40  ;;  %v743_v62 = vshll.u32 %v3559_v52, 16  ;;  %v731_v1 = vrot.slane %v729_v54, 5  ;;  %v3148_v3 = vld [vmem:[%s3999_s1 + $0x158] sm:$0xff]  ;;  %v3131_v12 = vld [vmem:[%s3999_s1 + $0xd0] sm:$0xff]  ;;  %vm982_vm9 = vcmask 1042432   ;;  %v3138_v41 = vld [vmem:[%s3999_s1 + $0x108] sm:$0xff] }
  0x38   : > { %v736_v60 = vrot.slane %v734_v50, 4  ;;  %v739_v61 = vrot.slane %v737_v51, 5  ;;  %v727_v0 = vrot.slane %v726_v53, 4  ;;  %v3139_v13 = vld [vmem:[%s3999_s1 + $0x110] sm:$0xff]  ;;  %v958_v24 = vld [vmem:[#allocation2] sm:$0xe] }
  0x39   : > { %v772_v59 = vpack.c.b16 %v765_v47, %v764_v30  ;;  %1235 = vmatpush.bf16.msrb.mxu3 %v3133_v21  ;;  %v745_v5 = vrot.slane %v743_v62, 5  ;;  %v602_v6 = vld [vmem:[#allocation2 + $0x10] sm:$0xf]  ;;  %v3118_v21 = vld [vmem:[%s3999_s1 + $0x88] sm:$0xff]  ;;  %vm983_vm10 = vcmask 1046532   ;;  %v3117_v47 = vld [vmem:[%s3999_s1 + $0x80] sm:$0xff] }
  0x3a   : > { %1101 = vmatpush.bf16.msrb.mxu2 %v3121_v15  ;;  %1481 = vmatpush.bf16.msrb.mxu0 %v3141_v27  ;;  %v740_v4 = vor.u32 %v739_v61, %v736_v60  ;;  %v732_v7 = vsel %vm3486_vm8, %v727_v0, %v731_v1  ;;  %v664_v8 = vshrl.u32 %v602_v6, 16  ;;  %v667_v9 = vshll.u32 %v602_v6, 16  ;;  %v3147_v14 = vld [vmem:[%s3999_s1 + $0x150] sm:$0xff]  ;;  %v3601_v25 = vld [vmem:[#allocation2 + $0x8] sm:$0xe]  ;;  %v3137_v60 = vld [vmem:[%s3999_s1 + $0x100] sm:$0xff] }
  0x3b   : > { %1655 = vmatpush.bf16.msrb.mxu1 %v3149_v31  ;;  %836 = vmatmul.bf16.vlgmr.msra.gmra.mxu0 %v772_v59  ;;  %v770_v15 = vunpack.c.l.b16 %v732_v7  ;;  %v3593_v16 = vld [vmem:[#allocation2 + $0x14] sm:$0x1]  ;;  %v2638_v20 = vld [vmem:[#allocation2 + $0x10] sm:$0xf]  ;;  %v3130_v30 = vld [vmem:[%s3999_s1 + $0xc8] sm:$0xff]  ;;  %v2680_v51 = vrot.slane %v958_v24, 9 }
  0x3c   : > { %952 = vmatmul.bf16.gmra.mxu3 %v2647_v48  ;;  %v741_v11 = vrot.slane %v740_v4, 4  ;;  %v666_v18 = vrot.slane %v664_v8, 4  ;;  %v669_v19 = vrot.slane %v667_v9, 5  ;;  %v673_v23 = vshll.u32 %v3593_v16, 16  ;;  %v3606_v31 = vld [vmem:[#allocation2 + $0x8] sm:$0xf]  ;;  %vm3631_vm11 = vmor %vm982_vm9, %vm983_vm10 }
  0x3d   : > { %1236 = vmatpush.bf16.msrb.mxu3 %v3132_v2  ;;  %v603_v27 = vld [vmem:[#allocation2 + $0x18] sm:$0xf]  ;;  %v1269_v32 = vld [vmem:[#allocation2 + $0x8] sm:$0xf]  ;;  %v3608_v35 = vld [vmem:[#allocation2 + $0x1c] sm:$0x1] }
  0x3e   : > { %1102 = vmatpush.bf16.msrb.mxu2 %v3120_v55  ;;  %1482 = vmatpush.bf16.msrb.mxu0 %v3140_v63  ;;  %v746_v22 = vsel %vm3486_vm8, %v741_v11, %v745_v5  ;;  %v670_v28 = vor.u32 %v669_v19, %v666_v18  ;;  %v3098_v29 = vld [vmem:[#allocation2 + $0x14] sm:$0xf0]  ;;  %v675_v36 = vrot.slane %v673_v23, 5  ;;  %v678_v38 = vshrl.u32 %v603_v27, 16  ;;  %v3146_v48 = vld [vmem:[%s3999_s1 + $0x148] sm:$0xff] }
  0x3f   : > { %1656 = vmatpush.bf16.msrb.mxu1 %v3148_v3  ;;  %v771_v26 = vunpack.c.l.b16 %v746_v22  ;;  %v681_v39 = vshll.u32 %v603_v27, 16  ;;  %v2639_v40 = vor.u32 %v3098_v29, %v2638_v20  ;;  %v687_v46 = vshll.u32 %v3608_v35, 16  ;;  %v3620_v50 = vld [vmem:[#allocation2 + $0xc] sm:$0xf0]  ;;  %v1515_v0 = vld [vmem:[#allocation2 + $0x8] sm:$0xe] }
  0x40   : > { %v671_v45 = vrot.slane %v670_v28, 4  ;;  %v680_v53 = vrot.slane %v678_v38, 4  ;;  %v987_v55 = vrot.slane %v3427_v42, 5  ;;  %v2681_v57 = vrot.slane %v3601_v25, 9  ;;  %v1271_v58 = vld [vmem:[#allocation2 + $0x10] sm:$0xf] }
  0x41   : > { %v775_v43 = vpack.c.b16 %v771_v26, %v770_v15  ;;  %1237 = vmatpush.bf16.msrb.mxu3 %v3131_v12  ;;  %v683_v54 = vrot.slane %v681_v39, 5  ;;  %942 = vmatmul.bf16.gmra.mxu1 %v2639_v40  ;;  %v991_v62 = vrot.slane %v3515_v56, 5  ;;  %v1286_v42 = vshrl.u32 %v1269_v32, 16  ;;  %v3164_v4 = vld [vmem:[%s3999_s1 + $0x1b8] sm:$0xff]  ;;  %v1270_v5 = vld [vmem:[#allocation2 + $0xc] sm:$0x1] }
  0x42   : > { %1103 = vmatpush.bf16.msrb.mxu2 %v3119_v10  ;;  %1483 = vmatpush.bf16.msrb.mxu0 %v3139_v13  ;;  %v676_v59 = vsel %vm3486_vm8, %v671_v45, %v675_v36  ;;  %v1289_v63 = vshll.u32 %v1269_v32, 16  ;;  %v689_v2 = vrot.slane %v687_v46, 5  ;;  %v2755_v3 = vor.u32 %v3620_v50, %v3606_v31  ;;  %v1516_v6 = vld [vmem:[#allocation2 + $0x10] sm:$0xe]  ;;  %v3129_v56 = vld [vmem:[%s3999_s1 + $0xc0] sm:$0xff]  ;;  %v3180_v11 = vld [vmem:[%s3999_s1 + $0x238] sm:$0xff] }
  0x43   : > { %1657 = vmatpush.bf16.msrb.mxu1 %v3147_v14  ;;  %v684_v1 = vor.u32 %v683_v54, %v680_v53  ;;  %v1288_v7 = vrot.slane %v1286_v42, 4  ;;  %v1300_v9 = vshrl.u32 %v1271_v58, 16  ;;  %v1303_v10 = vshll.u32 %v1271_v58, 16  ;;  %v3145_v15 = vld [vmem:[%s3999_s1 + $0x140] sm:$0xff]  ;;  %v1272_v18 = vld [vmem:[#allocation2 + $0x14] sm:$0x1] }
  0x44   : > { %v1291_v8 = vrot.slane %v1289_v63, 5  ;;  %v766_v13 = vunpack.c.l.b16 %v676_v59  ;;  %v3649_v14 = vsel %vm3631_vm11, %v2680_v51, %v987_v55  ;;  %v3172_v19 = vld [vmem:[%s3999_s1 + $0x1f8] sm:$0xff]  ;;  %v2848_v20 = vrot.slane %v1515_v0, 9  ;;  %v3163_v29 = vld [vmem:[%s3999_s1 + $0x1b0] sm:$0xff]  ;;  %v2276_v38 = vld [vmem:[%s4003_s5] sm:$0x3] }
  0x45   : > { %851 = vmatmul.bf16.gmra.mxu2 %v775_v43  ;;  %1238 = vmatpush.bf16.msrb.mxu3 %v3130_v30  ;;  %v685_v12 = vrot.slane %v684_v1, 4  ;;  %v1302_v22 = vrot.slane %v1300_v9, 4  ;;  %v1305_v23 = vrot.slane %v1303_v10, 5  ;;  %v1541_v24 = vrot.slane %v1270_v5, 5  ;;  %v3171_v43 = vld [vmem:[%s3999_s1 + $0x1f0] sm:$0xff] }
  0x46   : > { %1104 = vmatpush.bf16.msrb.mxu2 %v3118_v21  ;;  %1484 = vmatpush.bf16.msrb.mxu0 %v3138_v41  ;;  %v1295_v21 = vshll.u32 %v1270_v5, 16  ;;  %v1292_v26 = vor.u32 %v1291_v8, %v1288_v7  ;;  %v2849_v27 = vrot.slane %v1516_v6, 9  ;;  %v1545_v28 = vrot.slane %v1272_v18, 5  ;;  %v1273_v50 = vld [vmem:[#allocation2 + $0x18] sm:$0xf]  ;;  %v3178_v7 = vld [vmem:[%s3999_s1 + $0x228] sm:$0xff] }
  0x47   : > { %1658 = vmatpush.bf16.msrb.mxu1 %v3146_v48  ;;  %v690_v25 = vsel %vm3486_vm8, %v685_v12, %v689_v2  ;;  %v992_v31 = vsel %vm3631_vm11, %v2681_v57, %v991_v62  ;;  %v1309_v32 = vshll.u32 %v1272_v18, 16  ;;  %v1542_v36 = vsel %vm3631_vm11, %v2848_v20, %v1541_v24  ;;  %v3162_v48 = vld [vmem:[%s3999_s1 + $0x1a8] sm:$0xff]  ;;  %v1275_v57 = vld [vmem:[#allocation2 + $0x20] sm:$0xf]  ;;  %v960_v59 = vld [vmem:[#allocation2 + $0x10] sm:$0xe] }
  0x48   : > { %v767_v30 = vunpack.c.l.b16 %v690_v25  ;;  %v1306_v39 = vor.u32 %v1305_v23, %v1302_v22  ;;  %v1546_v40 = vsel %vm3631_vm11, %v2849_v27, %v1545_v28  ;;  %v1588_v41 = vunpack.c.l.b16 %v1542_v36  ;;  %v961_v63 = vld [vmem:[#allocation2 + $0x18] sm:$0xe]  ;;  %v3170_v2 = vld [vmem:[%s3999_s1 + $0x1e8] sm:$0xff]  ;;  %v1274_v5 = vld [vmem:[#allocation2 + $0x1c] sm:$0x1] }
  0x49   : > { %1239 = vmatpush.bf16.msrb.mxu3 %v3129_v56  ;;  %vm2310_vm12 = vcmask 1041408   ;;  %v1297_v46 = vrot.slane %v1295_v21, 5  ;;  %v1034_v51 = vunpack.c.l.b16 %v3649_v14  ;;  %v1035_v53 = vunpack.c.l.b16 %v992_v31  ;;  %v1517_v56 = vld [vmem:[#allocation2 + $0x18] sm:$0xe]  ;;  %v1276_v10 = vld [vmem:[#allocation2 + $0x24] sm:$0x1] }
  0x4a   : > { %1105 = vmatpush.bf16.msrb.mxu2 %v3117_v47  ;;  %1485 = vmatpush.bf16.msrb.mxu0 %v3137_v60  ;;  %v773_v45 = vpack.c.b16 %v767_v30, %v766_v13  ;;  %v1589_v47 = vunpack.c.l.b16 %v1546_v40  ;;  %v1293_v54 = vrot.slane %v1292_v26, 4  ;;  %v2312_v55 = vsel %vm2310_vm12, %v2276_v38, 0  ;;  %v3179_v60 = vld [vmem:[%s3999_s1 + $0x230] sm:$0xff]  ;;  %v1518_v13 = vld [vmem:[#allocation2 + $0x20] sm:$0xe] }
  0x4b   : > { %1659 = vmatpush.bf16.msrb.mxu1 %v3145_v15  ;;  %v1311_v58 = vrot.slane %v1309_v32, 5  ;;  %v1307_v62 = vrot.slane %v1306_v39, 4  ;;  %v1314_v0 = vshrl.u32 %v1273_v50, 16  ;;  %v1317_v1 = vshll.u32 %v1273_v50, 16  ;;  %v3161_v14 = vld [vmem:[%s3999_s1 + $0x1a0] sm:$0xff] }
  0x4c   : > { %1240 = vmatmul.bf16.vlgmr.msrb.gmra.mxu3 %v2755_v3  ;;  %841 = vmatmul.bf16.gmra.mxu0 %v773_v45  ;;  %v1596_v42 = vpack.c.b16 %v1589_v47, %v1588_v41  ;;  %v3684_v3 = vld [vmem:[#allocation2 + $0x18] sm:$0xf]  ;;  %v1328_v6 = vshrl.u32 %v1275_v57, 16  ;;  %v1042_v8 = vpack.c.b16 %v1035_v53, %v1034_v51  ;;  %v1298_v9 = vsel %vm3486_vm8, %v1293_v54, %v1297_v46  ;;  %v962_v21 = vld [vmem:[#allocation2 + $0x20] sm:$0xe] }
  0x4d   : > { %2033 = vmatpush.bf16.msra.mxu3 %v3172_v19  ;;  %v1319_v12 = vrot.slane %v1317_v1, 5  ;;  %v2682_v15 = vrot.slane %v960_v59, 9  ;;  %v995_v18 = vrot.slane %v3593_v16, 5  ;;  %v2683_v19 = vrot.slane %v961_v63, 9  ;;  %v3169_v26 = vld [vmem:[%s3999_s1 + $0x1e0] sm:$0xff] }
  0x4e   : > { %1787 = vmatpush.bf16.msra.mxu2 %v3164_v4  ;;  %2207 = vmatpush.bf16.msra.mxu0 %v3180_v11  ;;  %v3686_v4 = vld [vmem:[#allocation2 + $0x1c] sm:$0xf0]  ;;  %v1316_v11 = vrot.slane %v1314_v0, 4  ;;  %v1331_v20 = vshll.u32 %v1275_v57, 16  ;;  %v1312_v22 = vsel %vm3486_vm8, %v1307_v62, %v1311_v58  ;;  %v999_v23 = vrot.slane %v3608_v35, 5 }
  0x4f   : > { %2321 = vmatpush.bf16.msra.mxu1 %v2312_v55  ;;  %v1330_v24 = vrot.slane %v1328_v6, 4  ;;  %v2850_v25 = vrot.slane %v1517_v56, 9  ;;  %v1549_v28 = vrot.slane %v1274_v5, 5  ;;  %v1553_v16 = vrot.slane %v1276_v10, 5  ;;  %v963_v30 = vld [vmem:[#allocation2 + $0x28] sm:$0xe] }
  0x50   : > { %v1333_v27 = vrot.slane %v1331_v20, 5  ;;  %v2759_v31 = vor.u32 %v3686_v4, %v3684_v3  ;;  %v1320_v32 = vor.u32 %v1319_v12, %v1316_v11  ;;  %v1323_v36 = vshll.u32 %v1274_v5, 16  ;;  %v464_v4 = vld [vmem:[%s3368_s24 + $0x1c] sm:$0xf]  ;;  %v1279_v6 = vld [vmem:[#allocation2 + $0x30] sm:$0xf] }
  0x51   : > { %2034 = vmatpush.bf16.msra.mxu3 %v3171_v43  ;;  %1660 = vmatmul.bf16.vlgmr.msrb.gmra.mxu1 %v1596_v42  ;;  %v2684_v35 = vrot.slane %v962_v21, 9  ;;  %v1414_v38 = vunpack.c.l.b16 %v1298_v9  ;;  %v1415_v39 = vunpack.c.l.b16 %v1312_v22  ;;  %v996_v40 = vsel %vm3631_vm11, %v2682_v15, %v995_v18  ;;  %v3160_v43 = vld [vmem:[%s3999_s1 + $0x198] sm:$0xff]  ;;  %v3177_v9 = vld [vmem:[%s3999_s1 + $0x220] sm:$0xff]  ;;  %v1520_v12 = vld [vmem:[#allocation2 + $0x30] sm:$0xe] }
  0x52   : > { %1788 = vmatpush.bf16.msra.mxu2 %v3163_v29  ;;  %2208 = vmatpush.bf16.msra.mxu0 %v3179_v60  ;;  %v2851_v29 = vrot.slane %v1518_v13, 9  ;;  %v1003_v41 = vrot.slane %v3482_v33, 5  ;;  %v1000_v45 = vsel %vm3631_vm11, %v2683_v19, %v999_v23  ;;  %v1337_v46 = vshll.u32 %v1276_v10, 16  ;;  %v1277_v60 = vld [vmem:[#allocation2 + $0x28] sm:$0xf]  ;;  %v3159_v13 = vld [vmem:[%s3999_s1 + $0x190] sm:$0xff] }
  0x53   : > { %v2685_v47 = vrot.slane %v963_v30, 9  ;;  %v1334_v50 = vor.u32 %v1333_v27, %v1330_v24  ;;  %v1550_v51 = vsel %vm3631_vm11, %v2850_v25, %v1549_v28  ;;  %v1321_v54 = vrot.slane %v1320_v32, 4  ;;  %v1519_v10 = vld [vmem:[#allocation2 + $0x28] sm:$0xe]  ;;  %v1278_v21 = vld [vmem:[#allocation2 + $0x2c] sm:$0x1] }
  0x54   : > { %v1554_v53 = vsel %vm3631_vm11, %v2851_v29, %v1553_v16  ;;  %v1004_v33 = vsel %vm3631_vm11, %v2684_v35, %v1003_v41  ;;  %v1325_v55 = vrot.slane %v1323_v36, 5  ;;  %v1422_v59 = vpack.c.b16 %v1415_v39, %v1414_v38  ;;  %v3176_v22 = vld [vmem:[%s3999_s1 + $0x218] sm:$0xff]  ;;  %v964_v24 = vld [vmem:[#allocation2 + $0x30] sm:$0xe]  ;;  %v594_v32 = vld [vmem:[#allocation2 + $0x40] sm:$0xf] }
  0x55   : > { %2035 = vmatpush.bf16.msra.mxu3 %v3170_v2  ;;  %1106 = vmatmul.bf16.vlgmr.msrb.gmra.mxu2 %v1042_v8  ;;  %v1038_v58 = vunpack.c.l.b16 %v1004_v33  ;;  %v1036_v62 = vunpack.c.l.b16 %v996_v40  ;;  %v1590_v42 = vunpack.c.l.b16 %v1550_v51  ;;  %v1591_v63 = vunpack.c.l.b16 %v1554_v53  ;;  %v3168_v8 = vld [vmem:[%s3999_s1 + $0x1d8] sm:$0xff] }
  0x56   : > { %1789 = vmatpush.bf16.msra.mxu2 %v3162_v48  ;;  %2209 = vmatpush.bf16.msra.mxu0 %v3178_v7  ;;  %v1007_v48 = vrot.slane %v3501_v44, 5  ;;  %v1037_v0 = vunpack.c.l.b16 %v1000_v45  ;;  %v1335_v1 = vrot.slane %v1334_v50, 4  ;;  %v1339_v2 = vrot.slane %v1337_v46, 5  ;;  %v965_v25 = vld [vmem:[#allocation2 + $0x38] sm:$0xe] }
  0x57   : > { %v1326_v5 = vsel %vm3486_vm8, %v1321_v54, %v1325_v55  ;;  %v1342_v56 = vshrl.u32 %v1277_v60, 16  ;;  %v1345_v7 = vshll.u32 %v1277_v60, 16  ;;  %v1597_v11 = vpack.c.b16 %v1591_v63, %v1590_v42  ;;  %v2762_v45 = vld [vmem:[#allocation2 + $0x28] sm:$0xf]  ;;  %v3127_v46 = vld [vmem:[#allocation2 + $0x2c] sm:$0xf0] }
  0x58   : > { %v1008_v57 = vsel %vm3631_vm11, %v2685_v47, %v1007_v48  ;;  %v522_v15 = vshrl.u32 %v464_v4, 16  ;;  %v1043_v18 = vpack.c.b16 %v1037_v0, %v1036_v62  ;;  %v1340_v19 = vsel %vm3486_vm8, %v1335_v1, %v1339_v2 }
  0x59   : > { %2036 = vmatpush.bf16.msra.mxu3 %v3169_v26  ;;  %v1039_v44 = vunpack.c.l.b16 %v1008_v57  ;;  %v3741_v20 = vunpack.c.l.b16 %v1326_v5  ;;  %v525_v23 = vshll.u32 %v464_v4, 16  ;;  %v1280_v26 = vld [vmem:[#allocation2 + $0x34] sm:$0x1]  ;;  %v1344_v27 = vrot.slane %v1342_v56, 4 }
  0x5a   : > { %1790 = vmatpush.bf16.msra.mxu2 %v3161_v14  ;;  %v3167_v14 = vld [vmem:[%s3999_s1 + $0x1d0] sm:$0xff]  ;;  %2210 = vmatpush.bf16.msra.mxu0 %v3177_v9  ;;  %v1347_v28 = vrot.slane %v1345_v7, 5  ;;  %v1356_v29 = vshrl.u32 %v1279_v6, 16  ;;  %v1359_v16 = vshll.u32 %v1279_v6, 16  ;;  %v2852_v30 = vrot.slane %v1519_v10, 9  ;;  %v3166_v9 = vld [vmem:[%s3999_s1 + $0x1c8] sm:$0xff] }
  0x5b   : > { %v3722_v3 = vpack.c.b16 %v1039_v44, %v1038_v58  ;;  %v2686_v36 = vrot.slane %v964_v24, 9  ;;  %v1011_v35 = vrot.slane %v3557_v49, 5  ;;  %v1557_v38 = vrot.slane %v1278_v21, 5  ;;  %v3158_v58 = vld [vmem:[%s3999_s1 + $0x188] sm:$0xff]  ;;  %v1824_v10 = vld [vmem:[#allocation2 + $0x10] sm:$0xf] }
  0x5c   : > { %1245 = vmatmul.bf16.gmra.mxu3 %v2759_v31  ;;  %1486 = vmatmul.bf16.vlgmr.msrb.gmra.mxu0 %v1422_v59  ;;  %v524_v31 = vrot.slane %v522_v15, 7  ;;  %v2853_v39 = vrot.slane %v1520_v12, 9  ;;  %v2687_v40 = vrot.slane %v965_v25, 9  ;;  %v1015_v41 = vrot.slane %v3559_v52, 5  ;;  %v3175_v12 = vld [vmem:[%s3999_s1 + $0x210] sm:$0xff]  ;;  %v3174_v25 = vld [vmem:[%s3999_s1 + $0x208] sm:$0xff] }
  0x5d   : > { %2037 = vmatpush.bf16.msra.mxu3 %v3168_v8  ;;  %v1561_v47 = vrot.slane %v1280_v26, 5  ;;  %v1012_v51 = vsel %vm3631_vm11, %v2686_v36, %v1011_v35  ;;  %v1358_v53 = vrot.slane %v1356_v29, 4  ;;  %v1361_v33 = vrot.slane %v1359_v16, 5  ;;  %v1281_v8 = vld [vmem:[#allocation2 + $0x38] sm:$0xf] }
  0x5e   : > { %1791 = vmatpush.bf16.msra.mxu2 %v3160_v43  ;;  %v597_v43 = vld [vmem:[#allocation2 + $0x44] sm:$0x1]  ;;  %2211 = vmatpush.bf16.msra.mxu0 %v3176_v22  ;;  %v527_v48 = vor.u32 %v525_v23, %v524_v31  ;;  %v528_v50 = vrot.slane %v524_v31, 4  ;;  %v1016_v49 = vsel %vm3631_vm11, %v2687_v40, %v1015_v41  ;;  %v1040_v54 = vunpack.c.l.b16 %v1012_v51  ;;  %v1521_v23 = vld [vmem:[#allocation2 + $0x38] sm:$0xe] }
  0x5f   : > { %v1417_v55 = vunpack.c.l.b16 %v1340_v19  ;;  %v1041_v57 = vunpack.c.l.b16 %v1016_v49  ;;  %v2763_v44 = vor.u32 %v3127_v46, %v2762_v45  ;;  %v1558_v60 = vsel %vm3631_vm11, %v2852_v30, %v1557_v38  ;;  %v3165_v19 = vld [vmem:[%s3999_s1 + $0x1c0] sm:$0xff]  ;;  %v1282_v16 = vld [vmem:[#allocation2 + $0x3c] sm:$0x1] }
  0x60   : > { %v595_v52 = vsel %vm3389_vm2, %v527_v48, %v594_v32  ;;  %v598_v59 = vsel %vm3422_vm5, %v528_v50, %v597_v43  ;;  %v1562_v62 = vsel %vm3631_vm11, %v2853_v39, %v1561_v47  ;;  %v1348_v17 = vor.u32 %v1347_v28, %v1344_v27  ;;  %v2766_v43 = vld [vmem:[#allocation2 + $0x38] sm:$0xf]  ;;  %v3173_v47 = vld [vmem:[%s3999_s1 + $0x200] sm:$0xff] }
  0x61   : > { %1665 = vmatmul.bf16.gmra.mxu1 %v1597_v11  ;;  %2038 = vmatpush.bf16.msra.mxu3 %v3167_v14  ;;  %596 = vst [vmem:[#allocation2 + $0x40] sm:$0xf] %v595_v52  ;;  %v3763_v42 = vpack.c.b16 %v1041_v57, %v1040_v54  ;;  %v1351_v63 = vshll.u32 %v1278_v21, 16  ;;  %v1362_v0 = vor.u32 %v1361_v33, %v1358_v53  ;;  %v1365_v1 = vshll.u32 %v1280_v26, 16  ;;  %v1826_v14 = vld [vmem:[#allocation2 + $0x18] sm:$0xf] }
  0x62   : > { %1792 = vmatpush.bf16.msra.mxu2 %v3159_v13  ;;  %599 = vst [vmem:[#allocation2 + $0x44] sm:$0x1] %v598_v59  ;;  %v1423_v2 = vpack.c.b16 %v1417_v55, %v3741_v20  ;;  %v1592_v37 = vunpack.c.l.b16 %v1558_v60  ;;  %v1593_v4 = vunpack.c.l.b16 %v1562_v62  ;;  %v1349_v5 = vrot.slane %v1348_v17, 4  ;;  %v3157_v13 = vld [vmem:[%s3999_s1 + $0x180] sm:$0xff]  ;;  %2212 = vmatpush.bf16.msra.mxu0 %v3175_v12  ;;  %v3789_v55 = vld [vmem:[#allocation2 + $0x14] sm:$0x1] }
  0x63   : > { %v1353_v6 = vrot.slane %v1351_v63, 5  ;;  %v1363_v56 = vrot.slane %v1362_v0, 4  ;;  %v1367_v7 = vrot.slane %v1365_v1, 5  ;;  %v1373_v22 = vshll.u32 %v1281_v8, 16  ;;  %v3791_v52 = vld [vmem:[#allocation2 + $0x1c] sm:$0x1] }
  0x64   : > { %v1598_v11 = vpack.c.b16 %v1593_v4, %v1592_v37  ;;  %v1841_v26 = vshrl.u32 %v1824_v10, 16  ;;  %v1844_v27 = vshll.u32 %v1824_v10, 16  ;;  %v1855_v28 = vshrl.u32 %v1826_v14, 16 }
  0x65   : > { %1111 = vmatmul.bf16.gmra.mxu2 %v1043_v18  ;;  %v1370_v18 = vshrl.u32 %v1281_v8, 16  ;;  %2039 = vmatpush.bf16.msra.mxu3 %v3166_v9  ;;  %v1354_v20 = vsel %vm3486_vm8, %v1349_v5, %v1353_v6  ;;  %v1368_v21 = vsel %vm3486_vm8, %v1363_v56, %v1367_v7  ;;  %v1858_v29 = vshll.u32 %v1826_v14, 16  ;;  %v1828_v6 = vld [vmem:[#allocation2 + $0x20] sm:$0xf]  ;;  %v1830_v56 = vld [vmem:[#allocation2 + $0x28] sm:$0xf] }
  0x66   : > { %1793 = vmatpush.bf16.msra.mxu2 %v3158_v58  ;;  %v2854_v36 = vrot.slane %v1521_v23, 9  ;;  %v1565_v35 = vrot.slane %v1282_v16, 5  ;;  %v1418_v40 = vunpack.c.l.b16 %v1354_v20  ;;  %v1419_v41 = vunpack.c.l.b16 %v1368_v21  ;;  %2213 = vmatpush.bf16.msra.mxu0 %v3174_v25 }
  0x67   : > { %v1372_v45 = vrot.slane %v1370_v18, 4  ;;  %v1375_v46 = vrot.slane %v1373_v22, 5  ;;  %v1843_v50 = vrot.slane %v1841_v26, 4  ;;  %v1846_v51 = vrot.slane %v1844_v27, 5 }
  0x68   : > { %v1283_v15 = vld [vmem:[#allocation2 + $0x40] sm:$0xf]  ;;  %v1857_v53 = vrot.slane %v1855_v28, 4  ;;  %v1860_v33 = vrot.slane %v1858_v29, 5  ;;  %v1566_v57 = vsel %vm3631_vm11, %v2854_v36, %v1565_v35  ;;  %v1424_v59 = vpack.c.b16 %v1419_v41, %v1418_v40 }
  0x69   : > { %v1522_v24 = vld [vmem:[#allocation2 + $0x40] sm:$0xe]  ;;  %v1284_v30 = vld [vmem:[#allocation2 + $0x44] sm:$0x1]  ;;  %v1384_v31 = vshrl.u32 %v1283_v15, 16  ;;  %v1387_v32 = vshll.u32 %v1283_v15, 16  ;;  %2040 = vmatpush.bf16.msra.mxu3 %v3165_v19  ;;  %v1847_v62 = vor.u32 %v1846_v51, %v1843_v50  ;;  %v1594_v37 = vunpack.c.l.b16 %v1566_v57 }
  0x6a   : > { %1794 = vmatpush.bf16.msra.mxu2 %v3157_v13  ;;  %v2855_v38 = vrot.slane %v1522_v24, 9  ;;  %v1569_v39 = vrot.slane %v1284_v30, 5  ;;  %v3128_v48 = vld [vmem:[#allocation2 + $0x3c] sm:$0xf0]  ;;  %v1379_v60 = vshll.u32 %v1282_v16, 16  ;;  %2214 = vmatpush.bf16.msra.mxu0 %v3173_v47  ;;  %v1850_v17 = vshll.u32 %v3789_v55, 16 }
  0x6b   : > { %v1386_v49 = vrot.slane %v1384_v31, 4  ;;  %v1389_v54 = vrot.slane %v1387_v32, 5  ;;  %v1861_v63 = vor.u32 %v1860_v33, %v1857_v53  ;;  %v1864_v0 = vshll.u32 %v3791_v52, 16  ;;  %v3809_v31 = vld [vmem:[#allocation2 + $0x2c] sm:$0x1] }
  0x6c   : > { %1250 = vmatmul.bf16.gmra.mxu3 %v2763_v44  ;;  %1491 = vmatmul.bf16.gmra.mxu0 %v1423_v2  ;;  %v1570_v58 = vsel %vm3631_vm11, %v2855_v38, %v1569_v39  ;;  %v2767_v44 = vor.u32 %v3128_v48, %v2766_v43  ;;  %v1393_v2 = vshll.u32 %v1284_v30, 16  ;;  %v1381_v5 = vrot.slane %v1379_v60, 5  ;;  %v3807_v30 = vld [vmem:[#allocation2 + $0x24] sm:$0x1]  ;;  %v2922_v51 = vld [vmem:[#allocation2 + $0x10] sm:$0xf] }
  0x6d   : > { %v1390_v1 = vor.u32 %v1389_v54, %v1386_v49  ;;  %v1595_v4 = vunpack.c.l.b16 %v1570_v58  ;;  %v1848_v7 = vrot.slane %v1847_v62, 4  ;;  %v1852_v8 = vrot.slane %v1850_v17, 5  ;;  %v3153_v53 = vld [vmem:[#allocation2 + $0x14] sm:$0xf0]  ;;  %v1832_v33 = vld [vmem:[#allocation2 + $0x30] sm:$0xf] }
  0x6e   : > { %v1862_v9 = vrot.slane %v1861_v63, 4  ;;  %v1866_v10 = vrot.slane %v1864_v0, 5  ;;  %v1395_v13 = vrot.slane %v1393_v2, 5  ;;  %v1869_v15 = vshrl.u32 %v1828_v6, 16  ;;  %v1834_v49 = vld [vmem:[#allocation2 + $0x38] sm:$0xf] }
  0x6f   : > { %v1391_v12 = vrot.slane %v1390_v1, 4  ;;  %v1599_v14 = vpack.c.b16 %v1595_v4, %v1594_v37  ;;  %v1872_v18 = vshll.u32 %v1828_v6, 16  ;;  %v1883_v19 = vshrl.u32 %v1830_v56, 16 }
  0x70   : > { %v1886_v20 = vshll.u32 %v1830_v56, 16  ;;  %v1853_v21 = vsel %vm3486_vm8, %v1848_v7, %v1852_v8  ;;  %v1867_v22 = vsel %vm3486_vm8, %v1862_v9, %v1866_v10  ;;  %v1871_v25 = vrot.slane %v1869_v15, 4  ;;  %v3832_v9 = vld [vmem:[#allocation2 + $0x34] sm:$0x1]  ;;  %v3834_v10 = vld [vmem:[#allocation2 + $0x3c] sm:$0x1] }
  0x71   : > { %1670 = vmatmul.bf16.gmra.mxu1 %v1598_v11  ;;  %v1396_v24 = vsel %vm3486_vm8, %v1391_v12, %v1395_v13  ;;  %v1874_v26 = vrot.slane %v1872_v18, 5  ;;  %v1885_v27 = vrot.slane %v1883_v19, 4  ;;  %v1969_v29 = vunpack.c.l.b16 %v1853_v21  ;;  %v2072_v12 = vld [vmem:[#allocation2 + $0x20] sm:$0xe]  ;;  %v2073_v13 = vld [vmem:[#allocation2 + $0x28] sm:$0xe] }
  0x72   : > { %v1888_v28 = vrot.slane %v1886_v20, 5  ;;  %v1970_v16 = vunpack.c.l.b16 %v1867_v22  ;;  %v1421_v36 = vunpack.c.l.b16 %v1396_v24  ;;  %v1878_v38 = vshll.u32 %v3807_v30, 16  ;;  %v2926_v21 = vld [vmem:[#allocation2 + $0x20] sm:$0xf] }
  0x73   : > { %v1875_v35 = vor.u32 %v1874_v26, %v1871_v25  ;;  %v1892_v40 = vshll.u32 %v3809_v31, 16  ;;  %v2096_v57 = vrot.slane %v3789_v55, 5  ;;  %vm2297_vm13 = vcmask 31744   ;;  %v3154_v26 = vld [vmem:[#allocation2 + $0x24] sm:$0xf0] }
  0x74   : > { %v1889_v39 = vor.u32 %v1888_v28, %v1885_v27  ;;  %v1977_v41 = vpack.c.b16 %v1970_v16, %v1969_v29  ;;  %v1897_v62 = vshrl.u32 %v1832_v33, 16  ;;  %v1900_v17 = vshll.u32 %v1832_v33, 16 }
  0x75   : > { %1116 = vmatmul.bf16.gmra.mxu2 %v3722_v3  ;;  %v1376_v3 = vor.u32 %v1375_v46, %v1372_v45  ;;  %v2070_v45 = vld [vmem:[#allocation2 + $0x10] sm:$0xe]  ;;  %v2071_v46 = vld [vmem:[#allocation2 + $0x18] sm:$0xe]  ;;  %v1876_v47 = vrot.slane %v1875_v35, 4  ;;  %v1894_v50 = vrot.slane %v1892_v40, 5  ;;  %v2923_v1 = vor.u32 %v3153_v53, %v2922_v51 }
  0x76   : > { %v1890_v48 = vrot.slane %v1889_v39, 4  ;;  %v3016_v54 = vrot.slane %v2070_v45, 9  ;;  %v3017_v58 = vrot.slane %v2071_v46, 9  ;;  %v1911_v63 = vshrl.u32 %v1834_v49, 16  ;;  %v1838_v35 = vld [vmem:[#allocation2 + $0x48] sm:$0xf] }
  0x77   : > { %v1377_v11 = vrot.slane %v1376_v3, 4  ;;  %v1914_v0 = vshll.u32 %v1834_v49, 16  ;;  %v1899_v4 = vrot.slane %v1897_v62, 4  ;;  %v1906_v15 = vshll.u32 %v3832_v9, 16 }
  0x78   : > { %v1895_v60 = vsel %vm3486_vm8, %v1890_v48, %v1894_v50  ;;  %v2097_v2 = vsel %vm3631_vm11, %v3016_v54, %v2096_v57  ;;  %v1913_v6 = vrot.slane %v1911_v63, 4  ;;  %v1920_v19 = vshll.u32 %v3834_v10, 16  ;;  %v3850_v54 = vld [vmem:[#allocation2 + $0x44] sm:$0x1]  ;;  %v3852_v57 = vld [vmem:[#allocation2 + $0x4c] sm:$0x1] }
  0x79   : > { %v1382_v23 = vsel %vm3486_vm8, %v1377_v11, %v1381_v5  ;;  %v1972_v37 = vunpack.c.l.b16 %v1895_v60  ;;  %v1902_v5 = vrot.slane %v1900_v17, 5  ;;  %v1916_v56 = vrot.slane %v1914_v0, 5 }
  0x7a   : > { %v1420_v32 = vunpack.c.l.b16 %v1382_v23  ;;  %v2143_v7 = vunpack.c.l.b16 %v2097_v2  ;;  %v3018_v22 = vrot.slane %v2072_v12, 9  ;;  %v2104_v23 = vrot.slane %v3807_v30, 5 }
  0x7b   : > { %v1917_v18 = vor.u32 %v1916_v56, %v1913_v6  ;;  %v3019_v24 = vrot.slane %v2073_v13, 9  ;;  %v2108_v25 = vrot.slane %v3809_v31, 5  ;;  %v1908_v28 = vrot.slane %v1906_v15, 5  ;;  %v2930_v6 = vld [vmem:[#allocation2 + $0x30] sm:$0xf] }
  0x7c   : > { %1255 = vmatmul.bf16.gmra.mxu3 %v2767_v44  ;;  %1496 = vmatmul.bf16.gmra.mxu0 %v1424_v59  ;;  %v1425_v43 = vpack.c.b16 %v1421_v36, %v1420_v32  ;;  %v2100_v59 = vrot.slane %v3791_v52, 5  ;;  %v3181_v44 = vld [vmem:[%s3818_s22] sm:$0xff]  ;;  %v1922_v16 = vrot.slane %v1920_v19, 5  ;;  %v3182_v32 = vld [vmem:[%s3818_s22 + $0x8] sm:$0xff]  ;;  %v2105_v39 = vsel %vm3631_vm11, %v3018_v22, %v2104_v23  ;;  %v3155_v56 = vld [vmem:[#allocation2 + $0x34] sm:$0xf0] }
  0x7d   : > { %v1918_v29 = vrot.slane %v1917_v18, 4  ;;  %v1836_v36 = vld [vmem:[#allocation2 + $0x40] sm:$0xf]  ;;  %v2109_v30 = vsel %vm3631_vm11, %v3019_v24, %v2108_v25  ;;  %v1939_v45 = vshrl.u32 %v1838_v35, 16  ;;  %v1942_v46 = vshll.u32 %v1838_v35, 16 }
  0x7e   : > { %v2101_v55 = vsel %vm3631_vm11, %v3017_v58, %v2100_v59  ;;  %v1934_v62 = vshll.u32 %v3850_v54, 16  ;;  %v1948_v63 = vshll.u32 %v3852_v57, 16  ;;  %v2112_v2 = vrot.slane %v3832_v9, 5  ;;  %v2934_v35 = vld [vmem:[#allocation2 + $0x40] sm:$0xf] }
  0x7f   : > { %v2144_v8 = vunpack.c.l.b16 %v2101_v55  ;;  %v1923_v40 = vsel %vm3486_vm8, %v1918_v29, %v1922_v16  ;;  %v1941_v33 = vrot.slane %v1939_v45, 4  ;;  %v1944_v49 = vrot.slane %v1942_v46, 5  ;;  %v2077_v29 = vld [vmem:[#allocation2 + $0x48] sm:$0xe] }
  0x80   : > { %v1974_v50 = vunpack.c.l.b16 %v1923_v40  ;;  %v2931_v12 = vor.u32 %v3155_v56, %v2930_v6 }
  0x81   : > { %1675 = vmatmul.bf16.gmra.mxu1 %v1599_v14  ;;  %v1903_v14 = vor.u32 %v1902_v5, %v1899_v4  ;;  %v2151_v20 = vpack.c.b16 %v2144_v8, %v2143_v7  ;;  %v1945_v17 = vor.u32 %v1944_v49, %v1941_v33  ;;  %v1950_v5 = vrot.slane %v1948_v63, 5  ;;  %v3183_v8 = vld [vmem:[%s3818_s22 + $0x10] sm:$0xff] }
  0x82   : > { %v2116_v7 = vrot.slane %v3834_v10, 5 }
  0x83   : > { %v1904_v27 = vrot.slane %v1903_v14, 4  ;;  %v1946_v4 = vrot.slane %v1945_v17, 4 }
  0x85   : > { %1121 = vmatmul.bf16.gmra.mxu2 %v3763_v42  ;;  %v1880_v42 = vrot.slane %v1878_v38, 5  ;;  %v2927_v38 = vor.u32 %v3154_v26, %v2926_v21  ;;  %v1909_v31 = vsel %vm3486_vm8, %v1904_v27, %v1908_v28  ;;  %v1951_v14 = vsel %vm3486_vm8, %v1946_v4, %v1950_v5  ;;  %v2076_v28 = vld [vmem:[#allocation2 + $0x40] sm:$0xe] }
  0x86   : > { %v1973_v48 = vunpack.c.l.b16 %v1909_v31  ;;  %v1976_v19 = vunpack.c.l.b16 %v1951_v14  ;;  %v3022_v16 = vrot.slane %v2076_v28, 9 }
  0x87   : > { %v1881_v3 = vsel %vm3486_vm8, %v1876_v47, %v1880_v42  ;;  %v2145_v47 = vunpack.c.l.b16 %v2105_v39  ;;  %v2146_v42 = vunpack.c.l.b16 %v2109_v30  ;;  %v2124_v39 = vrot.slane %v3852_v57, 5  ;;  %v3184_v30 = vld [vmem:[%s3818_s22 + $0x18] sm:$0xff] }
  0x88   : > { %v1971_v52 = vunpack.c.l.b16 %v1881_v3  ;;  %v1979_v59 = vpack.c.b16 %v1974_v50, %v1973_v48  ;;  %v2075_v3 = vld [vmem:[#allocation2 + $0x38] sm:$0xe] }
  0x89   : > { %v2152_v58 = vpack.c.b16 %v2146_v42, %v2145_v47  ;;  %v3021_v55 = vrot.slane %v2075_v3, 9 }
  0x8a   : > { %v1978_v11 = vpack.c.b16 %v1972_v37, %v1971_v52  ;;  %v1936_v37 = vrot.slane %v1934_v62, 5 }
  0x8b   : > { %v2117_v15 = vsel %vm3631_vm11, %v3021_v55, %v2116_v7 }
  0x8c   : > { %2041 = vmatmul.bf16.vlgmr.msra.gmra.mxu3 %v1977_v41  ;;  %1501 = vmatmul.bf16.gmra.mxu0 %v1425_v43  ;;  %v1925_v41 = vshrl.u32 %v1836_v36, 16  ;;  %v1928_v43 = vshll.u32 %v1836_v36, 16  ;;  %v3023_v36 = vrot.slane %v2077_v29, 9 }
  0x8e   : > { %v1927_v51 = vrot.slane %v1925_v41, 4  ;;  %v1930_v53 = vrot.slane %v1928_v43, 5  ;;  %v2125_v48 = vsel %vm3631_vm11, %v3023_v36, %v2124_v39 }
  0x90   : > { %v1931_v60 = vor.u32 %v1930_v53, %v1927_v51  ;;  %v2150_v51 = vunpack.c.l.b16 %v2125_v48 }
  0x91   : > { %3088 = vmatmul.msk.bf16.vlgmr.msra.gmra.mxu1 %vm2297_vm13, %v3181_v44  ;;  %v2074_v44 = vld [vmem:[#allocation2 + $0x30] sm:$0xe] }
  0x92   : > { %v1932_v52 = vrot.slane %v1931_v60, 4 }
  0x94   : > { %v1937_v13 = vsel %vm3486_vm8, %v1932_v52, %v1936_v37 }
  0x95   : > { %1795 = vmatmul.bf16.vlgmr.msra.gmra.mxu2 %v2923_v1  ;;  %v3020_v1 = vrot.slane %v2074_v44, 9  ;;  %v1975_v18 = vunpack.c.l.b16 %v1937_v13 }
  0x97   : > { %v2113_v9 = vsel %vm3631_vm11, %v3020_v1, %v2112_v2  ;;  %v1980_v25 = vpack.c.b16 %v1976_v19, %v1975_v18 }
  0x98   : > { %v2147_v10 = vunpack.c.l.b16 %v2113_v9 }
  0x9c   : > { %2046 = vmatmul.bf16.gmra.mxu3 %v1978_v11  ;;  %2215 = vmatmul.bf16.vlgmr.msra.gmra.mxu0 %v2151_v20  ;;  %v2148_v20 = vunpack.c.l.b16 %v2117_v15 }
  0x9e   : > { %v2153_v26 = vpack.c.b16 %v2148_v20, %v2147_v10 }
  0xa1   : > { %3089 = vmatmul.msk.bf16.gmra.mxu1 %vm2297_vm13, %v3182_v32  ;;  %v2120_v32 = vrot.slane %v3850_v54, 5 }
  0xa3   : > { %v2121_v42 = vsel %vm3631_vm11, %v3022_v16, %v2120_v32 }
  0xa4   : > { %v2149_v50 = vunpack.c.l.b16 %v2121_v42 }
  0xa5   : > { %1800 = vmatmul.bf16.gmra.mxu2 %v2927_v38  ;;  %v3156_v38 = vld [vmem:[#allocation2 + $0x44] sm:$0xf0] }
  0xa6   : > { %v2935_v47 = vor.u32 %v3156_v38, %v2934_v35  ;;  %v2154_v54 = vpack.c.b16 %v2150_v51, %v2149_v50 }
  0xac   : > { %2051 = vmatmul.bf16.gmra.mxu3 %v1979_v59  ;;  %2220 = vmatmul.bf16.gmra.mxu0 %v2152_v58 }
  0xad   : > { %v938_v0 = vpop.f32.mrf.mxu1 }
  0xaf   : > { %v948_v11 = vpop.f32.mrf.mxu3 }
  0xb1   : > { %3090 = vmatmul.msk.bf16.gmra.mxu1 %vm2297_vm13, %v3183_v8 }
  0xb5   : > { %1805 = vmatmul.bf16.gmra.mxu2 %v2931_v12  ;;  %v940_v21 = vpop.f32.mrf.mxu1 }
  0xb7   : > { %v950_v23 = vpop.f32.mrf.mxu3 }
  0xb8   : > { %v837_v22 = vpop.f32.mrf.mxu0  ;;  %v847_v34 = vpop.f32.mrf.mxu2 }
  0xb9   : > { %v939_v24 = vadd.f32 %v938_v0, %v837_v22  ;;  %v3868_v27 = vadd.f32 %v948_v11, %v847_v34 }
  0xbc   : > { %2056 = vmatmul.bf16.gmra.mxu3 %v1980_v25  ;;  %2225 = vmatmul.bf16.gmra.mxu0 %v2153_v26 }
  0xbe   : > { %v943_v40 = vpop.f32.mrf.mxu1 }
  0xbf   : > { %v953_v45 = vpop.f32.mrf.mxu3 }
  0xc0   : > { %v839_v31 = vpop.f32.mrf.mxu0  ;;  %v849_v43 = vpop.f32.mrf.mxu2 }
  0xc1   : > { %v3873_v41 = vadd.f32 %v940_v21, %v839_v31  ;;  %v3875_v46 = vadd.f32 %v950_v23, %v849_v43  ;;  %3091 = vmatmul.msk.bf16.gmra.mxu1 %vm2297_vm13, %v3184_v30 }
  0xc5   : > { %1810 = vmatmul.bf16.gmra.mxu2 %v2935_v47 }
  0xc6   : > { %v945_v53 = vpop.f32.mrf.mxu1 }
  0xc7   : > { %v955_v49 = vpop.f32.mrf.mxu3 }
  0xc8   : > { %v852_v33 = vpop.f32.mrf.mxu2 }
  0xc9   : > { %v954_v57 = vadd.f32 %v953_v45, %v852_v33  ;;  %v842_v58 = vpop.f32.mrf.mxu0 }
  0xca   : > { %v944_v59 = vadd.f32 %v943_v40, %v842_v58 }
  0xcc   : > { %2230 = vmatmul.bf16.gmra.mxu0 %v2154_v54 }
  0xce   : > { %v1661_v44 = vpop.f32.mrf.mxu1 }
  0xcf   : > { %v1241_v60 = vpop.f32.mrf.mxu3 }
  0xd0   : > { %v854_v3 = vpop.f32.mrf.mxu2 }
  0xd1   : > { %v3882_v62 = vadd.f32 %v955_v49, %v854_v3  ;;  %v844_v61 = vpop.f32.mrf.mxu0  ;;  %v3915_v3 = vld [vmem:[%s4004_s6] ss:$0 sm:$0xff] }
  0xd2   : > { %v3884_v17 = vadd.f32 %v945_v53, %v844_v61  ;;  %v3920_v61 = vld [vmem:[%s4000_s2] ss:$0 sm:$0xff] }
  0xd6   : > { %v1663_v63 = vpop.f32.mrf.mxu1 }
  0xd7   : > { %v1243_v1 = vpop.f32.mrf.mxu3 }
  0xd8   : > { %v1107_v0 = vpop.f32.mrf.mxu2 }
  0xd9   : > { %v1127_v2 = vadd.f32 %v1107_v0, %v939_v24  ;;  %v1487_v55 = vpop.f32.mrf.mxu0 }
  0xdb   : > { %v1261_v52 = vadd.f32 %v1241_v60, %v1127_v2 }
  0xdd   : > { %v1507_v37 = vadd.f32 %v1487_v55, %v1261_v52  ;;  %v3926_v52 = vld [vmem:[%s4005_s7] ss:$0 sm:$0xff] }
  0xde   : > { %v1666_v4 = vpop.f32.mrf.mxu1 }
  0xdf   : > { %v1681_v5 = vadd.f32 %v1661_v44, %v1507_v37  ;;  %v1246_v56 = vpop.f32.mrf.mxu3 }
  0xe0   : > { %v1109_v6 = vpop.f32.mrf.mxu2 }
  0xe1   : > { %v1489_v7 = vpop.f32.mrf.mxu0  ;;  %v1128_v51 = vadd.f32 %v1109_v6, %v3873_v41 }
  0xe3   : > { %v1262_v53 = vadd.f32 %v1243_v1, %v1128_v51 }
  0xe5   : > { %v1508_v44 = vadd.f32 %v1489_v7, %v1262_v53 }
  0xe6   : > { %v3886_v8 = vpop.f32.mrf.mxu1 }
  0xe7   : > { %v1248_v12 = vpop.f32.mrf.mxu3  ;;  %v1682_v41 = vadd.f32 %v1663_v63, %v1508_v44 }
  0xe8   : > { %v1112_v11 = vpop.f32.mrf.mxu2 }
  0xe9   : > { %v1129_v13 = vadd.f32 %v1112_v11, %v944_v59  ;;  %v1492_v14 = vpop.f32.mrf.mxu0 }
  0xeb   : > { %v1263_v9 = vadd.f32 %v1246_v56, %v1129_v13 }
  0xed   : > { %v1509_v15 = vadd.f32 %v1492_v14, %v1263_v9 }
  0xee   : > { %v1671_v18 = vpop.f32.mrf.mxu1 }
  0xef   : > { %v1683_v19 = vadd.f32 %v1666_v4, %v1509_v15  ;;  %v1251_v20 = vpop.f32.mrf.mxu3  ;;  %v3932_v4 = vld [vmem:[%s4001_s3] ss:$0 sm:$0xff] }
  0xf0   : > { %v1114_v10 = vpop.f32.mrf.mxu2 }
  0xf1   : > { %v3888_v21 = vpop.f32.mrf.mxu0  ;;  %v1130_v63 = vadd.f32 %v1114_v10, %v3884_v17 }
  0xf3   : > { %v1264_v9 = vadd.f32 %v1248_v12, %v1130_v63 }
  0xf6   : > { %v3890_v22 = vpop.f32.mrf.mxu1 }
  0xf7   : > { %v3892_v24 = vpop.f32.mrf.mxu3 }
  0xf8   : > { %v1117_v23 = vpop.f32.mrf.mxu2 }
  0xf9   : > { %v1131_v34 = vadd.f32 %v1117_v23, %v3868_v27  ;;  %v1497_v25 = vpop.f32.mrf.mxu0 }
  0xfb   : > { %v1265_v26 = vadd.f32 %v1251_v20, %v1131_v34 }
  0xfd   : > { %v1511_v28 = vadd.f32 %v1497_v25, %v1265_v26 }
  0xfe   : > { %v1676_v29 = vpop.f32.mrf.mxu1 }
  0xff   : > { %v3895_v16 = vadd.f32 %v1671_v18, %v1511_v28  ;;  %v1256_v36 = vpop.f32.mrf.mxu3 }
 0x100   : > { %v3897_v32 = vpop.f32.mrf.mxu2 }
 0x101   : > { %v3899_v35 = vpop.f32.mrf.mxu0  ;;  %v1132_v51 = vadd.f32 %v3897_v32, %v3875_v46 }
 0x106   : > { %v3901_v38 = vpop.f32.mrf.mxu1 }
 0x107   : > { %v3903_v30 = vpop.f32.mrf.mxu3 }
 0x108   : > { %v1122_v39 = vpop.f32.mrf.mxu2 }
 0x109   : > { %v1133_v31 = vadd.f32 %v1122_v39, %v954_v57  ;;  %v1502_v40 = vpop.f32.mrf.mxu0 }
 0x10b   : > { %v1267_v43 = vadd.f32 %v1256_v36, %v1133_v31  ;;  %v1510_v36 = vadd.f32 %v3888_v21, %v1264_v9 }
 0x10d   : > { %v1513_v27 = vadd.f32 %v1502_v40, %v1267_v43  ;;  %v1684_v43 = vadd.f32 %v3886_v8, %v1510_v36 }
 0x10e   : > { %v2323_v45 = vpop.f32.mrf.mxu1 }
 0x10f   : > { %v3905_v47 = vadd.f32 %v1676_v29, %v1513_v27  ;;  %v2042_v48 = vpop.f32.mrf.mxu3  ;;  %v2347_v55 = vmul.f32 %v3915_v3, %v2323_v45 }
 0x110   : > { %v3907_v42 = vpop.f32.mrf.mxu2 }
 0x111   : > { %v3909_v50 = vpop.f32.mrf.mxu0  ;;  %v2359_v7 = vadd.f32 %v3926_v52, %v2347_v55 }
 0x116   : > { %v2325_v33 = vpop.f32.mrf.mxu1 }
 0x117   : > { %v2044_v54 = vpop.f32.mrf.mxu3  ;;  %v2348_v13 = vmul.f32 %v3915_v3, %v2325_v33 }
 0x118   : > { %v1796_v49 = vpop.f32.mrf.mxu2 }
 0x119   : > { %v1816_v58 = vadd.f32 %v1796_v49, %v1681_v5  ;;  %v2216_v59 = vpop.f32.mrf.mxu0  ;;  %v2360_v23 = vadd.f32 %v3926_v52, %v2348_v13 }
 0x11b   : > { %v2062_v57 = vadd.f32 %v2042_v48, %v1816_v58 }
 0x11d   : > { %v2236_v60 = vadd.f32 %v2216_v59, %v2062_v57  ;;  %v1266_v57 = vadd.f32 %v3892_v24, %v1132_v51 }
 0x11e   : > { %v2328_v0 = vpop.f32.mrf.mxu1 }
 0x11f   : > { %v2047_v2 = vpop.f32.mrf.mxu3  ;;  %v2248_v37 = vmul.f32 %v3920_v61, %v2236_v60  ;;  %v2349_v27 = vmul.f32 %v3915_v3, %v2328_v0 }
 0x120   : > { %v1798_v1 = vpop.f32.mrf.mxu2 }
 0x121   : > { %v1817_v5 = vadd.f32 %v1798_v1, %v1682_v41  ;;  %v2218_v6 = vpop.f32.mrf.mxu0  ;;  %v2260_v11 = vadd.f32 %v3932_v4, %v2248_v37  ;;  %v1512_v37 = vadd.f32 %v3899_v35, %v1266_v57 }
 0x123   : > { %v2063_v56 = vadd.f32 %v2044_v54, %v1817_v5  ;;  %v2367_v20 = vadd.f32 %v2359_v7, %v2260_v11  ;;  %v2361_v54 = vadd.f32 %v3926_v52, %v2349_v27  ;;  %v1686_v11 = vadd.f32 %v3890_v22, %v1512_v37 }
 0x125   : > { %v2237_v14 = vadd.f32 %v2218_v6, %v2063_v56  ;;  %v2375_v39 = vmax.f32 %v2367_v20, 0.0 }
 0x126   : > { %v2330_v17 = vpop.f32.mrf.mxu1 }
 0x127   : > { %v2249_v15 = vmul.f32 %v3920_v61, %v2237_v14  ;;  %v2049_v26 = vpop.f32.mrf.mxu3  ;;  %v2350_v8 = vmul.f32 %v3915_v3, %v2330_v17 }
 0x128   : > { %v1801_v18 = vpop.f32.mrf.mxu2 }
 0x129   : > { %v2261_v34 = vadd.f32 %v3932_v4, %v2249_v15  ;;  %v1818_v25 = vadd.f32 %v1801_v18, %v1683_v19  ;;  %v2221_v10 = vpop.f32.mrf.mxu0  ;;  %v2362_v0 = vadd.f32 %v3926_v52, %v2350_v8  ;;  %v1134_v18 = vadd.f32 %v3907_v42, %v3882_v62 }
 0x12b   : > { %v2368_v28 = vadd.f32 %v2360_v23, %v2261_v34  ;;  %v2064_v29 = vadd.f32 %v2047_v2, %v1818_v25  ;;  %v1268_v22 = vadd.f32 %v3903_v30, %v1134_v18 }
 0x12d   : > { %v2376_v31 = vmax.f32 %v2368_v28, 0.0  ;;  %v2238_v12 = vadd.f32 %v2221_v10, %v2064_v29 }
 0x12e   : > { %v2333_v33 = vpop.f32.mrf.mxu1 }
 0x12f   : > { %v3188_v40 = vpack.c.bf16 %v2376_v31, %v2375_v39  ;;  %v2250_v45 = vmul.f32 %v3920_v61, %v2238_v12  ;;  %v2052_v49 = vpop.f32.mrf.mxu3  ;;  %v2351_v14 = vmul.f32 %v3915_v3, %v2333_v33 }
 0x130   : > { %v1803_v19 = vpop.f32.mrf.mxu2 }
 0x131   : > { %3189 = vst [vmem:[%s3946_s15] sm:$0xff] %v3188_v40   ;;  %v1819_v48 = vadd.f32 %v1803_v19, %v1684_v43  ;;  %v2223_v21 = vpop.f32.mrf.mxu0  ;;  %v2262_v58 = vadd.f32 %v3932_v4, %v2250_v45  ;;  %v2363_v20 = vadd.f32 %v3926_v52, %v2351_v14  ;;  %v1514_v40 = vadd.f32 %v3909_v50, %v1268_v22 }
 0x133   : > { %v2065_v53 = vadd.f32 %v2049_v26, %v1819_v48  ;;  %v2369_v41 = vadd.f32 %v2361_v54, %v2262_v58  ;;  %v1688_v45 = vadd.f32 %v3901_v38, %v1514_v40 }
 0x135   : > { %v2239_v59 = vadd.f32 %v2223_v21, %v2065_v53  ;;  %v2377_v5 = vmax.f32 %v2369_v41, 0.0 }
 0x136   : > { %v2335_v24 = vpop.f32.mrf.mxu1 }
 0x137   : > { %v2251_v44 = vmul.f32 %v3920_v61, %v2239_v59  ;;  %v2054_v56 = vpop.f32.mrf.mxu3  ;;  %v2352_v34 = vmul.f32 %v3915_v3, %v2335_v24 }
 0x138   : > { %v1806_v60 = vpop.f32.mrf.mxu2 }
 0x139   : > { %v2263_v46 = vadd.f32 %v3932_v4, %v2251_v44  ;;  %v1820_v32 = vadd.f32 %v1806_v60, %v3895_v16  ;;  %v2226_v1 = vpop.f32.mrf.mxu0  ;;  %v2364_v36 = vadd.f32 %v3926_v52, %v2352_v34 }
 0x13b   : > { %v2370_v2 = vadd.f32 %v2362_v0, %v2263_v46  ;;  %v2066_v55 = vadd.f32 %v2052_v49, %v1820_v32 }
 0x13d   : > { %v2378_v6 = vmax.f32 %v2370_v2, 0.0  ;;  %v2240_v63 = vadd.f32 %v2226_v1, %v2066_v55 }
 0x13e   : > { %v2338_v10 = vpop.f32.mrf.mxu1 }
 0x13f   : > { %v3193_v7 = vpack.c.bf16 %v2378_v6, %v2377_v5  ;;  %v2252_v9 = vmul.f32 %v3920_v61, %v2240_v63  ;;  %v2057_v26 = vpop.f32.mrf.mxu3  ;;  %v2353_v21 = vmul.f32 %v3915_v3, %v2338_v10 }
 0x140   : > { %v1808_v13 = vpop.f32.mrf.mxu2 }
 0x141   : > { %3205 = vst [vmem:[%s3946_s15 + $0x8] sm:$0xff] %v3193_v7   ;;  %v1821_v16 = vadd.f32 %v1808_v13, %v1686_v11  ;;  %v2228_v15 = vpop.f32.mrf.mxu0  ;;  %v2264_v23 = vadd.f32 %v3932_v4, %v2252_v9  ;;  %v2365_v50 = vadd.f32 %v3926_v52, %v2353_v21 }
 0x143   : > { %v2067_v35 = vadd.f32 %v2054_v56, %v1821_v16  ;;  %v2371_v29 = vadd.f32 %v2363_v20, %v2264_v23 }
 0x145   : > { %v2241_v25 = vadd.f32 %v2228_v15, %v2067_v35  ;;  %v2379_v43 = vmax.f32 %v2371_v29, 0.0 }
 0x146   : > { %v2340_v33 = vpop.f32.mrf.mxu1 }
 0x147   : > { %v2253_v17 = vmul.f32 %v3920_v61, %v2241_v25  ;;  %v2354_v8 = vmul.f32 %v3915_v3, %v2340_v33 }
 0x148   : > { %v1811_v28 = vpop.f32.mrf.mxu2 }
 0x149   : > { %v2265_v62 = vadd.f32 %v3932_v4, %v2253_v17  ;;  %v1822_v42 = vadd.f32 %v1811_v28, %v3905_v47  ;;  %v2231_v39 = vpop.f32.mrf.mxu0  ;;  %v2059_v47 = vpop.f32.mrf.mxu3  ;;  %v2366_v44 = vadd.f32 %v3926_v52, %v2354_v8 }
 0x14b   : > { %v2372_v31 = vadd.f32 %v2364_v36, %v2265_v62  ;;  %v2068_v12 = vadd.f32 %v2057_v26, %v1822_v42 }
 0x14d   : > { %v2380_v30 = vmax.f32 %v2372_v31, 0.0  ;;  %v2242_v19 = vadd.f32 %v2231_v39, %v2068_v12 }
 0x14f   : > { %v3198_v27 = vpack.c.bf16 %v2380_v30, %v2379_v43  ;;  %v2254_v51 = vmul.f32 %v3920_v61, %v2242_v19 }
 0x150   : > { %v1813_v48 = vpop.f32.mrf.mxu2 }
 0x151   : > { %3206 = vst [vmem:[%s3946_s15 + $0x10] sm:$0xff] %v3198_v27   ;;  %v1823_v53 = vadd.f32 %v1813_v48, %v1688_v45  ;;  %v2233_v54 = vpop.f32.mrf.mxu0  ;;  %v2266_v58 = vadd.f32 %v3932_v4, %v2254_v51 }
 0x153   : > { %v2069_v49 = vadd.f32 %v2059_v47, %v1823_v53  ;;  %v2373_v57 = vadd.f32 %v2365_v50, %v2266_v58 }
 0x155   : > { %v2243_v59 = vadd.f32 %v2233_v54, %v2069_v49  ;;  %v2381_v0 = vmax.f32 %v2373_v57, 0.0 }
 0x157   : > { %v2255_v38 = vmul.f32 %v3920_v61, %v2243_v59 }
 0x159   : > { %v2267_v60 = vadd.f32 %v3932_v4, %v2255_v38 }
 0x15b   : > { %v2374_v41 = vadd.f32 %v2366_v44, %v2267_v60 }
 0x15d   : > { %v2382_v46 = vmax.f32 %v2374_v41, 0.0 }
 0x15f   : > { %v3203_v32 = vpack.c.bf16 %v2382_v46, %v2381_v0 }
 0x161   : > { %3207 = vst [vmem:[%s3946_s15 + $0x18] sm:$0xff] %v3203_v32  }
 0x162 PF: > { %s18_s29 = sadd.s32 1, %s3275_s29   ;;  %s4015_s27 = smov %s3271_s28 }
 0x163   : > { %p15_p5 = scmp.ge.s32.totalorder %s18_s29, 4   ;;  %s4016_s28 = smov %s4018_s30 }
 0x165   :  { %17 = sbr.rel (!%p15_p5) target bundleno = 2 (0x2), region = 113 }

</bundles_post_ra>
